<compile_context>
chip_gen: v6e
topology: v6e:2x2x1
jax: 0.10.0
libtpu: 0.0.40
codegen_flags: <defaults>
</compile_context>

<pallas_src>
import functools

import numpy as np
import jax
import jax.numpy as jnp
from jax.experimental import pallas as pl
from jax.experimental.pallas import tpu as pltpu

OUT_H, OUT_W = 400, 400
_VMEM_BUDGET = 28 * 1024 * 1024          # what we allow our blocks to use
_VMEM_LIMIT = 48 * 1024 * 1024           # scoped VMEM limit (safe on v5e/v6e/v7x)


@functools.lru_cache(maxsize=None)
def _bilinear_matrix(out_size: int, in_size: int, transpose: bool = False):
    """(out_size, in_size) bilinear interpolation matrix, PyTorch half-pixel
    rule (align_corners=False, antialias=False). Cached per shape."""
    scale = in_size / out_size
    src = (np.arange(out_size, dtype=np.float64) + 0.5) * scale - 0.5
    src = np.maximum(src, 0.0)                       # PyTorch clamps negatives
    i0 = np.clip(np.floor(src).astype(np.int64), 0, in_size - 1)
    i1 = np.clip(i0 + 1, 0, in_size - 1)
    lam = (src - i0).astype(np.float32)
    w = np.zeros((out_size, in_size), dtype=np.float32)
    rows = np.arange(out_size)
    np.add.at(w, (rows, i0), 1.0 - lam)
    np.add.at(w, (rows, i1), lam)
    if transpose:
        w = np.ascontiguousarray(w.T)
    return jnp.asarray(w)


def _pad_to(x: int, m: int) -> int:
    return -(-x // m) * m


def _choose_plane_batch(nc: int, h_in: int, w_in: int) -> int:
    """Largest divisor B of nc whose VMEM footprint fits the budget, preferring
    a grid length >= 2 so both v7x TensorCores get work."""
    def est(b):
        in_buf = 2 * b * _pad_to(h_in, 8) * _pad_to(w_in, 128) * 4          # double-buffered input
        out_buf = 2 * b * _pad_to(OUT_H, 8) * _pad_to(OUT_W, 128) * 4        # double-buffered output
        wts = 2 * (_pad_to(OUT_H, 8) * _pad_to(h_in, 128)
                   + _pad_to(w_in, 8) * _pad_to(OUT_W, 128)) * 4             # both weight matrices
        inter = (b * _pad_to(h_in, 8) * _pad_to(OUT_W, 128)
                 + _pad_to(OUT_H, 8) * _pad_to(OUT_W, 128)) * 4              # live f32 intermediates
        return in_buf + out_buf + wts + inter

    divisors = [d for d in range(1, nc + 1) if nc % d == 0]
    cands = [d for d in divisors if est(d) <= _VMEM_BUDGET and (nc // d >= 2 or nc == 1)]
    if not cands:
        # TODO(synk): for very large planes (e.g. 4K downscale) add a K-tiling
        # reduction axis over H_in with a VMEM accumulator instead of B=1.
        return 1
    return max(cands)


def _resize_kernel(x_ref, wh_ref, wwt_ref, o_ref, *, width_first: bool):
    # x_ref:   (B, H_in, W_in)   B channel planes
    # wh_ref:  (OUT_H, H_in)     height interpolation matrix
    # wwt_ref: (W_in, OUT_W)     width interpolation matrix, pre-transposed
    # o_ref:   (B, OUT_H, OUT_W)
    b, h_in, w_in = x_ref.shape

    if width_first:
        if h_in % 8 == 0:
            # One big width-pass matmul: (B*H_in, W_in) @ (W_in, OUT_W).
            # Reshape only merges leading dims (sublane-aligned) -> no relayout.
            x2 = x_ref[...].reshape(b * h_in, w_in)
            tmp = jnp.dot(x2, wwt_ref[...], preferred_element_type=jnp.float32)
            for i in range(b):                                 # static unrolled
                o_ref[i] = jnp.dot(
                    wh_ref[...], tmp[i * h_in:(i + 1) * h_in, :],
                    preferred_element_type=jnp.float32).astype(o_ref.dtype)
        else:
            for i in range(b):
                t = jnp.dot(x_ref[i], wwt_ref[...],
                            preferred_element_type=jnp.float32)      # (H_in, OUT_W)
                o_ref[i] = jnp.dot(wh_ref[...], t,
                                   preferred_element_type=jnp.float32
                                   ).astype(o_ref.dtype)
    else:
        # Height-first: smaller intermediate when W_in < H_in.
        for i in range(b):
            t = jnp.dot(wh_ref[...], x_ref[i],
                        preferred_element_type=jnp.float32)           # (OUT_H, W_in)
            o_ref[i] = jnp.dot(t, wwt_ref[...],
                               preferred_element_type=jnp.float32
                               ).astype(o_ref.dtype)


def _net1_forward_impl(x: jnp.ndarray) -> jnp.ndarray:
    """x: (N, C, H, W) float32 -> (N, C, 400, 400) float32 (bilinear, no antialias)."""
    n, c, h_in, w_in = x.shape
    nc = n * c
    x_flat = x.reshape(nc, h_in, w_in)

    w_h = _bilinear_matrix(OUT_H, h_in)                   # (400, H_in)
    w_w_t = _bilinear_matrix(OUT_W, w_in, transpose=True)  # (W_in, 400)

    b = _choose_plane_batch(nc, h_in, w_in)
    # Order that minimizes the live intermediate (OUT_H == OUT_W, so compare dims).
    width_first = h_in <= w_in

    kernel = functools.partial(_resize_kernel, width_first=width_first)

    out_flat = pl.pallas_call(
        kernel,
        out_shape=jax.ShapeDtypeStruct((nc, OUT_H, OUT_W), x.dtype),
        grid_spec=pltpu.PrefetchScalarGridSpec(
            num_scalar_prefetch=0,
            grid=(nc // b,),
            in_specs=[
                pl.BlockSpec((b, h_in, w_in), lambda i: (i, 0, 0)),
                pl.BlockSpec((OUT_H, h_in), lambda i: (0, 0)),
                pl.BlockSpec((w_in, OUT_W), lambda i: (0, 0)),
            ],
            out_specs=pl.BlockSpec((b, OUT_H, OUT_W), lambda i: (i, 0, 0)),
        ),
        compiler_params=pltpu.CompilerParams(
            dimension_semantics=("parallel",),
            vmem_limit_bytes=_VMEM_LIMIT),
    )(x_flat, w_h, w_w_t)

    return out_flat.reshape(n, c, OUT_H, OUT_W)


net1_forward = jax.jit(_net1_forward_impl)

# TODO(synk): recent torchvision Resize applies antialiasing when DOWNscaling;
# this kernel matches torch.nn.functional.interpolate(mode="bilinear",
# antialias=False), which is exact for upsampling.


if __name__ == "__main__":
    key = jax.random.PRNGKey(0)
    # small NCHW input consistent with an image tensor
    x = jax.random.normal(key, (2, 4, 16, 16), dtype=jnp.float32)

    y = net1_forward(x)
    y = jax.block_until_ready(y)

    assert y.shape == (2, 4, 400, 400), y.shape
    assert y.dtype == jnp.float32

    # sanity check against jax.image.resize (same half-pixel bilinear upsample)
    ref = jax.image.resize(x, (2, 4, 400, 400), method="bilinear")
    assert jnp.allclose(y, ref, atol=1e-4, rtol=1e-4)

    print("KERNEL_OK")
</pallas_src>

<mosaic_0001>
module attributes {stable_mosaic.version = 11 : i64} {
  func.func @_resize_kernel(%arg0: i32, %arg1: memref<4x16x16xf32, #tpu.memory_space<vmem>>, %arg2: memref<400x16xf32, #tpu.memory_space<vmem>>, %arg3: memref<16x400xf32, #tpu.memory_space<vmem>>, %arg4: memref<4x400x400xf32, #tpu.memory_space<vmem>>) attributes {dimension_semantics = [#tpu.dimension_semantics<parallel>], iteration_bounds = array<i64: 2>, scalar_prefetch = 0 : i64, scratch_operands = 0 : i64, tpu.core_type = #tpu.core_type<tc>, window_params = [{transform_indices = @transform_0, window_bounds = array<i64: 4, 16, 16>}, {pipeline_mode = #tpu.pipeline_mode<synchronous>, transform_indices = @transform_1, window_bounds = array<i64: 400, 16>}, {pipeline_mode = #tpu.pipeline_mode<synchronous>, transform_indices = @transform_2, window_bounds = array<i64: 16, 400>}, {transform_indices = @transform_3, window_bounds = array<i64: 4, 400, 400>}]} {
    %c0 = arith.constant 0 : index
    %c0_0 = arith.constant 0 : index
    %c0_1 = arith.constant 0 : index
    %0 = vector.load %arg1[%c0, %c0_0, %c0_1] : memref<4x16x16xf32, #tpu.memory_space<vmem>>, vector<4x16x16xf32>
    %1 = vector.shape_cast %0 : vector<4x16x16xf32> to vector<64x16xf32>
    %c0_2 = arith.constant 0 : index
    %c0_3 = arith.constant 0 : index
    %2 = vector.load %arg3[%c0_2, %c0_3] : memref<16x400xf32, #tpu.memory_space<vmem>>, vector<16x400xf32>
    %cst = arith.constant dense<0.000000e+00> : vector<64x400xf32>
    %3 = tpu.matmul %1, %2, %cst {dimension_numbers = #tpu.dot_dimension_numbers<[1], [0], [0], [1], [0, 0, 1, 1], [], []>} : vector<64x16xf32>, vector<16x400xf32>, vector<64x400xf32> -> vector<64x400xf32>
    %c0_4 = arith.constant 0 : index
    %c0_5 = arith.constant 0 : index
    %4 = vector.load %arg2[%c0_4, %c0_5] : memref<400x16xf32, #tpu.memory_space<vmem>>, vector<400x16xf32>
    %5 = vector.extract_strided_slice %3 {offsets = [0, 0], sizes = [16, 400], strides = [1, 1]} : vector<64x400xf32> to vector<16x400xf32>
    %cst_6 = arith.constant dense<0.000000e+00> : vector<400x400xf32>
    %6 = tpu.matmul %4, %5, %cst_6 {dimension_numbers = #tpu.dot_dimension_numbers<[1], [0], [0], [1], [0, 0, 1, 1], [], []>} : vector<400x16xf32>, vector<16x400xf32>, vector<400x400xf32> -> vector<400x400xf32>
    %c0_7 = arith.constant 0 : index
    %c0_8 = arith.constant 0 : index
    %c0_9 = arith.constant 0 : index
    %7 = vector.load %arg4[%c0_7, %c0_8, %c0_9] : memref<4x400x400xf32, #tpu.memory_space<vmem>>, vector<1x400x400xf32>
    %8 = vector.shape_cast %7 : vector<1x400x400xf32> to vector<400x400xf32>
    %9 = vector.shape_cast %6 : vector<400x400xf32> to vector<1x400x400xf32>
    tpu.vector_store %arg4[%c0_7, %c0_8, %c0_9], %9 {strides = array<i32>} : memref<4x400x400xf32, #tpu.memory_space<vmem>>, vector<1x400x400xf32>,
    %c0_10 = arith.constant 0 : index
    %c0_11 = arith.constant 0 : index
    %10 = vector.load %arg2[%c0_10, %c0_11] : memref<400x16xf32, #tpu.memory_space<vmem>>, vector<400x16xf32>
    %11 = vector.extract_strided_slice %3 {offsets = [16, 0], sizes = [16, 400], strides = [1, 1]} : vector<64x400xf32> to vector<16x400xf32>
    %cst_12 = arith.constant dense<0.000000e+00> : vector<400x400xf32>
    %12 = tpu.matmul %10, %11, %cst_12 {dimension_numbers = #tpu.dot_dimension_numbers<[1], [0], [0], [1], [0, 0, 1, 1], [], []>} : vector<400x16xf32>, vector<16x400xf32>, vector<400x400xf32> -> vector<400x400xf32>
    %c1 = arith.constant 1 : index
    %c0_13 = arith.constant 0 : index
    %c0_14 = arith.constant 0 : index
    %13 = vector.load %arg4[%c1, %c0_13, %c0_14] : memref<4x400x400xf32, #tpu.memory_space<vmem>>, vector<1x400x400xf32>
    %14 = vector.shape_cast %13 : vector<1x400x400xf32> to vector<400x400xf32>
    %15 = vector.shape_cast %12 : vector<400x400xf32> to vector<1x400x400xf32>
    tpu.vector_store %arg4[%c1, %c0_13, %c0_14], %15 {strides = array<i32>} : memref<4x400x400xf32, #tpu.memory_space<vmem>>, vector<1x400x400xf32>,
    %c0_15 = arith.constant 0 : index
    %c0_16 = arith.constant 0 : index
    %16 = vector.load %arg2[%c0_15, %c0_16] : memref<400x16xf32, #tpu.memory_space<vmem>>, vector<400x16xf32>
    %17 = vector.extract_strided_slice %3 {offsets = [32, 0], sizes = [16, 400], strides = [1, 1]} : vector<64x400xf32> to vector<16x400xf32>
    %cst_17 = arith.constant dense<0.000000e+00> : vector<400x400xf32>
    %18 = tpu.matmul %16, %17, %cst_17 {dimension_numbers = #tpu.dot_dimension_numbers<[1], [0], [0], [1], [0, 0, 1, 1], [], []>} : vector<400x16xf32>, vector<16x400xf32>, vector<400x400xf32> -> vector<400x400xf32>
    %c2 = arith.constant 2 : index
    %c0_18 = arith.constant 0 : index
    %c0_19 = arith.constant 0 : index
    %19 = vector.load %arg4[%c2, %c0_18, %c0_19] : memref<4x400x400xf32, #tpu.memory_space<vmem>>, vector<1x400x400xf32>
    %20 = vector.shape_cast %19 : vector<1x400x400xf32> to vector<400x400xf32>
    %21 = vector.shape_cast %18 : vector<400x400xf32> to vector<1x400x400xf32>
    tpu.vector_store %arg4[%c2, %c0_18, %c0_19], %21 {strides = array<i32>} : memref<4x400x400xf32, #tpu.memory_space<vmem>>, vector<1x400x400xf32>,
    %c0_20 = arith.constant 0 : index
    %c0_21 = arith.constant 0 : index
    %22 = vector.load %arg2[%c0_20, %c0_21] : memref<400x16xf32, #tpu.memory_space<vmem>>, vector<400x16xf32>
    %23 = vector.extract_strided_slice %3 {offsets = [48, 0], sizes = [16, 400], strides = [1, 1]} : vector<64x400xf32> to vector<16x400xf32>
    %cst_22 = arith.constant dense<0.000000e+00> : vector<400x400xf32>
    %24 = tpu.matmul %22, %23, %cst_22 {dimension_numbers = #tpu.dot_dimension_numbers<[1], [0], [0], [1], [0, 0, 1, 1], [], []>} : vector<400x16xf32>, vector<16x400xf32>, vector<400x400xf32> -> vector<400x400xf32>
    %c3 = arith.constant 3 : index
    %c0_23 = arith.constant 0 : index
    %c0_24 = arith.constant 0 : index
    %25 = vector.load %arg4[%c3, %c0_23, %c0_24] : memref<4x400x400xf32, #tpu.memory_space<vmem>>, vector<1x400x400xf32>
    %26 = vector.shape_cast %25 : vector<1x400x400xf32> to vector<400x400xf32>
    %27 = vector.shape_cast %24 : vector<400x400xf32> to vector<1x400x400xf32>
    tpu.vector_store %arg4[%c3, %c0_23, %c0_24], %27 {strides = array<i32>} : memref<4x400x400xf32, #tpu.memory_space<vmem>>, vector<1x400x400xf32>,
    return
  }
  func.func @transform_0(%arg0: i32) -> (i32, i32, i32) {
    %c0_i32 = arith.constant 0 : i32
    %c0_i32_0 = arith.constant 0 : i32
    %c0_i32_1 = arith.constant 0 : i32
    return %arg0, %c0_i32, %c0_i32_0 : i32, i32, i32
  }
  func.func @transform_1(%arg0: i32) -> (i32, i32) {
    %c0_i32 = arith.constant 0 : i32
    %c0_i32_0 = arith.constant 0 : i32
    %c0_i32_1 = arith.constant 0 : i32
    return %c0_i32, %c0_i32_0 : i32, i32
  }
  func.func @transform_2(%arg0: i32) -> (i32, i32) {
    %c0_i32 = arith.constant 0 : i32
    %c0_i32_0 = arith.constant 0 : i32
    %c0_i32_1 = arith.constant 0 : i32
    return %c0_i32, %c0_i32_0 : i32, i32
  }
  func.func @transform_3(%arg0: i32) -> (i32, i32, i32) {
    %c0_i32 = arith.constant 0 : i32
    %c0_i32_0 = arith.constant 0 : i32
    %c0_i32_1 = arith.constant 0 : i32
    return %arg0, %c0_i32, %c0_i32_0 : i32, i32, i32
  }
}

</mosaic_0001>

<bundles_post_ra>
// kernel: _net1_forward_impl.1
= control target key start
LH: loop header
LB: loop body
LE: loop exit
PB: predicated region body
PF: predicated region fallthrough
CT: control target
= control target key end

     0   :  { %8 = vsyncpa [#allocation3], 0  ;;  %s8686_s0 = inlined_call_operand.hbm [shape: f32[8,16,16], index: 0, kind: input, shape index: {}]   ;;  %s8687_s1 = inlined_call_operand.hbm [shape: f32[400,16], index: 1, kind: input, shape index: {}]   ;;  %s8688_s2 = inlined_call_operand.hbm [shape: f32[16,400], index: 2, kind: input, shape index: {}]   ;;  %s8689_s3 = inlined_call_operand.hbm [shape: f32[8,400,400], index: 3, kind: output, shape index: {}]  }
   0x1   :  { %10 = vsyncpa [#allocation3 + $0x1], 0 }
   0x2   :  { %11 = vsyncpa [#allocation6], 0 }
   0x3   :  { %12 = vsyncpa [#allocation4], 0 }
   0x4   :  { %14 = vsyncpa [#allocation4 + $0x1], 0  ;;  %s6412_s12 = smov 0   ;;  %s6414_s13 = smov 0  }
   0x5   :  { %s6416_s14 = smov 0   ;;  %s6418_s15 = smov 0  }
   0x6 LB: > { %s6433_s16 = sadd.s32 4294967295, %s6379_s15   ;;  %s5118_s17 = sadd.s32 4294967294, %s6379_s15   ;;  %s6379_s15 = sphi %s6418_s15, %s8710_s15   ;;  %s6375_s14 = sphi %s6416_s14, %s8709_s14   ;;  %s6371_s13 = sphi %s6414_s13, %s8708_s13   ;;  %s6367_s12 = sphi %s6412_s12, %s8707_s12  }
   0x7   : > { %p40_p0 = scmp.ne.s32.totalorder %s6371_s13, %s6367_s12  ;;  %p8690_p1 = scmp.eq.s32.totalorder %s6433_s16, 0 }
   0x8   : > { %p106_p2 = scmp.eq.s32.totalorder %s6433_s16, 1  ;;  %p112_p3 = scmp.eq.s32.totalorder %s5118_s17, 1 }
   0x9   : > { %p6442_p4 = por %p8690_p1, %p40_p0  ;;  %p5119_p5 = scmp.ge.s32.totalorder %s6379_s15, 1 }
   0xa   : > { %p6447_p6 = por %p112_p3, %p40_p0  ;;  %p119_p7 = scmp.lt.s32.totalorder %s6379_s15, 3 }
   0xb   : > { %s8694_s18 = scalar_select %p6442_p4, 1, 0 }
   0xc   : > { %s8695_s19 = scalar_select %p6447_p6, 1, 0 }
   0xd   : > { %p6452_p8 = pnand %p5119_p5, %p119_p7  ;;  %s6381_s21 = smov [#allocation5]  }
   0xe   : > { %s131_s22 = sshll.u32 %s6381_s21, 4  ;;  %s6382_s24 = smov [#allocation7]   ;;  %s132_s22 = int_to_ptr.vmem [resolvable:$true] %s131_s22 }
   0xf   : > { %s8696_s20 = scalar_select %p6452_p8, 1, 0 }
  0x10   : > { %p6168_p9 = pneg %p6452_p8  ;;  %s144_s25 = sshll.u32 %s6382_s24, 4  ;;  %s145_s25 = int_to_ptr.vmem [resolvable:$true] %s144_s25 }
  0x11   : > { %s6242_s26 = scalar_lea.vmem %s132_s22, 6400  ;;  %p6250_p5 = scmp.lt.s32.totalorder %s132_s22, %s132_s22 }
  0x12   : > { %p6461_p11 = pnand %p6168_p9, %p8690_p1  ;;  %p6243_p13 = scmp.ne.s32.totalorder %s132_s22, %s6242_s26 }
  0x13   : > { %p6251_p7 = scmp.lt.s32.totalorder %s6242_s26, %s6242_s26 }
  0x14   : > { %p6233_p12 = pneg %p6461_p11 }
  0x15   : > { %p6252_p10 = por %p6251_p7, %p6250_p5 }
  0x16   : > { %p6245_p0 = pnand %p6243_p13, %p6233_p12 }
  0x18   : > { %p6246_p3 = pneg %p6245_p0 }
  0x1a   : > { %p6253_p9 = pnand %p6252_p10, %p6246_p3 }
  0x1c   : > { %6256 = shalt.err (!%p6253_p9)
}
  0x1d   : > { %s6383_s27 = smov 128   ;;  %s6384_s28 = smov 8  }
  0x1e   : > { %6171 = dma.hbm_to_vmem [thread:$0]  (!%p6461_p11), %s8687_s1, 6400, %s132_s22, [#allocation6], %s6383_s27, %s6383_s27, %s6384_s28  }
  0x1f   : > { %s6268_s4 = scalar_lea.vmem %s145_s25, 1024  ;;  %p6276_p10 = scmp.lt.s32.totalorder %s145_s25, %s145_s25 }
  0x20   : > { %p6269_p13 = scmp.ne.s32.totalorder %s145_s25, %s6268_s4  ;;  %p6277_p3 = scmp.lt.s32.totalorder %s6268_s4, %s6268_s4 }
  0x22   : > { %p6271_p0 = pnand %p6269_p13, %p6233_p12  ;;  %p6278_p7 = por %p6277_p3, %p6276_p10 }
  0x24   : > { %p6272_p5 = pneg %p6271_p0 }
  0x26   : > { %p6279_p9 = pnand %p6278_p7, %p6272_p5 }
  0x28   : > { %6282 = shalt.err (!%p6279_p9)
}
  0x29   : > { %s6385_s5 = smov 512   ;;  %s6386_s6 = smov 32  }
  0x2a   : > { %6174 = dma.hbm_to_vmem [thread:$0]  (!%p6461_p11), %s8688_s2, 1024, %s145_s25, [#allocation6], %s6385_s5, %s6385_s5, %s6386_s6  }
  0x2b   : > { %s6487_s9 = sadd.s32 1, %s6379_s15   ;;  %s27_s11 = sadd.s32 1, %s6375_s14 }
  0x2c   : > { %s24_s10 = ssub.s32 %s6379_s15, %s6487_s9  ;;  %p34_p13 = scmp.ne.s32.totalorder %s6375_s14, %s6371_s13 }
  0x2d   : > { %p25_p12 = scmp.eq.s32.totalorder %s24_s10, 0  ;;  %p35_p0 = scmp.eq.s32.totalorder %s6379_s15, 0 }
  0x2e   : > { %p6500_p10 = por %p106_p2, %p34_p13  ;;  %p6185_p3 = scmp.lt.s32.totalorder %s6379_s15, 2 }
  0x2f   : > { %s6496_s17 = scalar_select %p25_p12, %s6375_s14, %s27_s11  }
  0x30   : > { %p36_p5 = por %p35_p0, %p34_p13  ;;  %s158_s22 = sand.u32 1, %s6375_s14  }
  0x31   : > { %s8698_s21 = scalar_select %p6500_p10, 1, 0 }
  0x32   : > { %s5123_s23 = sshll.u32 %s158_s22, 6  ;;  %s6153_s24 = sshll.u32 %s6379_s15, 10 }
  0x33   : > { %s6510_s29 = scalar_lea.hbm %s8686_s0, %s6153_s24  ;;  %s162_s30 = scalar_lea.vmem [#allocation2], %s5123_s23 }
  0x34   : > { %s170_s4 = sshll.u32 %s162_s30, 4  ;;  %p6514_p2 = pnand %p6185_p3, %p36_p5  ;;  %s6512_s4 = int_to_ptr.vmem [resolvable:$true] %s170_s4 }
  0x35   : > { %s6518_s6 = scalar_lea.sflag [#allocation3], %s158_s22  ;;  %s6283_s7 = scalar_lea.hbm %s6510_s29, 1024 }
  0x36   : > { %p6284_p11 = scmp.ne.s32.totalorder %s6510_s29, %s6283_s7  ;;  %p6285_p7 = pneg %p6514_p2 }
  0x37   : > { %s6288_s11 = scalar_lea.hbm %s8686_s0, 2048  ;;  %p6289_p13 = scmp.lt.s32.totalorder %s6510_s29, %s8686_s0 }
  0x38   : > { %p6286_p9 = pnand %p6285_p7, %p6284_p11  ;;  %p6290_p0 = scmp.lt.s32.totalorder %s6288_s11, %s6283_s7 }
  0x3a   : > { %p6287_p12 = pneg %p6286_p9  ;;  %p6291_p5 = por %p6290_p0, %p6289_p13 }
  0x3c   : > { %p6292_p3 = pnand %p6291_p5, %p6287_p12 }
  0x3e   : > { %6295 = shalt.err (!%p6292_p3)
}
  0x3f   : > { %s6296_s22 = scalar_lea.vmem %s6512_s4, 1024  ;;  %s6387_s25 = smov [#allocation2]  }
  0x40   : > { %p6297_p1 = scmp.ne.s32.totalorder %s6512_s4, %s6296_s22  ;;  %s6301_s26 = sshll.u32 %s6387_s25, 4  ;;  %s6302_s26 = int_to_ptr.vmem [resolvable:$false] %s6301_s26 }
  0x41   : > { %s6303_s30 = scalar_lea.vmem %s6302_s26, 2048  ;;  %p6304_p9 = scmp.lt.s32.totalorder %s6512_s4, %s6302_s26 }
  0x42   : > { %p6299_p6 = pnand %p6297_p1, %p6285_p7  ;;  %p6305_p10 = scmp.lt.s32.totalorder %s6303_s30, %s6296_s22 }
  0x44   : > { %p6300_p11 = pneg %p6299_p6  ;;  %p6306_p4 = por %p6305_p10, %p6304_p9 }
  0x46   : > { %p6307_p8 = pnand %p6306_p4, %p6300_p11 }
  0x48   : > { %6310 = shalt.err (!%p6307_p8)
}
  0x49   : > { %6178 = dma.hbm_to_vmem [thread:$0]  (!%p6514_p2), %s6510_s29, 1024, %s6512_s4, %s6518_s6, %s6383_s27, %s6383_s27, %s6384_s28  }
  0x4a   : > { %p8700_p1 = scmp.ne.s32.totalorder %s8696_s20, 0 }
  0x4b   : > { %s6545_s7 = sand.u32 (!%p8700_p1), 1, %s6371_s13   ;;  %p8701_p4 = scmp.ne.s32.totalorder (!%p8700_p1), %s8694_s18, 0 }
  0x4c   : > { %182 = sbr.rel (%p8700_p1) target bundleno = 1300 (0x514), region = 32  ;;  %s5128_s8 = sshll.u32 (!%p8700_p1), %s6545_s7, 6 }
  0x4d   : > { %s185_s10 = scalar_lea.sflag (!%p8700_p1), [#allocation3], %s6545_s7  ;;  %s6549_s11 = scalar_lea.vmem (!%p8700_p1), [#allocation2], %s5128_s8 }
  0x51   : > { %6354 = dma.done.wait (%p8701_p4), %s185_s10, 1024  }
  0x52   : > { %6356 = vsyncadd (%p8701_p4), %s185_s10, 4294966272  ;;  %p8702_p6 = scmp.eq.s32.totalorder %s6433_s16, 0 }
  0x54   : > { %6358 = dma.done.wait (%p8702_p6), [#allocation6], 7424   ;;  %p8703_p8 = pmov %p8702_p6 }
  0x55   : > { %v6388_v0 = vmov 0.0   ;;  %v234_v1 = vld [vmem:[#allocation7 + $0x28] sm:$0xff]  ;;  %v236_v2 = vld [vmem:[#allocation7 + $0x38] sm:$0xff]  ;;  %v233_v3 = vld [vmem:[#allocation7 + $0x20] sm:$0xff]  ;;  %vm237_vm0 = vcmask 130048   ;;  %s6154_s18 = smul.u32 6400, %s6545_s7 }
  0x56   : > { %6360 = vsyncadd (%p8703_p8), [#allocation6], 4294959872  ;;  %326 = vmatprep.mubr.f32.mxu0 %v6388_v0  ;;  %439 = vmatprep.mubr.f32.mxu1 %v6388_v0  ;;  %v235_v4 = vld [vmem:[#allocation7 + $0x30] sm:$0xff]  ;;  %v230_v5 = vld [vmem:[#allocation7 + $0x8] sm:$0xff]  ;;  %s6155_s27 = smul.u32 102400, %s6433_s16  ;;  %s5012_s16 = scalar_lea.sflag [#allocation4], %s6545_s7 }
  0x57   : > { %290 = vmatprep.subr.mxu0 %v234_v1  ;;  %403 = vmatprep.subr.mxu1 %v236_v2  ;;  %v232_v6 = vld [vmem:[#allocation7 + $0x18] sm:$0xff]  ;;  %v229_v7 = vld [vmem:[#allocation7] sm:$0xff]  ;;  %v231_v8 = vld [vmem:[#allocation7 + $0x10] sm:$0xff]  ;;  %s6954_s20 = scalar_lea.vmem [#allocation8], %s6154_s18  ;;  %p8704_p2 = scmp.ne.s32.totalorder %s8698_s21, 0 }
  0x58   : > { %291 = vmatpush1.msra.mxu0 %v233_v3  ;;  %404 = vmatpush1.msra.mxu1 %v235_v4  ;;  %v221_v9 = vld [vmem:[%s6549_s11] sm:$0xff]  ;;  %v222_v10 = vld [vmem:[%s6549_s11 + $0x8] sm:$0xff]  ;;  %v223_v11 = vld [vmem:[%s6549_s11 + $0x10] sm:$0xff]  ;;  %s5026_s28 = sshll.u32 %s6954_s20, 4  ;;  %s8636_s5 = scalar_lea.hbm %s8689_s3, %s6155_s27  ;;  %s8640_s28 = int_to_ptr.vmem [resolvable:$true] %s5026_s28 }
  0x59   : > { %292 = vmatprep.subr.mxu0 %v230_v5  ;;  %405 = vmatprep.subr.mxu1 %v232_v6  ;;  %v224_v12 = vld [vmem:[%s6549_s11 + $0x18] sm:$0xff]  ;;  %v225_v13 = vld [vmem:[%s6549_s11 + $0x20] sm:$0xff]  ;;  %v226_v14 = vld [vmem:[%s6549_s11 + $0x28] sm:$0xff]  ;;  %s6311_s6 = scalar_lea.vmem %s8640_s28, 102400  ;;  %s6389_s23 = smov [#allocation8]  }
  0x5a   : > { %293 = vmatpush1.msra.mxu0 %v229_v7  ;;  %406 = vmatpush1.msra.mxu1 %v231_v8  ;;  %v227_v15 = vld [vmem:[%s6549_s11 + $0x30] sm:$0xff]  ;;  %v228_v16 = vld [vmem:[%s6549_s11 + $0x38] sm:$0xff]  ;;  %v6601_v25 = vld [vmem:[#allocation5] sm:$0xff]  ;;  %p6312_p10 = scmp.ne.s32.totalorder %s8640_s28, %s6311_s6  ;;  %s6315_s24 = sshll.u32 %s6389_s23, 4  ;;  %s6316_s24 = int_to_ptr.vmem [resolvable:$false] %s6315_s24 }
  0x5b   : > { %5131 = vmatmul.mubr.msk.f32.vlgmr.msra.gmra.mxu0 %vm237_vm0, %v221_v9  ;;  %5139 = vmatmul.mubr.msk.f32.vlgmr.msra.gmra.mxu1 %vm237_vm0, %v221_v9  ;;  %v6609_v30 = vld [vmem:[#allocation5 + $0x8] sm:$0xff]  ;;  %v6617_v35 = vld [vmem:[#allocation5 + $0x10] sm:$0xff]  ;;  %v6625_v36 = vld [vmem:[#allocation5 + $0x18] sm:$0xff]  ;;  %s6317_s22 = scalar_lea.vmem %s6316_s24, 204800  ;;  %p6318_p13 = scmp.lt.s32.totalorder %s8640_s28, %s6316_s24 }
  0x5c   : > { %332 = vmatprep.mubr.f32.mxu0 %v6388_v0  ;;  %445 = vmatprep.mubr.f32.mxu1 %v6388_v0  ;;  %v6633_v37 = vld [vmem:[#allocation5 + $0x20] sm:$0xff]  ;;  %v6641_v38 = vld [vmem:[#allocation5 + $0x28] sm:$0xff]  ;;  %v6649_v39 = vld [vmem:[#allocation5 + $0x30] sm:$0xff]  ;;  %p6313_p7 = pnand %p6312_p10, %p8704_p2  ;;  %p6319_p0 = scmp.lt.s32.totalorder %s6317_s22, %s6311_s6 }
  0x5d   : > { %v6657_v40 = vld [vmem:[#allocation5 + $0x38] sm:$0xff]  ;;  %v6665_v41 = vld [vmem:[#allocation5 + $0x40] sm:$0xff]  ;;  %v6673_v42 = vld [vmem:[#allocation5 + $0x48] sm:$0xff] }
  0x5e   : > { %v6681_v43 = vld [vmem:[#allocation5 + $0x50] sm:$0xff]  ;;  %v6689_v44 = vld [vmem:[#allocation5 + $0x58] sm:$0xff]  ;;  %v6697_v45 = vld [vmem:[#allocation5 + $0x60] sm:$0xff]  ;;  %p6314_p12 = pneg %p6313_p7  ;;  %p6320_p5 = por %p6319_p0, %p6318_p13 }
  0x5f   : > { %5132 = vmatmul.mubr.msk.f32.gmra.mxu0 %vm237_vm0, %v222_v10  ;;  %5140 = vmatmul.mubr.msk.f32.gmra.mxu1 %vm237_vm0, %v222_v10  ;;  %v6713_v50 = vld [vmem:[#allocation5 + $0x68] sm:$0xff]  ;;  %v6725_v55 = vld [vmem:[#allocation5 + $0x70] sm:$0xff]  ;;  %v6733_v56 = vld [vmem:[#allocation5 + $0x78] sm:$0xff] }
  0x60   : > { %338 = vmatprep.mubr.f32.mxu0 %v6388_v0  ;;  %451 = vmatprep.mubr.f32.mxu1 %v6388_v0  ;;  %v6741_v57 = vld [vmem:[#allocation5 + $0x80] sm:$0xff]  ;;  %v6749_v58 = vld [vmem:[#allocation5 + $0x88] sm:$0xff]  ;;  %v6757_v59 = vld [vmem:[#allocation5 + $0x90] sm:$0xff]  ;;  %p6321_p3 = pnand %p6320_p5, %p6314_p12 }
  0x61   : > { %v6765_v60 = vld [vmem:[#allocation5 + $0x98] sm:$0xff]  ;;  %v6773_v61 = vld [vmem:[#allocation5 + $0xa0] sm:$0xff]  ;;  %v6781_v62 = vld [vmem:[#allocation5 + $0xa8] sm:$0xff] }
  0x62   : > { %v6789_v63 = vld [vmem:[#allocation5 + $0xb0] sm:$0xff]  ;;  %v6797_v1 = vld [vmem:[#allocation5 + $0xb8] sm:$0xff]  ;;  %v6805_v2 = vld [vmem:[#allocation5 + $0xc0] sm:$0xff] }
  0x63   : > { %5133 = vmatmul.mubr.msk.f32.gmra.mxu0 %vm237_vm0, %v223_v11  ;;  %5141 = vmatmul.mubr.msk.f32.gmra.mxu1 %vm237_vm0, %v223_v11  ;;  %v6813_v3 = vld [vmem:[#allocation5 + $0xc8] sm:$0xff]  ;;  %v6821_v4 = vld [vmem:[#allocation5 + $0xd0] sm:$0xff]  ;;  %v6829_v5 = vld [vmem:[#allocation5 + $0xd8] sm:$0xff] }
  0x64   : > { %344 = vmatprep.mubr.f32.mxu0 %v6388_v0  ;;  %457 = vmatprep.mubr.f32.mxu1 %v6388_v0  ;;  %v6837_v6 = vld [vmem:[#allocation5 + $0xe0] sm:$0xff]  ;;  %v6845_v7 = vld [vmem:[#allocation5 + $0xe8] sm:$0xff]  ;;  %v6853_v8 = vld [vmem:[#allocation5 + $0xf0] sm:$0xff] }
  0x65   : > { %v6861_v9 = vld [vmem:[#allocation5 + $0xf8] sm:$0xff]  ;;  %v6869_v10 = vld [vmem:[#allocation5 + $0x100] sm:$0xff]  ;;  %v521_v11 = vld [vmem:[#allocation5 + $0x108] sm:$0xff] }
  0x67   : > { %5134 = vmatmul.mubr.msk.f32.gmra.mxu0 %vm237_vm0, %v224_v12  ;;  %5142 = vmatmul.mubr.msk.f32.gmra.mxu1 %vm237_vm0, %v224_v12  ;;  %v522_v12 = vld [vmem:[#allocation5 + $0x110] sm:$0xff] }
  0x68   : > { %350 = vmatprep.mubr.f32.mxu0 %v6388_v0  ;;  %463 = vmatprep.mubr.f32.mxu1 %v6388_v0 }
  0x6b   : > { %5135 = vmatmul.mubr.msk.f32.gmra.mxu0 %vm237_vm0, %v225_v13  ;;  %5143 = vmatmul.mubr.msk.f32.gmra.mxu1 %vm237_vm0, %v225_v13  ;;  %v523_v13 = vld [vmem:[#allocation5 + $0x118] sm:$0xff] }
  0x6c   : > { %356 = vmatprep.mubr.f32.mxu0 %v6388_v0  ;;  %469 = vmatprep.mubr.f32.mxu1 %v6388_v0 }
  0x6f   : > { %5136 = vmatmul.mubr.msk.f32.gmra.mxu0 %vm237_vm0, %v226_v14  ;;  %5144 = vmatmul.mubr.msk.f32.gmra.mxu1 %vm237_vm0, %v226_v14  ;;  %v524_v14 = vld [vmem:[#allocation5 + $0x120] sm:$0xff] }
  0x70   : > { %362 = vmatprep.mubr.f32.mxu0 %v6388_v0  ;;  %475 = vmatprep.mubr.f32.mxu1 %v6388_v0 }
  0x73   : > { %5137 = vmatmul.mubr.msk.f32.gmra.mxu0 %vm237_vm0, %v227_v15  ;;  %5145 = vmatmul.mubr.msk.f32.gmra.mxu1 %vm237_vm0, %v227_v15  ;;  %v525_v15 = vld [vmem:[#allocation5 + $0x128] sm:$0xff] }
  0x74   : > { %368 = vmatprep.mubr.f32.mxu0 %v6388_v0  ;;  %481 = vmatprep.mubr.f32.mxu1 %v6388_v0 }
  0x77   : > { %5138 = vmatmul.mubr.msk.f32.gmra.mxu0 %vm237_vm0, %v228_v16  ;;  %5146 = vmatmul.mubr.msk.f32.gmra.mxu1 %vm237_vm0, %v228_v16  ;;  %v526_v16 = vld [vmem:[#allocation5 + $0x130] sm:$0xff] }
  0x78   : > { %752 = vmatprep.mubr.f32.mxu0 %v6388_v0  ;;  %1117 = vmatprep.mubr.f32.mxu1 %v6388_v0 }
 0x11b   : > { %v328_v17 = vpop.f32.mrf.mxu0  ;;  %v441_v18 = vpop.f32.mrf.mxu1 }
 0x11d   : > { %v330_v19 = vpop.f32.mrf.mxu0  ;;  %v443_v20 = vpop.f32.mrf.mxu1 }
 0x11f   : > { %v334_v21 = vpop.f32.mrf.mxu0  ;;  %v447_v22 = vpop.f32.mrf.mxu1 }
 0x121   : > { %v336_v23 = vpop.f32.mrf.mxu0  ;;  %v449_v24 = vpop.f32.mrf.mxu1 }
 0x122   : > { %716 = vmatprep.subr.mxu0 %v336_v23  ;;  %1081 = vmatprep.subr.mxu1 %v449_v24  ;;  %v533_v23 = vld [vmem:[#allocation5 + $0x168] sm:$0xff] }
 0x123   : > { %717 = vmatpush1.msra.mxu0 %v334_v21  ;;  %1082 = vmatpush1.msra.mxu1 %v447_v22  ;;  %v340_v26 = vpop.f32.mrf.mxu0  ;;  %v453_v27 = vpop.f32.mrf.mxu1  ;;  %v531_v21 = vld [vmem:[#allocation5 + $0x158] sm:$0xff]  ;;  %v532_v22 = vld [vmem:[#allocation5 + $0x160] sm:$0xff] }
 0x124   : > { %718 = vmatprep.subr.mxu0 %v330_v19  ;;  %1083 = vmatprep.subr.mxu1 %v443_v20  ;;  %v529_v19 = vld [vmem:[#allocation5 + $0x148] sm:$0xff]  ;;  %v530_v20 = vld [vmem:[#allocation5 + $0x150] sm:$0xff] }
 0x125   : > { %719 = vmatpush1.msra.mxu0 %v328_v17  ;;  %1084 = vmatpush1.msra.mxu1 %v441_v18  ;;  %v342_v28 = vpop.f32.mrf.mxu0  ;;  %v455_v29 = vpop.f32.mrf.mxu1  ;;  %v527_v17 = vld [vmem:[#allocation5 + $0x138] sm:$0xff]  ;;  %v528_v18 = vld [vmem:[#allocation5 + $0x140] sm:$0xff] }
 0x126   : > { %5147 = vmatmul.mubr.msk.f32.vlgmr.msra.gmra.mxu0 %vm237_vm0, %v6601_v25  ;;  %5197 = vmatmul.mubr.msk.f32.vlgmr.msra.gmra.mxu1 %vm237_vm0, %v6601_v25 }
 0x127   : > { %758 = vmatprep.mubr.f32.mxu0 %v6388_v0  ;;  %1123 = vmatprep.mubr.f32.mxu1 %v6388_v0  ;;  %v346_v31 = vpop.f32.mrf.mxu0  ;;  %v459_v32 = vpop.f32.mrf.mxu1 }
 0x129   : > { %v348_v33 = vpop.f32.mrf.mxu0  ;;  %v461_v34 = vpop.f32.mrf.mxu1 }
 0x12a   : > { %5148 = vmatmul.mubr.msk.f32.gmra.mxu0 %vm237_vm0, %v6609_v30  ;;  %5198 = vmatmul.mubr.msk.f32.gmra.mxu1 %vm237_vm0, %v6609_v30 }
 0x12b   : > { %764 = vmatprep.mubr.f32.mxu0 %v6388_v0  ;;  %1129 = vmatprep.mubr.f32.mxu1 %v6388_v0  ;;  %v6699_v46 = vpop.f32.mrf.mxu0  ;;  %v6701_v47 = vpop.f32.mrf.mxu1 }
 0x12c   : > { %1846 = vmatprep.subr.mxu0 %v348_v33  ;;  %2211 = vmatprep.subr.mxu1 %v461_v34  ;;  %v536_v34 = vld [vmem:[#allocation5 + $0x180] sm:$0xff] }
 0x12d   : > { %1847 = vmatpush1.msra.mxu0 %v346_v31  ;;  %2212 = vmatpush1.msra.mxu1 %v459_v32  ;;  %v6707_v48 = vpop.f32.mrf.mxu0  ;;  %v6709_v49 = vpop.f32.mrf.mxu1  ;;  %v535_v31 = vld [vmem:[#allocation5 + $0x178] sm:$0xff] }
 0x12e   : > { %5149 = vmatmul.mubr.msk.f32.gmra.mxu0 %vm237_vm0, %v6617_v35  ;;  %5199 = vmatmul.mubr.msk.f32.gmra.mxu1 %vm237_vm0, %v6617_v35 }
 0x12f   : > { %770 = vmatprep.mubr.f32.mxu0 %v6388_v0  ;;  %1135 = vmatprep.mubr.f32.mxu1 %v6388_v0  ;;  %v6715_v51 = vpop.f32.mrf.mxu0  ;;  %v6717_v52 = vpop.f32.mrf.mxu1 }
 0x130   : > { %1848 = vmatprep.subr.mxu0 %v342_v28  ;;  %2213 = vmatprep.subr.mxu1 %v455_v29 }
 0x131   : > { %1849 = vmatpush1.msra.mxu0 %v340_v26  ;;  %2214 = vmatpush1.msra.mxu1 %v453_v27  ;;  %v360_v53 = vpop.f32.mrf.mxu0  ;;  %v473_v54 = vpop.f32.mrf.mxu1  ;;  %v534_v27 = vld [vmem:[#allocation5 + $0x170] sm:$0xff] }
 0x132   : > { %5150 = vmatmul.mubr.msk.f32.gmra.mxu0 %vm237_vm0, %v6625_v36  ;;  %5200 = vmatmul.mubr.msk.f32.gmra.mxu1 %vm237_vm0, %v6625_v36 }
 0x133   : > { %776 = vmatprep.mubr.f32.mxu0 %v6388_v0  ;;  %1141 = vmatprep.mubr.f32.mxu1 %v6388_v0  ;;  %v6925_v24 = vpop.f32.mrf.mxu0  ;;  %v6927_v26 = vpop.f32.mrf.mxu1 }
 0x134   : > { %2977 = vmatprep.subr.mxu0 %v360_v53  ;;  %3342 = vmatprep.subr.mxu1 %v473_v54 }
 0x135   : > { %v6933_v28 = vpop.f32.mrf.mxu0  ;;  %v6935_v29 = vpop.f32.mrf.mxu1 }
 0x136   : > { %5151 = vmatmul.mubr.msk.f32.gmra.mxu0 %vm237_vm0, %v6633_v37  ;;  %5201 = vmatmul.mubr.msk.f32.gmra.mxu1 %vm237_vm0, %v6633_v37 }
 0x137   : > { %782 = vmatprep.mubr.f32.mxu0 %v6388_v0  ;;  %1147 = vmatprep.mubr.f32.mxu1 %v6388_v0  ;;  %v6941_v32 = vpop.f32.mrf.mxu0  ;;  %v6943_v33 = vpop.f32.mrf.mxu1 }
 0x139   : > { %v372_v53 = vpop.f32.mrf.mxu0  ;;  %v485_v54 = vpop.f32.mrf.mxu1 }
 0x13a   : > { %5152 = vmatmul.mubr.msk.f32.gmra.mxu0 %vm237_vm0, %v6641_v38  ;;  %5202 = vmatmul.mubr.msk.f32.gmra.mxu1 %vm237_vm0, %v6641_v38 }
 0x13b   : > { %788 = vmatprep.mubr.f32.mxu0 %v6388_v0  ;;  %1153 = vmatprep.mubr.f32.mxu1 %v6388_v0 }
 0x13e   : > { %5153 = vmatmul.mubr.msk.f32.gmra.mxu0 %vm237_vm0, %v6649_v39  ;;  %5203 = vmatmul.mubr.msk.f32.gmra.mxu1 %vm237_vm0, %v6649_v39 }
 0x13f   : > { %794 = vmatprep.mubr.f32.mxu0 %v6388_v0  ;;  %1159 = vmatprep.mubr.f32.mxu1 %v6388_v0 }
 0x142   : > { %5154 = vmatmul.mubr.msk.f32.gmra.mxu0 %vm237_vm0, %v6657_v40  ;;  %5204 = vmatmul.mubr.msk.f32.gmra.mxu1 %vm237_vm0, %v6657_v40 }
 0x143   : > { %800 = vmatprep.mubr.f32.mxu0 %v6388_v0  ;;  %1165 = vmatprep.mubr.f32.mxu1 %v6388_v0 }
 0x146   : > { %5155 = vmatmul.mubr.msk.f32.gmra.mxu0 %vm237_vm0, %v6665_v41  ;;  %5205 = vmatmul.mubr.msk.f32.gmra.mxu1 %vm237_vm0, %v6665_v41 }
 0x147   : > { %806 = vmatprep.mubr.f32.mxu0 %v6388_v0  ;;  %1171 = vmatprep.mubr.f32.mxu1 %v6388_v0 }
 0x14a   : > { %5156 = vmatmul.mubr.msk.f32.gmra.mxu0 %vm237_vm0, %v6673_v42  ;;  %5206 = vmatmul.mubr.msk.f32.gmra.mxu1 %vm237_vm0, %v6673_v42 }
 0x14b   : > { %812 = vmatprep.mubr.f32.mxu0 %v6388_v0  ;;  %1177 = vmatprep.mubr.f32.mxu1 %v6388_v0 }
 0x14e   : > { %5157 = vmatmul.mubr.msk.f32.gmra.mxu0 %vm237_vm0, %v6681_v43  ;;  %5207 = vmatmul.mubr.msk.f32.gmra.mxu1 %vm237_vm0, %v6681_v43 }
 0x14f   : > { %818 = vmatprep.mubr.f32.mxu0 %v6388_v0  ;;  %1183 = vmatprep.mubr.f32.mxu1 %v6388_v0 }
 0x152   : > { %5158 = vmatmul.mubr.msk.f32.gmra.mxu0 %vm237_vm0, %v6689_v44  ;;  %5208 = vmatmul.mubr.msk.f32.gmra.mxu1 %vm237_vm0, %v6689_v44 }
 0x153   : > { %824 = vmatprep.mubr.f32.mxu0 %v6388_v0  ;;  %1189 = vmatprep.mubr.f32.mxu1 %v6388_v0 }
 0x156   : > { %5159 = vmatmul.mubr.msk.f32.gmra.mxu0 %vm237_vm0, %v6697_v45  ;;  %5209 = vmatmul.mubr.msk.f32.gmra.mxu1 %vm237_vm0, %v6697_v45 }
 0x157   : > { %830 = vmatprep.mubr.f32.mxu0 %v6388_v0  ;;  %1195 = vmatprep.mubr.f32.mxu1 %v6388_v0 }
 0x15a   : > { %5160 = vmatmul.mubr.msk.f32.gmra.mxu0 %vm237_vm0, %v6713_v50  ;;  %5210 = vmatmul.mubr.msk.f32.gmra.mxu1 %vm237_vm0, %v6713_v50 }
 0x15b   : > { %836 = vmatprep.mubr.f32.mxu0 %v6388_v0  ;;  %1201 = vmatprep.mubr.f32.mxu1 %v6388_v0 }
 0x15e   : > { %5161 = vmatmul.mubr.msk.f32.gmra.mxu0 %vm237_vm0, %v6725_v55  ;;  %5211 = vmatmul.mubr.msk.f32.gmra.mxu1 %vm237_vm0, %v6725_v55 }
 0x15f   : > { %842 = vmatprep.mubr.f32.mxu0 %v6388_v0  ;;  %1207 = vmatprep.mubr.f32.mxu1 %v6388_v0 }
 0x162   : > { %5162 = vmatmul.mubr.msk.f32.gmra.mxu0 %vm237_vm0, %v6733_v56  ;;  %5212 = vmatmul.mubr.msk.f32.gmra.mxu1 %vm237_vm0, %v6733_v56 }
 0x163   : > { %848 = vmatprep.mubr.f32.mxu0 %v6388_v0  ;;  %1213 = vmatprep.mubr.f32.mxu1 %v6388_v0 }
 0x166   : > { %5163 = vmatmul.mubr.msk.f32.gmra.mxu0 %vm237_vm0, %v6741_v57  ;;  %5213 = vmatmul.mubr.msk.f32.gmra.mxu1 %vm237_vm0, %v6741_v57 }
 0x167   : > { %854 = vmatprep.mubr.f32.mxu0 %v6388_v0  ;;  %1219 = vmatprep.mubr.f32.mxu1 %v6388_v0 }
 0x16a   : > { %5164 = vmatmul.mubr.msk.f32.gmra.mxu0 %vm237_vm0, %v6749_v58  ;;  %5214 = vmatmul.mubr.msk.f32.gmra.mxu1 %vm237_vm0, %v6749_v58 }
 0x16b   : > { %860 = vmatprep.mubr.f32.mxu0 %v6388_v0  ;;  %1225 = vmatprep.mubr.f32.mxu1 %v6388_v0 }
 0x16e   : > { %5165 = vmatmul.mubr.msk.f32.gmra.mxu0 %vm237_vm0, %v6757_v59  ;;  %5215 = vmatmul.mubr.msk.f32.gmra.mxu1 %vm237_vm0, %v6757_v59 }
 0x16f   : > { %866 = vmatprep.mubr.f32.mxu0 %v6388_v0  ;;  %1231 = vmatprep.mubr.f32.mxu1 %v6388_v0 }
 0x172   : > { %5166 = vmatmul.mubr.msk.f32.gmra.mxu0 %vm237_vm0, %v6765_v60  ;;  %5216 = vmatmul.mubr.msk.f32.gmra.mxu1 %vm237_vm0, %v6765_v60 }
 0x173   : > { %872 = vmatprep.mubr.f32.mxu0 %v6388_v0  ;;  %1237 = vmatprep.mubr.f32.mxu1 %v6388_v0 }
 0x176   : > { %5167 = vmatmul.mubr.msk.f32.gmra.mxu0 %vm237_vm0, %v6773_v61  ;;  %5217 = vmatmul.mubr.msk.f32.gmra.mxu1 %vm237_vm0, %v6773_v61 }
 0x177   : > { %878 = vmatprep.mubr.f32.mxu0 %v6388_v0  ;;  %1243 = vmatprep.mubr.f32.mxu1 %v6388_v0 }
 0x17a   : > { %5168 = vmatmul.mubr.msk.f32.gmra.mxu0 %vm237_vm0, %v6781_v62  ;;  %5218 = vmatmul.mubr.msk.f32.gmra.mxu1 %vm237_vm0, %v6781_v62 }
 0x17b   : > { %884 = vmatprep.mubr.f32.mxu0 %v6388_v0  ;;  %1249 = vmatprep.mubr.f32.mxu1 %v6388_v0 }
 0x17e   : > { %5169 = vmatmul.mubr.msk.f32.gmra.mxu0 %vm237_vm0, %v6789_v63  ;;  %5219 = vmatmul.mubr.msk.f32.gmra.mxu1 %vm237_vm0, %v6789_v63 }
 0x17f   : > { %890 = vmatprep.mubr.f32.mxu0 %v6388_v0  ;;  %1255 = vmatprep.mubr.f32.mxu1 %v6388_v0 }
 0x182   : > { %5170 = vmatmul.mubr.msk.f32.gmra.mxu0 %vm237_vm0, %v6797_v1  ;;  %5220 = vmatmul.mubr.msk.f32.gmra.mxu1 %vm237_vm0, %v6797_v1 }
 0x183   : > { %896 = vmatprep.mubr.f32.mxu0 %v6388_v0  ;;  %1261 = vmatprep.mubr.f32.mxu1 %v6388_v0 }
 0x186   : > { %5171 = vmatmul.mubr.msk.f32.gmra.mxu0 %vm237_vm0, %v6805_v2  ;;  %5221 = vmatmul.mubr.msk.f32.gmra.mxu1 %vm237_vm0, %v6805_v2 }
 0x187   : > { %902 = vmatprep.mubr.f32.mxu0 %v6388_v0  ;;  %1267 = vmatprep.mubr.f32.mxu1 %v6388_v0 }
 0x18a   : > { %5172 = vmatmul.mubr.msk.f32.gmra.mxu0 %vm237_vm0, %v6813_v3  ;;  %5222 = vmatmul.mubr.msk.f32.gmra.mxu1 %vm237_vm0, %v6813_v3 }
 0x18b   : > { %908 = vmatprep.mubr.f32.mxu0 %v6388_v0  ;;  %1273 = vmatprep.mubr.f32.mxu1 %v6388_v0 }
 0x18e   : > { %5173 = vmatmul.mubr.msk.f32.gmra.mxu0 %vm237_vm0, %v6821_v4  ;;  %5223 = vmatmul.mubr.msk.f32.gmra.mxu1 %vm237_vm0, %v6821_v4 }
 0x18f   : > { %914 = vmatprep.mubr.f32.mxu0 %v6388_v0  ;;  %1279 = vmatprep.mubr.f32.mxu1 %v6388_v0 }
 0x192   : > { %5174 = vmatmul.mubr.msk.f32.gmra.mxu0 %vm237_vm0, %v6829_v5  ;;  %5224 = vmatmul.mubr.msk.f32.gmra.mxu1 %vm237_vm0, %v6829_v5 }
 0x193   : > { %920 = vmatprep.mubr.f32.mxu0 %v6388_v0  ;;  %1285 = vmatprep.mubr.f32.mxu1 %v6388_v0 }
 0x196   : > { %5175 = vmatmul.mubr.msk.f32.gmra.mxu0 %vm237_vm0, %v6837_v6  ;;  %5225 = vmatmul.mubr.msk.f32.gmra.mxu1 %vm237_vm0, %v6837_v6 }
 0x197   : > { %926 = vmatprep.mubr.f32.mxu0 %v6388_v0  ;;  %1291 = vmatprep.mubr.f32.mxu1 %v6388_v0 }
 0x19a   : > { %5176 = vmatmul.mubr.msk.f32.gmra.mxu0 %vm237_vm0, %v6845_v7  ;;  %5226 = vmatmul.mubr.msk.f32.gmra.mxu1 %vm237_vm0, %v6845_v7 }
 0x19b   : > { %932 = vmatprep.mubr.f32.mxu0 %v6388_v0  ;;  %1297 = vmatprep.mubr.f32.mxu1 %v6388_v0 }
 0x19e   : > { %5177 = vmatmul.mubr.msk.f32.gmra.mxu0 %vm237_vm0, %v6853_v8  ;;  %5227 = vmatmul.mubr.msk.f32.gmra.mxu1 %vm237_vm0, %v6853_v8 }
 0x19f   : > { %938 = vmatprep.mubr.f32.mxu0 %v6388_v0  ;;  %1303 = vmatprep.mubr.f32.mxu1 %v6388_v0 }
 0x1a2   : > { %5178 = vmatmul.mubr.msk.f32.gmra.mxu0 %vm237_vm0, %v6861_v9  ;;  %5228 = vmatmul.mubr.msk.f32.gmra.mxu1 %vm237_vm0, %v6861_v9 }
 0x1a3   : > { %944 = vmatprep.mubr.f32.mxu0 %v6388_v0  ;;  %1309 = vmatprep.mubr.f32.mxu1 %v6388_v0 }
 0x1a6   : > { %5179 = vmatmul.mubr.msk.f32.gmra.mxu0 %vm237_vm0, %v6869_v10  ;;  %5229 = vmatmul.mubr.msk.f32.gmra.mxu1 %vm237_vm0, %v6869_v10 }
 0x1a7   : > { %950 = vmatprep.mubr.f32.mxu0 %v6388_v0  ;;  %1315 = vmatprep.mubr.f32.mxu1 %v6388_v0 }
 0x1aa   : > { %5180 = vmatmul.mubr.msk.f32.gmra.mxu0 %vm237_vm0, %v521_v11  ;;  %5230 = vmatmul.mubr.msk.f32.gmra.mxu1 %vm237_vm0, %v521_v11 }
 0x1ab   : > { %956 = vmatprep.mubr.f32.mxu0 %v6388_v0  ;;  %1321 = vmatprep.mubr.f32.mxu1 %v6388_v0 }
 0x1ae   : > { %5181 = vmatmul.mubr.msk.f32.gmra.mxu0 %vm237_vm0, %v522_v12  ;;  %5231 = vmatmul.mubr.msk.f32.gmra.mxu1 %vm237_vm0, %v522_v12 }
 0x1af   : > { %962 = vmatprep.mubr.f32.mxu0 %v6388_v0  ;;  %1327 = vmatprep.mubr.f32.mxu1 %v6388_v0 }
 0x1b2   : > { %5182 = vmatmul.mubr.msk.f32.gmra.mxu0 %vm237_vm0, %v523_v13  ;;  %5232 = vmatmul.mubr.msk.f32.gmra.mxu1 %vm237_vm0, %v523_v13  ;;  %v537_v13 = vld [vmem:[#allocation5 + $0x188] sm:$0xff] }
 0x1b3   : > { %968 = vmatprep.mubr.f32.mxu0 %v6388_v0  ;;  %1333 = vmatprep.mubr.f32.mxu1 %v6388_v0 }
 0x1b6   : > { %5183 = vmatmul.mubr.msk.f32.gmra.mxu0 %vm237_vm0, %v524_v14  ;;  %5233 = vmatmul.mubr.msk.f32.gmra.mxu1 %vm237_vm0, %v524_v14 }
 0x1b7   : > { %974 = vmatprep.mubr.f32.mxu0 %v6388_v0  ;;  %1339 = vmatprep.mubr.f32.mxu1 %v6388_v0 }
 0x1ba   : > { %5184 = vmatmul.mubr.msk.f32.gmra.mxu0 %vm237_vm0, %v525_v15  ;;  %5234 = vmatmul.mubr.msk.f32.gmra.mxu1 %vm237_vm0, %v525_v15 }
 0x1bb   : > { %980 = vmatprep.mubr.f32.mxu0 %v6388_v0  ;;  %1345 = vmatprep.mubr.f32.mxu1 %v6388_v0 }
 0x1be   : > { %5185 = vmatmul.mubr.msk.f32.gmra.mxu0 %vm237_vm0, %v526_v16  ;;  %5235 = vmatmul.mubr.msk.f32.gmra.mxu1 %vm237_vm0, %v526_v16 }
 0x1bf   : > { %986 = vmatprep.mubr.f32.mxu0 %v6388_v0  ;;  %1351 = vmatprep.mubr.f32.mxu1 %v6388_v0 }
 0x1c2   : > { %5186 = vmatmul.mubr.msk.f32.gmra.mxu0 %vm237_vm0, %v527_v17  ;;  %5236 = vmatmul.mubr.msk.f32.gmra.mxu1 %vm237_vm0, %v527_v17 }
 0x1c3   : > { %992 = vmatprep.mubr.f32.mxu0 %v6388_v0  ;;  %1357 = vmatprep.mubr.f32.mxu1 %v6388_v0 }
 0x1c6   : > { %5187 = vmatmul.mubr.msk.f32.gmra.mxu0 %vm237_vm0, %v528_v18  ;;  %5237 = vmatmul.mubr.msk.f32.gmra.mxu1 %vm237_vm0, %v528_v18 }
 0x1c7   : > { %998 = vmatprep.mubr.f32.mxu0 %v6388_v0  ;;  %1363 = vmatprep.mubr.f32.mxu1 %v6388_v0 }
 0x1ca   : > { %5188 = vmatmul.mubr.msk.f32.gmra.mxu0 %vm237_vm0, %v529_v19  ;;  %5238 = vmatmul.mubr.msk.f32.gmra.mxu1 %vm237_vm0, %v529_v19 }
 0x1cb   : > { %1004 = vmatprep.mubr.f32.mxu0 %v6388_v0  ;;  %1369 = vmatprep.mubr.f32.mxu1 %v6388_v0 }
 0x1ce   : > { %5189 = vmatmul.mubr.msk.f32.gmra.mxu0 %vm237_vm0, %v530_v20  ;;  %5239 = vmatmul.mubr.msk.f32.gmra.mxu1 %vm237_vm0, %v530_v20 }
 0x1cf   : > { %1010 = vmatprep.mubr.f32.mxu0 %v6388_v0  ;;  %1375 = vmatprep.mubr.f32.mxu1 %v6388_v0 }
 0x1d2   : > { %5190 = vmatmul.mubr.msk.f32.gmra.mxu0 %vm237_vm0, %v531_v21  ;;  %5240 = vmatmul.mubr.msk.f32.gmra.mxu1 %vm237_vm0, %v531_v21 }
 0x1d3   : > { %1016 = vmatprep.mubr.f32.mxu0 %v6388_v0  ;;  %1381 = vmatprep.mubr.f32.mxu1 %v6388_v0 }
 0x1d6   : > { %5191 = vmatmul.mubr.msk.f32.gmra.mxu0 %vm237_vm0, %v532_v22  ;;  %5241 = vmatmul.mubr.msk.f32.gmra.mxu1 %vm237_vm0, %v532_v22 }
 0x1d7   : > { %1022 = vmatprep.mubr.f32.mxu0 %v6388_v0  ;;  %1387 = vmatprep.mubr.f32.mxu1 %v6388_v0 }
 0x1da   : > { %5192 = vmatmul.mubr.msk.f32.gmra.mxu0 %vm237_vm0, %v533_v23  ;;  %5242 = vmatmul.mubr.msk.f32.gmra.mxu1 %vm237_vm0, %v533_v23 }
 0x1db   : > { %1028 = vmatprep.mubr.f32.mxu0 %v6388_v0  ;;  %1393 = vmatprep.mubr.f32.mxu1 %v6388_v0 }
 0x1de   : > { %5193 = vmatmul.mubr.msk.f32.gmra.mxu0 %vm237_vm0, %v534_v27  ;;  %5243 = vmatmul.mubr.msk.f32.gmra.mxu1 %vm237_vm0, %v534_v27 }
 0x1df   : > { %1034 = vmatprep.mubr.f32.mxu0 %v6388_v0  ;;  %1399 = vmatprep.mubr.f32.mxu1 %v6388_v0 }
 0x1e2   : > { %5194 = vmatmul.mubr.msk.f32.gmra.mxu0 %vm237_vm0, %v535_v31  ;;  %5244 = vmatmul.mubr.msk.f32.gmra.mxu1 %vm237_vm0, %v535_v31 }
 0x1e3   : > { %1040 = vmatprep.mubr.f32.mxu0 %v6388_v0  ;;  %1405 = vmatprep.mubr.f32.mxu1 %v6388_v0 }
 0x1e6   : > { %5195 = vmatmul.mubr.msk.f32.gmra.mxu0 %vm237_vm0, %v536_v34  ;;  %5245 = vmatmul.mubr.msk.f32.gmra.mxu1 %vm237_vm0, %v536_v34  ;;  %v754_v11 = vpop.f32.mrf.mxu0  ;;  %v1119_v12 = vpop.f32.mrf.mxu1 }
 0x1e7   : > { %1046 = vmatprep.mubr.f32.mxu0 %v6388_v0  ;;  %1411 = vmatprep.mubr.f32.mxu1 %v6388_v0  ;;  %1418 = vst [vmem:[%s6954_s20] sm:$0xff] %v754_v11  ;;  %1420 = vst [vmem:[%s6954_s20 + $0x10] sm:$0xff] %v1119_v12 }
 0x1e8   : > { %v756_v14 = vpop.f32.mrf.mxu0  ;;  %v1121_v15 = vpop.f32.mrf.mxu1 }
 0x1e9   : > { %1419 = vst [vmem:[%s6954_s20 + $0x8] sm:$0xff] %v756_v14  ;;  %1421 = vst.msk [vmem:[%s6954_s20 + $0x18] sm:$0xff] %vm237_vm0, %v1121_v15 }
 0x1ea   : > { %5196 = vmatmul.mubr.msk.f32.gmra.mxu0 %vm237_vm0, %v537_v13  ;;  %5246 = vmatmul.mubr.msk.f32.gmra.mxu1 %vm237_vm0, %v537_v13  ;;  %v760_v16 = vpop.f32.mrf.mxu0  ;;  %v1125_v17 = vpop.f32.mrf.mxu1 }
 0x1eb   : > { %1882 = vmatprep.mubr.f32.mxu0 %v6388_v0  ;;  %2247 = vmatprep.mubr.f32.mxu1 %v6388_v0  ;;  %1422 = vst [vmem:[%s6954_s20 + $0x20] sm:$0xff] %v760_v16  ;;  %1424 = vst [vmem:[%s6954_s20 + $0x30] sm:$0xff] %v1125_v17 }
 0x1ec   : > { %v762_v18 = vpop.f32.mrf.mxu0  ;;  %v1127_v19 = vpop.f32.mrf.mxu1 }
 0x1ed   : > { %1423 = vst [vmem:[%s6954_s20 + $0x28] sm:$0xff] %v762_v18  ;;  %1425 = vst.msk [vmem:[%s6954_s20 + $0x38] sm:$0xff] %vm237_vm0, %v1127_v19 }
 0x1ee   : > { %5247 = vmatmul.mubr.msk.f32.vlgmr.msra.gmra.mxu0 %vm237_vm0, %v6601_v25  ;;  %5297 = vmatmul.mubr.msk.f32.vlgmr.msra.gmra.mxu1 %vm237_vm0, %v6601_v25  ;;  %v766_v20 = vpop.f32.mrf.mxu0  ;;  %v1131_v21 = vpop.f32.mrf.mxu1 }
 0x1ef   : > { %1888 = vmatprep.mubr.f32.mxu0 %v6388_v0  ;;  %2253 = vmatprep.mubr.f32.mxu1 %v6388_v0  ;;  %1426 = vst [vmem:[%s6954_s20 + $0x40] sm:$0xff] %v766_v20  ;;  %1428 = vst [vmem:[%s6954_s20 + $0x50] sm:$0xff] %v1131_v21 }
 0x1f0   : > { %2978 = vmatpush1.msra.mxu0 %v6715_v51  ;;  %3343 = vmatpush1.msra.mxu1 %v6717_v52  ;;  %v768_v22 = vpop.f32.mrf.mxu0  ;;  %v1133_v23 = vpop.f32.mrf.mxu1 }
 0x1f1   : > { %2979 = vmatprep.subr.mxu0 %v6707_v48  ;;  %3344 = vmatprep.subr.mxu1 %v6709_v49  ;;  %1427 = vst [vmem:[%s6954_s20 + $0x48] sm:$0xff] %v768_v22  ;;  %1429 = vst.msk [vmem:[%s6954_s20 + $0x58] sm:$0xff] %vm237_vm0, %v1133_v23 }
 0x1f2   : > { %5248 = vmatmul.mubr.msk.f32.gmra.mxu0 %vm237_vm0, %v6609_v30  ;;  %5298 = vmatmul.mubr.msk.f32.gmra.mxu1 %vm237_vm0, %v6609_v30  ;;  %v772_v25 = vpop.f32.mrf.mxu0  ;;  %v1137_v51 = vpop.f32.mrf.mxu1 }
 0x1f3   : > { %2980 = vmatpush1.msra.mxu0 %v6699_v46  ;;  %3345 = vmatpush1.msra.mxu1 %v6701_v47  ;;  %1430 = vst [vmem:[%s6954_s20 + $0x60] sm:$0xff] %v772_v25  ;;  %1432 = vst [vmem:[%s6954_s20 + $0x70] sm:$0xff] %v1137_v51 }
 0x1f4   : > { %1894 = vmatprep.mubr.f32.mxu0 %v6388_v0  ;;  %2259 = vmatprep.mubr.f32.mxu1 %v6388_v0  ;;  %v774_v48 = vpop.f32.mrf.mxu0  ;;  %v1139_v49 = vpop.f32.mrf.mxu1 }
 0x1f5   : > { %4108 = vmatprep.subr.mxu0 %v372_v53  ;;  %4473 = vmatprep.subr.mxu1 %v485_v54  ;;  %1431 = vst [vmem:[%s6954_s20 + $0x68] sm:$0xff] %v774_v48  ;;  %1433 = vst.msk [vmem:[%s6954_s20 + $0x78] sm:$0xff] %vm237_vm0, %v1139_v49 }
 0x1f6   : > { %5249 = vmatmul.mubr.msk.f32.gmra.mxu0 %vm237_vm0, %v6617_v35  ;;  %5299 = vmatmul.mubr.msk.f32.gmra.mxu1 %vm237_vm0, %v6617_v35  ;;  %v778_v30 = vpop.f32.mrf.mxu0  ;;  %v1143_v46 = vpop.f32.mrf.mxu1 }
 0x1f7   : > { %1900 = vmatprep.mubr.f32.mxu0 %v6388_v0  ;;  %2265 = vmatprep.mubr.f32.mxu1 %v6388_v0  ;;  %1434 = vst [vmem:[%s6954_s20 + $0x80] sm:$0xff] %v778_v30  ;;  %1436 = vst [vmem:[%s6954_s20 + $0x90] sm:$0xff] %v1143_v46 }
 0x1f8   : > { %v780_v47 = vpop.f32.mrf.mxu0  ;;  %v1145_v52 = vpop.f32.mrf.mxu1 }
 0x1f9   : > { %1435 = vst [vmem:[%s6954_s20 + $0x88] sm:$0xff] %v780_v47  ;;  %1437 = vst.msk [vmem:[%s6954_s20 + $0x98] sm:$0xff] %vm237_vm0, %v1145_v52 }
 0x1fa   : > { %5250 = vmatmul.mubr.msk.f32.gmra.mxu0 %vm237_vm0, %v6625_v36  ;;  %5300 = vmatmul.mubr.msk.f32.gmra.mxu1 %vm237_vm0, %v6625_v36  ;;  %v784_v35 = vpop.f32.mrf.mxu0  ;;  %v1149_v27 = vpop.f32.mrf.mxu1 }
 0x1fb   : > { %1906 = vmatprep.mubr.f32.mxu0 %v6388_v0  ;;  %2271 = vmatprep.mubr.f32.mxu1 %v6388_v0  ;;  %1438 = vst [vmem:[%s6954_s20 + $0xa0] sm:$0xff] %v784_v35  ;;  %1440 = vst [vmem:[%s6954_s20 + $0xb0] sm:$0xff] %v1149_v27 }
 0x1fc   : > { %v786_v31 = vpop.f32.mrf.mxu0  ;;  %v1151_v34 = vpop.f32.mrf.mxu1 }
 0x1fd   : > { %1439 = vst [vmem:[%s6954_s20 + $0xa8] sm:$0xff] %v786_v31  ;;  %1441 = vst.msk [vmem:[%s6954_s20 + $0xb8] sm:$0xff] %vm237_vm0, %v1151_v34 }
 0x1fe   : > { %5251 = vmatmul.mubr.msk.f32.gmra.mxu0 %vm237_vm0, %v6633_v37  ;;  %5301 = vmatmul.mubr.msk.f32.gmra.mxu1 %vm237_vm0, %v6633_v37  ;;  %v790_v36 = vpop.f32.mrf.mxu0  ;;  %v1155_v53 = vpop.f32.mrf.mxu1 }
 0x1ff   : > { %1912 = vmatprep.mubr.f32.mxu0 %v6388_v0  ;;  %2277 = vmatprep.mubr.f32.mxu1 %v6388_v0  ;;  %1442 = vst [vmem:[%s6954_s20 + $0xc0] sm:$0xff] %v790_v36  ;;  %1444 = vst [vmem:[%s6954_s20 + $0xd0] sm:$0xff] %v1155_v53 }
 0x200   : > { %v792_v54 = vpop.f32.mrf.mxu0  ;;  %v1157_v11 = vpop.f32.mrf.mxu1 }
 0x201   : > { %1443 = vst [vmem:[%s6954_s20 + $0xc8] sm:$0xff] %v792_v54  ;;  %1445 = vst.msk [vmem:[%s6954_s20 + $0xd8] sm:$0xff] %vm237_vm0, %v1157_v11 }
 0x202   : > { %5252 = vmatmul.mubr.msk.f32.gmra.mxu0 %vm237_vm0, %v6641_v38  ;;  %5302 = vmatmul.mubr.msk.f32.gmra.mxu1 %vm237_vm0, %v6641_v38  ;;  %v796_v37 = vpop.f32.mrf.mxu0  ;;  %v1161_v12 = vpop.f32.mrf.mxu1 }
 0x203   : > { %1918 = vmatprep.mubr.f32.mxu0 %v6388_v0  ;;  %2283 = vmatprep.mubr.f32.mxu1 %v6388_v0  ;;  %1446 = vst [vmem:[%s6954_s20 + $0xe0] sm:$0xff] %v796_v37  ;;  %1448 = vst [vmem:[%s6954_s20 + $0xf0] sm:$0xff] %v1161_v12 }
 0x204   : > { %v798_v13 = vpop.f32.mrf.mxu0  ;;  %v1163_v14 = vpop.f32.mrf.mxu1 }
 0x205   : > { %1447 = vst [vmem:[%s6954_s20 + $0xe8] sm:$0xff] %v798_v13  ;;  %1449 = vst.msk [vmem:[%s6954_s20 + $0xf8] sm:$0xff] %vm237_vm0, %v1163_v14 }
 0x206   : > { %5253 = vmatmul.mubr.msk.f32.gmra.mxu0 %vm237_vm0, %v6649_v39  ;;  %5303 = vmatmul.mubr.msk.f32.gmra.mxu1 %vm237_vm0, %v6649_v39  ;;  %v802_v38 = vpop.f32.mrf.mxu0  ;;  %v1167_v15 = vpop.f32.mrf.mxu1 }
 0x207   : > { %1924 = vmatprep.mubr.f32.mxu0 %v6388_v0  ;;  %2289 = vmatprep.mubr.f32.mxu1 %v6388_v0  ;;  %1450 = vst [vmem:[%s6954_s20 + $0x100] sm:$0xff] %v802_v38  ;;  %1452 = vst [vmem:[%s6954_s20 + $0x110] sm:$0xff] %v1167_v15 }
 0x208   : > { %v804_v16 = vpop.f32.mrf.mxu0  ;;  %v1169_v17 = vpop.f32.mrf.mxu1 }
 0x209   : > { %1451 = vst [vmem:[%s6954_s20 + $0x108] sm:$0xff] %v804_v16  ;;  %1453 = vst.msk [vmem:[%s6954_s20 + $0x118] sm:$0xff] %vm237_vm0, %v1169_v17 }
 0x20a   : > { %5254 = vmatmul.mubr.msk.f32.gmra.mxu0 %vm237_vm0, %v6657_v40  ;;  %5304 = vmatmul.mubr.msk.f32.gmra.mxu1 %vm237_vm0, %v6657_v40  ;;  %v808_v39 = vpop.f32.mrf.mxu0  ;;  %v1173_v18 = vpop.f32.mrf.mxu1 }
 0x20b   : > { %1930 = vmatprep.mubr.f32.mxu0 %v6388_v0  ;;  %2295 = vmatprep.mubr.f32.mxu1 %v6388_v0  ;;  %1454 = vst [vmem:[%s6954_s20 + $0x120] sm:$0xff] %v808_v39  ;;  %1456 = vst [vmem:[%s6954_s20 + $0x130] sm:$0xff] %v1173_v18 }
 0x20c   : > { %v810_v19 = vpop.f32.mrf.mxu0  ;;  %v1175_v20 = vpop.f32.mrf.mxu1 }
 0x20d   : > { %1455 = vst [vmem:[%s6954_s20 + $0x128] sm:$0xff] %v810_v19  ;;  %1457 = vst.msk [vmem:[%s6954_s20 + $0x138] sm:$0xff] %vm237_vm0, %v1175_v20 }
 0x20e   : > { %5255 = vmatmul.mubr.msk.f32.gmra.mxu0 %vm237_vm0, %v6665_v41  ;;  %5305 = vmatmul.mubr.msk.f32.gmra.mxu1 %vm237_vm0, %v6665_v41  ;;  %v814_v40 = vpop.f32.mrf.mxu0  ;;  %v1179_v21 = vpop.f32.mrf.mxu1 }
 0x20f   : > { %1936 = vmatprep.mubr.f32.mxu0 %v6388_v0  ;;  %2301 = vmatprep.mubr.f32.mxu1 %v6388_v0  ;;  %1458 = vst [vmem:[%s6954_s20 + $0x140] sm:$0xff] %v814_v40  ;;  %1460 = vst [vmem:[%s6954_s20 + $0x150] sm:$0xff] %v1179_v21 }
 0x210   : > { %v816_v22 = vpop.f32.mrf.mxu0  ;;  %v1181_v23 = vpop.f32.mrf.mxu1 }
 0x211   : > { %1459 = vst [vmem:[%s6954_s20 + $0x148] sm:$0xff] %v816_v22  ;;  %1461 = vst.msk [vmem:[%s6954_s20 + $0x158] sm:$0xff] %vm237_vm0, %v1181_v23 }
 0x212   : > { %5256 = vmatmul.mubr.msk.f32.gmra.mxu0 %vm237_vm0, %v6673_v42  ;;  %5306 = vmatmul.mubr.msk.f32.gmra.mxu1 %vm237_vm0, %v6673_v42  ;;  %v820_v41 = vpop.f32.mrf.mxu0  ;;  %v1185_v25 = vpop.f32.mrf.mxu1 }
 0x213   : > { %1942 = vmatprep.mubr.f32.mxu0 %v6388_v0  ;;  %2307 = vmatprep.mubr.f32.mxu1 %v6388_v0  ;;  %1462 = vst [vmem:[%s6954_s20 + $0x160] sm:$0xff] %v820_v41  ;;  %1464 = vst [vmem:[%s6954_s20 + $0x170] sm:$0xff] %v1185_v25 }
 0x214   : > { %v822_v51 = vpop.f32.mrf.mxu0  ;;  %v1187_v48 = vpop.f32.mrf.mxu1 }
 0x215   : > { %1463 = vst [vmem:[%s6954_s20 + $0x168] sm:$0xff] %v822_v51  ;;  %1465 = vst.msk [vmem:[%s6954_s20 + $0x178] sm:$0xff] %vm237_vm0, %v1187_v48 }
 0x216   : > { %5257 = vmatmul.mubr.msk.f32.gmra.mxu0 %vm237_vm0, %v6681_v43  ;;  %5307 = vmatmul.mubr.msk.f32.gmra.mxu1 %vm237_vm0, %v6681_v43  ;;  %v826_v42 = vpop.f32.mrf.mxu0  ;;  %v1191_v49 = vpop.f32.mrf.mxu1 }
 0x217   : > { %1948 = vmatprep.mubr.f32.mxu0 %v6388_v0  ;;  %2313 = vmatprep.mubr.f32.mxu1 %v6388_v0  ;;  %1466 = vst [vmem:[%s6954_s20 + $0x180] sm:$0xff] %v826_v42  ;;  %1468 = vst [vmem:[%s6954_s20 + $0x190] sm:$0xff] %v1191_v49 }
 0x218   : > { %v828_v30 = vpop.f32.mrf.mxu0  ;;  %v1193_v46 = vpop.f32.mrf.mxu1 }
 0x219   : > { %1467 = vst [vmem:[%s6954_s20 + $0x188] sm:$0xff] %v828_v30  ;;  %1469 = vst.msk [vmem:[%s6954_s20 + $0x198] sm:$0xff] %vm237_vm0, %v1193_v46 }
 0x21a   : > { %5258 = vmatmul.mubr.msk.f32.gmra.mxu0 %vm237_vm0, %v6689_v44  ;;  %5308 = vmatmul.mubr.msk.f32.gmra.mxu1 %vm237_vm0, %v6689_v44  ;;  %v832_v43 = vpop.f32.mrf.mxu0  ;;  %v1197_v47 = vpop.f32.mrf.mxu1 }
 0x21b   : > { %1954 = vmatprep.mubr.f32.mxu0 %v6388_v0  ;;  %2319 = vmatprep.mubr.f32.mxu1 %v6388_v0  ;;  %1470 = vst [vmem:[%s6954_s20 + $0x1a0] sm:$0xff] %v832_v43  ;;  %1472 = vst [vmem:[%s6954_s20 + $0x1b0] sm:$0xff] %v1197_v47 }
 0x21c   : > { %v834_v52 = vpop.f32.mrf.mxu0  ;;  %v1199_v35 = vpop.f32.mrf.mxu1 }
 0x21d   : > { %1471 = vst [vmem:[%s6954_s20 + $0x1a8] sm:$0xff] %v834_v52  ;;  %1473 = vst.msk [vmem:[%s6954_s20 + $0x1b8] sm:$0xff] %vm237_vm0, %v1199_v35 }
 0x21e   : > { %5259 = vmatmul.mubr.msk.f32.gmra.mxu0 %vm237_vm0, %v6697_v45  ;;  %5309 = vmatmul.mubr.msk.f32.gmra.mxu1 %vm237_vm0, %v6697_v45  ;;  %v838_v44 = vpop.f32.mrf.mxu0  ;;  %v1203_v27 = vpop.f32.mrf.mxu1 }
 0x21f   : > { %1960 = vmatprep.mubr.f32.mxu0 %v6388_v0  ;;  %2325 = vmatprep.mubr.f32.mxu1 %v6388_v0  ;;  %1474 = vst [vmem:[%s6954_s20 + $0x1c0] sm:$0xff] %v838_v44  ;;  %1476 = vst [vmem:[%s6954_s20 + $0x1d0] sm:$0xff] %v1203_v27 }
 0x220   : > { %v840_v31 = vpop.f32.mrf.mxu0  ;;  %v1205_v34 = vpop.f32.mrf.mxu1 }
 0x221   : > { %1475 = vst [vmem:[%s6954_s20 + $0x1c8] sm:$0xff] %v840_v31  ;;  %1477 = vst.msk [vmem:[%s6954_s20 + $0x1d8] sm:$0xff] %vm237_vm0, %v1205_v34 }
 0x222   : > { %5260 = vmatmul.mubr.msk.f32.gmra.mxu0 %vm237_vm0, %v6713_v50  ;;  %5310 = vmatmul.mubr.msk.f32.gmra.mxu1 %vm237_vm0, %v6713_v50  ;;  %v844_v45 = vpop.f32.mrf.mxu0  ;;  %v1209_v36 = vpop.f32.mrf.mxu1 }
 0x223   : > { %1966 = vmatprep.mubr.f32.mxu0 %v6388_v0  ;;  %2331 = vmatprep.mubr.f32.mxu1 %v6388_v0  ;;  %1478 = vst [vmem:[%s6954_s20 + $0x1e0] sm:$0xff] %v844_v45  ;;  %1480 = vst [vmem:[%s6954_s20 + $0x1f0] sm:$0xff] %v1209_v36 }
 0x224   : > { %v846_v53 = vpop.f32.mrf.mxu0  ;;  %v1211_v54 = vpop.f32.mrf.mxu1 }
 0x225   : > { %1479 = vst [vmem:[%s6954_s20 + $0x1e8] sm:$0xff] %v846_v53  ;;  %1481 = vst.msk [vmem:[%s6954_s20 + $0x1f8] sm:$0xff] %vm237_vm0, %v1211_v54 }
 0x226   : > { %5261 = vmatmul.mubr.msk.f32.gmra.mxu0 %vm237_vm0, %v6725_v55  ;;  %5311 = vmatmul.mubr.msk.f32.gmra.mxu1 %vm237_vm0, %v6725_v55  ;;  %v850_v50 = vpop.f32.mrf.mxu0  ;;  %v1215_v11 = vpop.f32.mrf.mxu1 }
 0x227   : > { %1972 = vmatprep.mubr.f32.mxu0 %v6388_v0  ;;  %2337 = vmatprep.mubr.f32.mxu1 %v6388_v0  ;;  %1482 = vst [vmem:[%s6954_s20 + $0x200] sm:$0xff] %v850_v50  ;;  %1484 = vst [vmem:[%s6954_s20 + $0x210] sm:$0xff] %v1215_v11 }
 0x228   : > { %v852_v37 = vpop.f32.mrf.mxu0  ;;  %v1217_v12 = vpop.f32.mrf.mxu1 }
 0x229   : > { %1483 = vst [vmem:[%s6954_s20 + $0x208] sm:$0xff] %v852_v37  ;;  %1485 = vst.msk [vmem:[%s6954_s20 + $0x218] sm:$0xff] %vm237_vm0, %v1217_v12 }
 0x22a   : > { %5262 = vmatmul.mubr.msk.f32.gmra.mxu0 %vm237_vm0, %v6733_v56  ;;  %5312 = vmatmul.mubr.msk.f32.gmra.mxu1 %vm237_vm0, %v6733_v56  ;;  %v856_v55 = vpop.f32.mrf.mxu0  ;;  %v1221_v13 = vpop.f32.mrf.mxu1 }
 0x22b   : > { %1978 = vmatprep.mubr.f32.mxu0 %v6388_v0  ;;  %2343 = vmatprep.mubr.f32.mxu1 %v6388_v0  ;;  %1486 = vst [vmem:[%s6954_s20 + $0x220] sm:$0xff] %v856_v55  ;;  %1488 = vst [vmem:[%s6954_s20 + $0x230] sm:$0xff] %v1221_v13 }
 0x22c   : > { %v858_v14 = vpop.f32.mrf.mxu0  ;;  %v1223_v38 = vpop.f32.mrf.mxu1 }
 0x22d   : > { %1487 = vst [vmem:[%s6954_s20 + $0x228] sm:$0xff] %v858_v14  ;;  %1489 = vst.msk [vmem:[%s6954_s20 + $0x238] sm:$0xff] %vm237_vm0, %v1223_v38 }
 0x22e   : > { %5263 = vmatmul.mubr.msk.f32.gmra.mxu0 %vm237_vm0, %v6741_v57  ;;  %5313 = vmatmul.mubr.msk.f32.gmra.mxu1 %vm237_vm0, %v6741_v57  ;;  %v862_v56 = vpop.f32.mrf.mxu0  ;;  %v1227_v15 = vpop.f32.mrf.mxu1 }
 0x22f   : > { %1984 = vmatprep.mubr.f32.mxu0 %v6388_v0  ;;  %2349 = vmatprep.mubr.f32.mxu1 %v6388_v0  ;;  %1490 = vst [vmem:[%s6954_s20 + $0x240] sm:$0xff] %v862_v56  ;;  %1492 = vst [vmem:[%s6954_s20 + $0x250] sm:$0xff] %v1227_v15 }
 0x230   : > { %v864_v16 = vpop.f32.mrf.mxu0  ;;  %v1229_v17 = vpop.f32.mrf.mxu1 }
 0x231   : > { %1491 = vst [vmem:[%s6954_s20 + $0x248] sm:$0xff] %v864_v16  ;;  %1493 = vst.msk [vmem:[%s6954_s20 + $0x258] sm:$0xff] %vm237_vm0, %v1229_v17 }
 0x232   : > { %5264 = vmatmul.mubr.msk.f32.gmra.mxu0 %vm237_vm0, %v6749_v58  ;;  %5314 = vmatmul.mubr.msk.f32.gmra.mxu1 %vm237_vm0, %v6749_v58  ;;  %v868_v57 = vpop.f32.mrf.mxu0  ;;  %v1233_v39 = vpop.f32.mrf.mxu1 }
 0x233   : > { %1990 = vmatprep.mubr.f32.mxu0 %v6388_v0  ;;  %2355 = vmatprep.mubr.f32.mxu1 %v6388_v0  ;;  %1494 = vst [vmem:[%s6954_s20 + $0x260] sm:$0xff] %v868_v57  ;;  %1496 = vst [vmem:[%s6954_s20 + $0x270] sm:$0xff] %v1233_v39 }
 0x234   : > { %v870_v18 = vpop.f32.mrf.mxu0  ;;  %v1235_v19 = vpop.f32.mrf.mxu1 }
 0x235   : > { %1495 = vst [vmem:[%s6954_s20 + $0x268] sm:$0xff] %v870_v18  ;;  %1497 = vst.msk [vmem:[%s6954_s20 + $0x278] sm:$0xff] %vm237_vm0, %v1235_v19 }
 0x236   : > { %5265 = vmatmul.mubr.msk.f32.gmra.mxu0 %vm237_vm0, %v6757_v59  ;;  %5315 = vmatmul.mubr.msk.f32.gmra.mxu1 %vm237_vm0, %v6757_v59  ;;  %v874_v58 = vpop.f32.mrf.mxu0  ;;  %v1239_v20 = vpop.f32.mrf.mxu1 }
 0x237   : > { %1996 = vmatprep.mubr.f32.mxu0 %v6388_v0  ;;  %2361 = vmatprep.mubr.f32.mxu1 %v6388_v0  ;;  %1498 = vst [vmem:[%s6954_s20 + $0x280] sm:$0xff] %v874_v58  ;;  %1500 = vst [vmem:[%s6954_s20 + $0x290] sm:$0xff] %v1239_v20 }
 0x238   : > { %v876_v40 = vpop.f32.mrf.mxu0  ;;  %v1241_v21 = vpop.f32.mrf.mxu1 }
 0x239   : > { %1499 = vst [vmem:[%s6954_s20 + $0x288] sm:$0xff] %v876_v40  ;;  %1501 = vst.msk [vmem:[%s6954_s20 + $0x298] sm:$0xff] %vm237_vm0, %v1241_v21 }
 0x23a   : > { %5266 = vmatmul.mubr.msk.f32.gmra.mxu0 %vm237_vm0, %v6765_v60  ;;  %5316 = vmatmul.mubr.msk.f32.gmra.mxu1 %vm237_vm0, %v6765_v60  ;;  %v880_v59 = vpop.f32.mrf.mxu0  ;;  %v1245_v22 = vpop.f32.mrf.mxu1 }
 0x23b   : > { %2002 = vmatprep.mubr.f32.mxu0 %v6388_v0  ;;  %2367 = vmatprep.mubr.f32.mxu1 %v6388_v0  ;;  %1502 = vst [vmem:[%s6954_s20 + $0x2a0] sm:$0xff] %v880_v59  ;;  %1504 = vst [vmem:[%s6954_s20 + $0x2b0] sm:$0xff] %v1245_v22  ;;  %v6230_v59 = vld [vmem:[#allocation5 + $0x108] sm:$0xff] }
 0x23c   : > { %v882_v23 = vpop.f32.mrf.mxu0  ;;  %v1247_v41 = vpop.f32.mrf.mxu1 }
 0x23d   : > { %1503 = vst [vmem:[%s6954_s20 + $0x2a8] sm:$0xff] %v882_v23  ;;  %1505 = vst.msk [vmem:[%s6954_s20 + $0x2b8] sm:$0xff] %vm237_vm0, %v1247_v41  ;;  %v1652_v23 = vld [vmem:[#allocation5 + $0x110] sm:$0xff] }
 0x23e   : > { %5267 = vmatmul.mubr.msk.f32.gmra.mxu0 %vm237_vm0, %v6773_v61  ;;  %5317 = vmatmul.mubr.msk.f32.gmra.mxu1 %vm237_vm0, %v6773_v61  ;;  %v886_v60 = vpop.f32.mrf.mxu0  ;;  %v1251_v25 = vpop.f32.mrf.mxu1 }
 0x23f   : > { %2008 = vmatprep.mubr.f32.mxu0 %v6388_v0  ;;  %2373 = vmatprep.mubr.f32.mxu1 %v6388_v0  ;;  %1506 = vst [vmem:[%s6954_s20 + $0x2c0] sm:$0xff] %v886_v60  ;;  %1508 = vst [vmem:[%s6954_s20 + $0x2d0] sm:$0xff] %v1251_v25 }
 0x240   : > { %v888_v51 = vpop.f32.mrf.mxu0  ;;  %v1253_v48 = vpop.f32.mrf.mxu1 }
 0x241   : > { %1507 = vst [vmem:[%s6954_s20 + $0x2c8] sm:$0xff] %v888_v51  ;;  %1509 = vst.msk [vmem:[%s6954_s20 + $0x2d8] sm:$0xff] %vm237_vm0, %v1253_v48  ;;  %v1653_v48 = vld [vmem:[#allocation5 + $0x118] sm:$0xff] }
 0x242   : > { %5268 = vmatmul.mubr.msk.f32.gmra.mxu0 %vm237_vm0, %v6781_v62  ;;  %5318 = vmatmul.mubr.msk.f32.gmra.mxu1 %vm237_vm0, %v6781_v62  ;;  %v892_v61 = vpop.f32.mrf.mxu0  ;;  %v1257_v42 = vpop.f32.mrf.mxu1 }
 0x243   : > { %2014 = vmatprep.mubr.f32.mxu0 %v6388_v0  ;;  %2379 = vmatprep.mubr.f32.mxu1 %v6388_v0  ;;  %1510 = vst [vmem:[%s6954_s20 + $0x2e0] sm:$0xff] %v892_v61  ;;  %1512 = vst [vmem:[%s6954_s20 + $0x2f0] sm:$0xff] %v1257_v42 }
 0x244   : > { %v894_v49 = vpop.f32.mrf.mxu0  ;;  %v1259_v30 = vpop.f32.mrf.mxu1 }
 0x245   : > { %1511 = vst [vmem:[%s6954_s20 + $0x2e8] sm:$0xff] %v894_v49  ;;  %1513 = vst.msk [vmem:[%s6954_s20 + $0x2f8] sm:$0xff] %vm237_vm0, %v1259_v30 }
 0x246   : > { %5269 = vmatmul.mubr.msk.f32.gmra.mxu0 %vm237_vm0, %v6789_v63  ;;  %5319 = vmatmul.mubr.msk.f32.gmra.mxu1 %vm237_vm0, %v6789_v63  ;;  %v898_v62 = vpop.f32.mrf.mxu0  ;;  %v1263_v46 = vpop.f32.mrf.mxu1 }
 0x247   : > { %2020 = vmatprep.mubr.f32.mxu0 %v6388_v0  ;;  %2385 = vmatprep.mubr.f32.mxu1 %v6388_v0  ;;  %1514 = vst [vmem:[%s6954_s20 + $0x300] sm:$0xff] %v898_v62  ;;  %1516 = vst [vmem:[%s6954_s20 + $0x310] sm:$0xff] %v1263_v46  ;;  %v1654_v62 = vld [vmem:[#allocation5 + $0x120] sm:$0xff] }
 0x248   : > { %v900_v43 = vpop.f32.mrf.mxu0  ;;  %v1265_v47 = vpop.f32.mrf.mxu1 }
 0x249   : > { %1515 = vst [vmem:[%s6954_s20 + $0x308] sm:$0xff] %v900_v43  ;;  %1517 = vst.msk [vmem:[%s6954_s20 + $0x318] sm:$0xff] %vm237_vm0, %v1265_v47 }
 0x24a   : > { %5270 = vmatmul.mubr.msk.f32.gmra.mxu0 %vm237_vm0, %v6797_v1  ;;  %5320 = vmatmul.mubr.msk.f32.gmra.mxu1 %vm237_vm0, %v6797_v1  ;;  %v904_v63 = vpop.f32.mrf.mxu0  ;;  %v1269_v52 = vpop.f32.mrf.mxu1 }
 0x24b   : > { %2026 = vmatprep.mubr.f32.mxu0 %v6388_v0  ;;  %2391 = vmatprep.mubr.f32.mxu1 %v6388_v0  ;;  %1518 = vst [vmem:[%s6954_s20 + $0x320] sm:$0xff] %v904_v63  ;;  %1520 = vst [vmem:[%s6954_s20 + $0x330] sm:$0xff] %v1269_v52  ;;  %v1655_v52 = vld [vmem:[#allocation5 + $0x128] sm:$0xff] }
 0x24c   : > { %v906_v35 = vpop.f32.mrf.mxu0  ;;  %v1271_v44 = vpop.f32.mrf.mxu1 }
 0x24d   : > { %1519 = vst [vmem:[%s6954_s20 + $0x328] sm:$0xff] %v906_v35  ;;  %1521 = vst.msk [vmem:[%s6954_s20 + $0x338] sm:$0xff] %vm237_vm0, %v1271_v44 }
 0x24e   : > { %5271 = vmatmul.mubr.msk.f32.gmra.mxu0 %vm237_vm0, %v6805_v2  ;;  %5321 = vmatmul.mubr.msk.f32.gmra.mxu1 %vm237_vm0, %v6805_v2  ;;  %v910_v1 = vpop.f32.mrf.mxu0  ;;  %v1275_v27 = vpop.f32.mrf.mxu1 }
 0x24f   : > { %2032 = vmatprep.mubr.f32.mxu0 %v6388_v0  ;;  %2397 = vmatprep.mubr.f32.mxu1 %v6388_v0  ;;  %1522 = vst [vmem:[%s6954_s20 + $0x340] sm:$0xff] %v910_v1  ;;  %1524 = vst [vmem:[%s6954_s20 + $0x350] sm:$0xff] %v1275_v27 }
 0x250   : > { %v912_v31 = vpop.f32.mrf.mxu0  ;;  %v1277_v34 = vpop.f32.mrf.mxu1 }
 0x251   : > { %1523 = vst [vmem:[%s6954_s20 + $0x348] sm:$0xff] %v912_v31  ;;  %1525 = vst.msk [vmem:[%s6954_s20 + $0x358] sm:$0xff] %vm237_vm0, %v1277_v34  ;;  %v1656_v31 = vld [vmem:[#allocation5 + $0x130] sm:$0xff] }
 0x252   : > { %5272 = vmatmul.mubr.msk.f32.gmra.mxu0 %vm237_vm0, %v6813_v3  ;;  %5322 = vmatmul.mubr.msk.f32.gmra.mxu1 %vm237_vm0, %v6813_v3  ;;  %v916_v2 = vpop.f32.mrf.mxu0  ;;  %v1281_v45 = vpop.f32.mrf.mxu1 }
 0x253   : > { %2038 = vmatprep.mubr.f32.mxu0 %v6388_v0  ;;  %2403 = vmatprep.mubr.f32.mxu1 %v6388_v0  ;;  %1526 = vst [vmem:[%s6954_s20 + $0x360] sm:$0xff] %v916_v2  ;;  %1528 = vst [vmem:[%s6954_s20 + $0x370] sm:$0xff] %v1281_v45 }
 0x254   : > { %v918_v36 = vpop.f32.mrf.mxu0  ;;  %v1283_v53 = vpop.f32.mrf.mxu1 }
 0x255   : > { %1527 = vst [vmem:[%s6954_s20 + $0x368] sm:$0xff] %v918_v36  ;;  %1529 = vst.msk [vmem:[%s6954_s20 + $0x378] sm:$0xff] %vm237_vm0, %v1283_v53  ;;  %v1657_v53 = vld [vmem:[#allocation5 + $0x138] sm:$0xff] }
 0x256   : > { %5273 = vmatmul.mubr.msk.f32.gmra.mxu0 %vm237_vm0, %v6821_v4  ;;  %5323 = vmatmul.mubr.msk.f32.gmra.mxu1 %vm237_vm0, %v6821_v4  ;;  %v922_v3 = vpop.f32.mrf.mxu0  ;;  %v1287_v54 = vpop.f32.mrf.mxu1 }
 0x257   : > { %2044 = vmatprep.mubr.f32.mxu0 %v6388_v0  ;;  %2409 = vmatprep.mubr.f32.mxu1 %v6388_v0  ;;  %1530 = vst [vmem:[%s6954_s20 + $0x380] sm:$0xff] %v922_v3  ;;  %1532 = vst [vmem:[%s6954_s20 + $0x390] sm:$0xff] %v1287_v54 }
 0x258   : > { %v924_v50 = vpop.f32.mrf.mxu0  ;;  %v1289_v11 = vpop.f32.mrf.mxu1 }
 0x259   : > { %1531 = vst [vmem:[%s6954_s20 + $0x388] sm:$0xff] %v924_v50  ;;  %1533 = vst.msk [vmem:[%s6954_s20 + $0x398] sm:$0xff] %vm237_vm0, %v1289_v11 }
 0x25a   : > { %5274 = vmatmul.mubr.msk.f32.gmra.mxu0 %vm237_vm0, %v6829_v5  ;;  %5324 = vmatmul.mubr.msk.f32.gmra.mxu1 %vm237_vm0, %v6829_v5  ;;  %v928_v4 = vpop.f32.mrf.mxu0  ;;  %v1293_v37 = vpop.f32.mrf.mxu1 }
 0x25b   : > { %2050 = vmatprep.mubr.f32.mxu0 %v6388_v0  ;;  %2415 = vmatprep.mubr.f32.mxu1 %v6388_v0  ;;  %1534 = vst [vmem:[%s6954_s20 + $0x3a0] sm:$0xff] %v928_v4  ;;  %1536 = vst [vmem:[%s6954_s20 + $0x3b0] sm:$0xff] %v1293_v37  ;;  %v1658_v4 = vld [vmem:[#allocation5 + $0x140] sm:$0xff] }
 0x25c   : > { %v930_v12 = vpop.f32.mrf.mxu0  ;;  %v1295_v55 = vpop.f32.mrf.mxu1 }
 0x25d   : > { %1535 = vst [vmem:[%s6954_s20 + $0x3a8] sm:$0xff] %v930_v12  ;;  %1537 = vst.msk [vmem:[%s6954_s20 + $0x3b8] sm:$0xff] %vm237_vm0, %v1295_v55 }
 0x25e   : > { %5275 = vmatmul.mubr.msk.f32.gmra.mxu0 %vm237_vm0, %v6837_v6  ;;  %5325 = vmatmul.mubr.msk.f32.gmra.mxu1 %vm237_vm0, %v6837_v6  ;;  %v934_v5 = vpop.f32.mrf.mxu0  ;;  %v1299_v13 = vpop.f32.mrf.mxu1 }
 0x25f   : > { %2056 = vmatprep.mubr.f32.mxu0 %v6388_v0  ;;  %2421 = vmatprep.mubr.f32.mxu1 %v6388_v0  ;;  %1538 = vst [vmem:[%s6954_s20 + $0x3c0] sm:$0xff] %v934_v5  ;;  %1540 = vst [vmem:[%s6954_s20 + $0x3d0] sm:$0xff] %v1299_v13  ;;  %v1659_v13 = vld [vmem:[#allocation5 + $0x148] sm:$0xff] }
 0x260   : > { %v936_v14 = vpop.f32.mrf.mxu0  ;;  %v1301_v38 = vpop.f32.mrf.mxu1 }
 0x261   : > { %1539 = vst [vmem:[%s6954_s20 + $0x3c8] sm:$0xff] %v936_v14  ;;  %1541 = vst.msk [vmem:[%s6954_s20 + $0x3d8] sm:$0xff] %vm237_vm0, %v1301_v38 }
 0x262   : > { %5276 = vmatmul.mubr.msk.f32.gmra.mxu0 %vm237_vm0, %v6845_v7  ;;  %5326 = vmatmul.mubr.msk.f32.gmra.mxu1 %vm237_vm0, %v6845_v7  ;;  %v940_v6 = vpop.f32.mrf.mxu0  ;;  %v1305_v56 = vpop.f32.mrf.mxu1 }
 0x263   : > { %2062 = vmatprep.mubr.f32.mxu0 %v6388_v0  ;;  %2427 = vmatprep.mubr.f32.mxu1 %v6388_v0  ;;  %1542 = vst [vmem:[%s6954_s20 + $0x3e0] sm:$0xff] %v940_v6  ;;  %1544 = vst [vmem:[%s6954_s20 + $0x3f0] sm:$0xff] %v1305_v56 }
 0x264   : > { %v942_v15 = vpop.f32.mrf.mxu0  ;;  %v1307_v16 = vpop.f32.mrf.mxu1 }
 0x265   : > { %1543 = vst [vmem:[%s6954_s20 + $0x3e8] sm:$0xff] %v942_v15  ;;  %1545 = vst.msk [vmem:[%s6954_s20 + $0x3f8] sm:$0xff] %vm237_vm0, %v1307_v16  ;;  %v1660_v15 = vld [vmem:[#allocation5 + $0x150] sm:$0xff] }
 0x266   : > { %5277 = vmatmul.mubr.msk.f32.gmra.mxu0 %vm237_vm0, %v6853_v8  ;;  %5327 = vmatmul.mubr.msk.f32.gmra.mxu1 %vm237_vm0, %v6853_v8  ;;  %v946_v7 = vpop.f32.mrf.mxu0  ;;  %v1311_v17 = vpop.f32.mrf.mxu1 }
 0x267   : > { %2068 = vmatprep.mubr.f32.mxu0 %v6388_v0  ;;  %2433 = vmatprep.mubr.f32.mxu1 %v6388_v0  ;;  %1546 = vst [vmem:[%s6954_s20 + $0x400] sm:$0xff] %v946_v7  ;;  %1548 = vst [vmem:[%s6954_s20 + $0x410] sm:$0xff] %v1311_v17 }
 0x268   : > { %v948_v57 = vpop.f32.mrf.mxu0  ;;  %v1313_v39 = vpop.f32.mrf.mxu1 }
 0x269   : > { %1547 = vst [vmem:[%s6954_s20 + $0x408] sm:$0xff] %v948_v57  ;;  %1549 = vst.msk [vmem:[%s6954_s20 + $0x418] sm:$0xff] %vm237_vm0, %v1313_v39  ;;  %v1661_v39 = vld [vmem:[#allocation5 + $0x158] sm:$0xff] }
 0x26a   : > { %5278 = vmatmul.mubr.msk.f32.gmra.mxu0 %vm237_vm0, %v6861_v9  ;;  %5328 = vmatmul.mubr.msk.f32.gmra.mxu1 %vm237_vm0, %v6861_v9  ;;  %v952_v8 = vpop.f32.mrf.mxu0  ;;  %v1317_v18 = vpop.f32.mrf.mxu1 }
 0x26b   : > { %2074 = vmatprep.mubr.f32.mxu0 %v6388_v0  ;;  %2439 = vmatprep.mubr.f32.mxu1 %v6388_v0  ;;  %1550 = vst [vmem:[%s6954_s20 + $0x420] sm:$0xff] %v952_v8  ;;  %1552 = vst [vmem:[%s6954_s20 + $0x430] sm:$0xff] %v1317_v18 }
 0x26c   : > { %v954_v19 = vpop.f32.mrf.mxu0  ;;  %v1319_v58 = vpop.f32.mrf.mxu1 }
 0x26d   : > { %1551 = vst [vmem:[%s6954_s20 + $0x428] sm:$0xff] %v954_v19  ;;  %1553 = vst.msk [vmem:[%s6954_s20 + $0x438] sm:$0xff] %vm237_vm0, %v1319_v58 }
 0x26e   : > { %5279 = vmatmul.mubr.msk.f32.gmra.mxu0 %vm237_vm0, %v6869_v10  ;;  %5329 = vmatmul.mubr.msk.f32.gmra.mxu1 %vm237_vm0, %v6869_v10  ;;  %v958_v9 = vpop.f32.mrf.mxu0  ;;  %v1323_v20 = vpop.f32.mrf.mxu1 }
 0x26f   : > { %2080 = vmatprep.mubr.f32.mxu0 %v6388_v0  ;;  %2445 = vmatprep.mubr.f32.mxu1 %v6388_v0  ;;  %1554 = vst [vmem:[%s6954_s20 + $0x440] sm:$0xff] %v958_v9  ;;  %1556 = vst [vmem:[%s6954_s20 + $0x450] sm:$0xff] %v1323_v20  ;;  %v1662_v9 = vld [vmem:[#allocation5 + $0x160] sm:$0xff] }
 0x270   : > { %v960_v40 = vpop.f32.mrf.mxu0  ;;  %v1325_v21 = vpop.f32.mrf.mxu1 }
 0x271   : > { %1555 = vst [vmem:[%s6954_s20 + $0x448] sm:$0xff] %v960_v40  ;;  %1557 = vst.msk [vmem:[%s6954_s20 + $0x458] sm:$0xff] %vm237_vm0, %v1325_v21 }
 0x272   : > { %5280 = vmatmul.mubr.msk.f32.gmra.mxu0 %vm237_vm0, %v6230_v59  ;;  %5330 = vmatmul.mubr.msk.f32.gmra.mxu1 %vm237_vm0, %v6230_v59  ;;  %v964_v10 = vpop.f32.mrf.mxu0  ;;  %v1329_v22 = vpop.f32.mrf.mxu1 }
 0x273   : > { %2086 = vmatprep.mubr.f32.mxu0 %v6388_v0  ;;  %2451 = vmatprep.mubr.f32.mxu1 %v6388_v0  ;;  %1558 = vst [vmem:[%s6954_s20 + $0x460] sm:$0xff] %v964_v10  ;;  %1560 = vst [vmem:[%s6954_s20 + $0x470] sm:$0xff] %v1329_v22  ;;  %v1663_v10 = vld [vmem:[#allocation5 + $0x168] sm:$0xff] }
 0x274   : > { %v966_v41 = vpop.f32.mrf.mxu0  ;;  %v1331_v60 = vpop.f32.mrf.mxu1 }
 0x275   : > { %1559 = vst [vmem:[%s6954_s20 + $0x468] sm:$0xff] %v966_v41  ;;  %1561 = vst.msk [vmem:[%s6954_s20 + $0x478] sm:$0xff] %vm237_vm0, %v1331_v60 }
 0x276   : > { %5281 = vmatmul.mubr.msk.f32.gmra.mxu0 %vm237_vm0, %v1652_v23  ;;  %5331 = vmatmul.mubr.msk.f32.gmra.mxu1 %vm237_vm0, %v1652_v23  ;;  %v970_v25 = vpop.f32.mrf.mxu0  ;;  %v1335_v51 = vpop.f32.mrf.mxu1 }
 0x277   : > { %2092 = vmatprep.mubr.f32.mxu0 %v6388_v0  ;;  %2457 = vmatprep.mubr.f32.mxu1 %v6388_v0  ;;  %1562 = vst [vmem:[%s6954_s20 + $0x480] sm:$0xff] %v970_v25  ;;  %1564 = vst [vmem:[%s6954_s20 + $0x490] sm:$0xff] %v1335_v51  ;;  %v1664_v25 = vld [vmem:[#allocation5 + $0x170] sm:$0xff] }
 0x278   : > { %v972_v61 = vpop.f32.mrf.mxu0  ;;  %v1337_v42 = vpop.f32.mrf.mxu1 }
 0x279   : > { %1563 = vst [vmem:[%s6954_s20 + $0x488] sm:$0xff] %v972_v61  ;;  %1565 = vst.msk [vmem:[%s6954_s20 + $0x498] sm:$0xff] %vm237_vm0, %v1337_v42 }
 0x27a   : > { %5282 = vmatmul.mubr.msk.f32.gmra.mxu0 %vm237_vm0, %v1653_v48  ;;  %5332 = vmatmul.mubr.msk.f32.gmra.mxu1 %vm237_vm0, %v1653_v48  ;;  %v976_v49 = vpop.f32.mrf.mxu0  ;;  %v1341_v30 = vpop.f32.mrf.mxu1 }
 0x27b   : > { %2098 = vmatprep.mubr.f32.mxu0 %v6388_v0  ;;  %2463 = vmatprep.mubr.f32.mxu1 %v6388_v0  ;;  %1566 = vst [vmem:[%s6954_s20 + $0x4a0] sm:$0xff] %v976_v49  ;;  %1568 = vst [vmem:[%s6954_s20 + $0x4b0] sm:$0xff] %v1341_v30  ;;  %v1665_v49 = vld [vmem:[#allocation5 + $0x178] sm:$0xff] }
 0x27c   : > { %v978_v46 = vpop.f32.mrf.mxu0  ;;  %v1343_v43 = vpop.f32.mrf.mxu1 }
 0x27d   : > { %1567 = vst [vmem:[%s6954_s20 + $0x4a8] sm:$0xff] %v978_v46  ;;  %1569 = vst.msk [vmem:[%s6954_s20 + $0x4b8] sm:$0xff] %vm237_vm0, %v1343_v43 }
 0x27e   : > { %5283 = vmatmul.mubr.msk.f32.gmra.mxu0 %vm237_vm0, %v1654_v62  ;;  %5333 = vmatmul.mubr.msk.f32.gmra.mxu1 %vm237_vm0, %v1654_v62  ;;  %v982_v47 = vpop.f32.mrf.mxu0  ;;  %v1347_v63 = vpop.f32.mrf.mxu1 }
 0x27f   : > { %2104 = vmatprep.mubr.f32.mxu0 %v6388_v0  ;;  %2469 = vmatprep.mubr.f32.mxu1 %v6388_v0  ;;  %1570 = vst [vmem:[%s6954_s20 + $0x4c0] sm:$0xff] %v982_v47  ;;  %1572 = vst [vmem:[%s6954_s20 + $0x4d0] sm:$0xff] %v1347_v63  ;;  %v1666_v47 = vld [vmem:[#allocation5 + $0x180] sm:$0xff] }
 0x280   : > { %v984_v35 = vpop.f32.mrf.mxu0  ;;  %v1349_v44 = vpop.f32.mrf.mxu1 }
 0x281   : > { %1571 = vst [vmem:[%s6954_s20 + $0x4c8] sm:$0xff] %v984_v35  ;;  %1573 = vst.msk [vmem:[%s6954_s20 + $0x4d8] sm:$0xff] %vm237_vm0, %v1349_v44 }
 0x282   : > { %5284 = vmatmul.mubr.msk.f32.gmra.mxu0 %vm237_vm0, %v1655_v52  ;;  %5334 = vmatmul.mubr.msk.f32.gmra.mxu1 %vm237_vm0, %v1655_v52  ;;  %v988_v1 = vpop.f32.mrf.mxu0  ;;  %v1353_v27 = vpop.f32.mrf.mxu1 }
 0x283   : > { %2110 = vmatprep.mubr.f32.mxu0 %v6388_v0  ;;  %2475 = vmatprep.mubr.f32.mxu1 %v6388_v0  ;;  %1574 = vst [vmem:[%s6954_s20 + $0x4e0] sm:$0xff] %v988_v1  ;;  %1576 = vst [vmem:[%s6954_s20 + $0x4f0] sm:$0xff] %v1353_v27  ;;  %v1667_v1 = vld [vmem:[#allocation5 + $0x188] sm:$0xff] }
 0x284   : > { %v990_v34 = vpop.f32.mrf.mxu0  ;;  %v1355_v2 = vpop.f32.mrf.mxu1 }
 0x285   : > { %1575 = vst [vmem:[%s6954_s20 + $0x4e8] sm:$0xff] %v990_v34  ;;  %1577 = vst.msk [vmem:[%s6954_s20 + $0x4f8] sm:$0xff] %vm237_vm0, %v1355_v2 }
 0x286   : > { %5285 = vmatmul.mubr.msk.f32.gmra.mxu0 %vm237_vm0, %v1656_v31  ;;  %5335 = vmatmul.mubr.msk.f32.gmra.mxu1 %vm237_vm0, %v1656_v31  ;;  %v994_v45 = vpop.f32.mrf.mxu0  ;;  %v1359_v36 = vpop.f32.mrf.mxu1 }
 0x287   : > { %2116 = vmatprep.mubr.f32.mxu0 %v6388_v0  ;;  %2481 = vmatprep.mubr.f32.mxu1 %v6388_v0  ;;  %1578 = vst [vmem:[%s6954_s20 + $0x500] sm:$0xff] %v994_v45  ;;  %1580 = vst [vmem:[%s6954_s20 + $0x510] sm:$0xff] %v1359_v36  ;;  %v2749_v45 = vld [vmem:[#allocation5] sm:$0xff] }
 0x288   : > { %v996_v3 = vpop.f32.mrf.mxu0  ;;  %v1361_v54 = vpop.f32.mrf.mxu1 }
 0x289   : > { %1579 = vst [vmem:[%s6954_s20 + $0x508] sm:$0xff] %v996_v3  ;;  %1581 = vst.msk [vmem:[%s6954_s20 + $0x518] sm:$0xff] %vm237_vm0, %v1361_v54 }
 0x28a   : > { %5286 = vmatmul.mubr.msk.f32.gmra.mxu0 %vm237_vm0, %v1657_v53  ;;  %5336 = vmatmul.mubr.msk.f32.gmra.mxu1 %vm237_vm0, %v1657_v53  ;;  %v1000_v50 = vpop.f32.mrf.mxu0  ;;  %v1365_v11 = vpop.f32.mrf.mxu1 }
 0x28b   : > { %2122 = vmatprep.mubr.f32.mxu0 %v6388_v0  ;;  %2487 = vmatprep.mubr.f32.mxu1 %v6388_v0  ;;  %1582 = vst [vmem:[%s6954_s20 + $0x520] sm:$0xff] %v1000_v50  ;;  %1584 = vst [vmem:[%s6954_s20 + $0x530] sm:$0xff] %v1365_v11 }
 0x28c   : > { %v1002_v37 = vpop.f32.mrf.mxu0  ;;  %v1367_v12 = vpop.f32.mrf.mxu1 }
 0x28d   : > { %1583 = vst [vmem:[%s6954_s20 + $0x528] sm:$0xff] %v1002_v37  ;;  %1585 = vst.msk [vmem:[%s6954_s20 + $0x538] sm:$0xff] %vm237_vm0, %v1367_v12 }
 0x28e   : > { %5287 = vmatmul.mubr.msk.f32.gmra.mxu0 %vm237_vm0, %v1658_v4  ;;  %5337 = vmatmul.mubr.msk.f32.gmra.mxu1 %vm237_vm0, %v1658_v4  ;;  %v1006_v55 = vpop.f32.mrf.mxu0  ;;  %v1371_v5 = vpop.f32.mrf.mxu1  ;;  %v2750_v4 = vld [vmem:[#allocation5 + $0x8] sm:$0xff] }
 0x28f   : > { %2128 = vmatprep.mubr.f32.mxu0 %v6388_v0  ;;  %2493 = vmatprep.mubr.f32.mxu1 %v6388_v0  ;;  %1586 = vst [vmem:[%s6954_s20 + $0x540] sm:$0xff] %v1006_v55  ;;  %1588 = vst [vmem:[%s6954_s20 + $0x550] sm:$0xff] %v1371_v5  ;;  %v2752_v5 = vld [vmem:[#allocation5 + $0x18] sm:$0xff] }
 0x290   : > { %v1008_v14 = vpop.f32.mrf.mxu0  ;;  %v1373_v38 = vpop.f32.mrf.mxu1 }
 0x291   : > { %1587 = vst [vmem:[%s6954_s20 + $0x548] sm:$0xff] %v1008_v14  ;;  %1589 = vst.msk [vmem:[%s6954_s20 + $0x558] sm:$0xff] %vm237_vm0, %v1373_v38 }
 0x292   : > { %5288 = vmatmul.mubr.msk.f32.gmra.mxu0 %vm237_vm0, %v1659_v13  ;;  %5338 = vmatmul.mubr.msk.f32.gmra.mxu1 %vm237_vm0, %v1659_v13  ;;  %v1012_v6 = vpop.f32.mrf.mxu0  ;;  %v1377_v56 = vpop.f32.mrf.mxu1 }
 0x293   : > { %2134 = vmatprep.mubr.f32.mxu0 %v6388_v0  ;;  %2499 = vmatprep.mubr.f32.mxu1 %v6388_v0  ;;  %1590 = vst [vmem:[%s6954_s20 + $0x560] sm:$0xff] %v1012_v6  ;;  %1592 = vst [vmem:[%s6954_s20 + $0x570] sm:$0xff] %v1377_v56  ;;  %v2753_v56 = vld [vmem:[#allocation5 + $0x20] sm:$0xff] }
 0x294   : > { %v1014_v16 = vpop.f32.mrf.mxu0  ;;  %v1379_v7 = vpop.f32.mrf.mxu1 }
 0x295   : > { %1591 = vst [vmem:[%s6954_s20 + $0x568] sm:$0xff] %v1014_v16  ;;  %1593 = vst.msk [vmem:[%s6954_s20 + $0x578] sm:$0xff] %vm237_vm0, %v1379_v7 }
 0x296   : > { %5289 = vmatmul.mubr.msk.f32.gmra.mxu0 %vm237_vm0, %v1660_v15  ;;  %5339 = vmatmul.mubr.msk.f32.gmra.mxu1 %vm237_vm0, %v1660_v15  ;;  %v1018_v17 = vpop.f32.mrf.mxu0  ;;  %v1383_v57 = vpop.f32.mrf.mxu1 }
 0x297   : > { %2140 = vmatprep.mubr.f32.mxu0 %v6388_v0  ;;  %2505 = vmatprep.mubr.f32.mxu1 %v6388_v0  ;;  %1594 = vst [vmem:[%s6954_s20 + $0x580] sm:$0xff] %v1018_v17  ;;  %1596 = vst [vmem:[%s6954_s20 + $0x590] sm:$0xff] %v1383_v57  ;;  %v2754_v57 = vld [vmem:[#allocation5 + $0x28] sm:$0xff] }
 0x298   : > { %v1020_v8 = vpop.f32.mrf.mxu0  ;;  %v1385_v18 = vpop.f32.mrf.mxu1 }
 0x299   : > { %1595 = vst [vmem:[%s6954_s20 + $0x588] sm:$0xff] %v1020_v8  ;;  %1597 = vst.msk [vmem:[%s6954_s20 + $0x598] sm:$0xff] %vm237_vm0, %v1385_v18 }
 0x29a   : > { %5290 = vmatmul.mubr.msk.f32.gmra.mxu0 %vm237_vm0, %v1661_v39  ;;  %5340 = vmatmul.mubr.msk.f32.gmra.mxu1 %vm237_vm0, %v1661_v39  ;;  %v1024_v19 = vpop.f32.mrf.mxu0  ;;  %v1389_v58 = vpop.f32.mrf.mxu1 }
 0x29b   : > { %2146 = vmatprep.mubr.f32.mxu0 %v6388_v0  ;;  %2511 = vmatprep.mubr.f32.mxu1 %v6388_v0  ;;  %1598 = vst [vmem:[%s6954_s20 + $0x5a0] sm:$0xff] %v1024_v19  ;;  %1600 = vst [vmem:[%s6954_s20 + $0x5b0] sm:$0xff] %v1389_v58  ;;  %v2755_v58 = vld [vmem:[#allocation5 + $0x30] sm:$0xff] }
 0x29c   : > { %v1026_v20 = vpop.f32.mrf.mxu0  ;;  %v1391_v40 = vpop.f32.mrf.mxu1 }
 0x29d   : > { %1599 = vst [vmem:[%s6954_s20 + $0x5a8] sm:$0xff] %v1026_v20  ;;  %1601 = vst.msk [vmem:[%s6954_s20 + $0x5b8] sm:$0xff] %vm237_vm0, %v1391_v40 }
 0x29e   : > { %5291 = vmatmul.mubr.msk.f32.gmra.mxu0 %vm237_vm0, %v1662_v9  ;;  %5341 = vmatmul.mubr.msk.f32.gmra.mxu1 %vm237_vm0, %v1662_v9  ;;  %v1030_v21 = vpop.f32.mrf.mxu0  ;;  %v1395_v59 = vpop.f32.mrf.mxu1 }
 0x29f   : > { %2152 = vmatprep.mubr.f32.mxu0 %v6388_v0  ;;  %2517 = vmatprep.mubr.f32.mxu1 %v6388_v0  ;;  %1602 = vst [vmem:[%s6954_s20 + $0x5c0] sm:$0xff] %v1030_v21  ;;  %1604 = vst [vmem:[%s6954_s20 + $0x5d0] sm:$0xff] %v1395_v59  ;;  %v2756_v59 = vld [vmem:[#allocation5 + $0x38] sm:$0xff] }
 0x2a0   : > { %v1032_v22 = vpop.f32.mrf.mxu0  ;;  %v1397_v23 = vpop.f32.mrf.mxu1 }
 0x2a1   : > { %1603 = vst [vmem:[%s6954_s20 + $0x5c8] sm:$0xff] %v1032_v22  ;;  %1605 = vst.msk [vmem:[%s6954_s20 + $0x5d8] sm:$0xff] %vm237_vm0, %v1397_v23 }
 0x2a2   : > { %5292 = vmatmul.mubr.msk.f32.gmra.mxu0 %vm237_vm0, %v1663_v10  ;;  %5342 = vmatmul.mubr.msk.f32.gmra.mxu1 %vm237_vm0, %v1663_v10  ;;  %v1036_v41 = vpop.f32.mrf.mxu0  ;;  %v1401_v60 = vpop.f32.mrf.mxu1 }
 0x2a3   : > { %2158 = vmatprep.mubr.f32.mxu0 %v6388_v0  ;;  %2523 = vmatprep.mubr.f32.mxu1 %v6388_v0  ;;  %1606 = vst [vmem:[%s6954_s20 + $0x5e0] sm:$0xff] %v1036_v41  ;;  %1608 = vst [vmem:[%s6954_s20 + $0x5f0] sm:$0xff] %v1401_v60  ;;  %v2757_v60 = vld [vmem:[#allocation5 + $0x40] sm:$0xff] }
 0x2a4   : > { %v1038_v51 = vpop.f32.mrf.mxu0  ;;  %v1403_v48 = vpop.f32.mrf.mxu1 }
 0x2a5   : > { %1607 = vst [vmem:[%s6954_s20 + $0x5e8] sm:$0xff] %v1038_v51  ;;  %1609 = vst.msk [vmem:[%s6954_s20 + $0x5f8] sm:$0xff] %vm237_vm0, %v1403_v48 }
 0x2a6   : > { %5293 = vmatmul.mubr.msk.f32.gmra.mxu0 %vm237_vm0, %v1664_v25  ;;  %5343 = vmatmul.mubr.msk.f32.gmra.mxu1 %vm237_vm0, %v1664_v25  ;;  %v1042_v61 = vpop.f32.mrf.mxu0  ;;  %v1407_v42 = vpop.f32.mrf.mxu1 }
 0x2a7   : > { %2164 = vmatprep.mubr.f32.mxu0 %v6388_v0  ;;  %2529 = vmatprep.mubr.f32.mxu1 %v6388_v0  ;;  %1610 = vst [vmem:[%s6954_s20 + $0x600] sm:$0xff] %v1042_v61  ;;  %1612 = vst [vmem:[%s6954_s20 + $0x610] sm:$0xff] %v1407_v42  ;;  %v2758_v42 = vld [vmem:[#allocation5 + $0x48] sm:$0xff] }
 0x2a8   : > { %v1044_v30 = vpop.f32.mrf.mxu0  ;;  %v1409_v62 = vpop.f32.mrf.mxu1 }
 0x2a9   : > { %1611 = vst [vmem:[%s6954_s20 + $0x608] sm:$0xff] %v1044_v30  ;;  %1613 = vst.msk [vmem:[%s6954_s20 + $0x618] sm:$0xff] %vm237_vm0, %v1409_v62 }
 0x2aa   : > { %5294 = vmatmul.mubr.msk.f32.gmra.mxu0 %vm237_vm0, %v1665_v49  ;;  %5344 = vmatmul.mubr.msk.f32.gmra.mxu1 %vm237_vm0, %v1665_v49  ;;  %v1048_v46 = vpop.f32.mrf.mxu0  ;;  %v1413_v43 = vpop.f32.mrf.mxu1 }
 0x2ab   : > { %2170 = vmatprep.mubr.f32.mxu0 %v6388_v0  ;;  %2535 = vmatprep.mubr.f32.mxu1 %v6388_v0  ;;  %1614 = vst [vmem:[%s6954_s20 + $0x620] sm:$0xff] %v1048_v46  ;;  %1616 = vst [vmem:[%s6954_s20 + $0x630] sm:$0xff] %v1413_v43  ;;  %v2759_v43 = vld [vmem:[#allocation5 + $0x50] sm:$0xff] }
 0x2ac   : > { %v1050_v63 = vpop.f32.mrf.mxu0  ;;  %v1415_v52 = vpop.f32.mrf.mxu1 }
 0x2ad   : > { %1615 = vst [vmem:[%s6954_s20 + $0x628] sm:$0xff] %v1050_v63  ;;  %1617 = vst.msk [vmem:[%s6954_s20 + $0x638] sm:$0xff] %vm237_vm0, %v1415_v52 }
 0x2ae   : > { %5295 = vmatmul.mubr.msk.f32.gmra.mxu0 %vm237_vm0, %v1666_v47  ;;  %5345 = vmatmul.mubr.msk.f32.gmra.mxu1 %vm237_vm0, %v1666_v47  ;;  %v1884_v35 = vpop.f32.mrf.mxu0  ;;  %v2249_v44 = vpop.f32.mrf.mxu1 }
 0x2af   : > { %2176 = vmatprep.mubr.f32.mxu0 %v6388_v0  ;;  %2541 = vmatprep.mubr.f32.mxu1 %v6388_v0  ;;  %5347 = vst [vmem:[%s6954_s20 + $0x640] sm:$0xff] %v1884_v35  ;;  %5349 = vst [vmem:[%s6954_s20 + $0x650] sm:$0xff] %v2249_v44  ;;  %v2760_v44 = vld [vmem:[#allocation5 + $0x58] sm:$0xff] }
 0x2b0   : > { %v1886_v27 = vpop.f32.mrf.mxu0  ;;  %v2251_v31 = vpop.f32.mrf.mxu1 }
 0x2b1   : > { %5348 = vst [vmem:[%s6954_s20 + $0x648] sm:$0xff] %v1886_v27  ;;  %5350 = vst.msk [vmem:[%s6954_s20 + $0x658] sm:$0xff] %vm237_vm0, %v2251_v31 }
 0x2b2   : > { %5296 = vmatmul.mubr.msk.f32.gmra.mxu0 %vm237_vm0, %v1667_v1  ;;  %5346 = vmatmul.mubr.msk.f32.gmra.mxu1 %vm237_vm0, %v1667_v1  ;;  %v1890_v34 = vpop.f32.mrf.mxu0  ;;  %v2255_v2 = vpop.f32.mrf.mxu1 }
 0x2b3   : > { %3013 = vmatprep.mubr.f32.mxu0 %v6388_v0  ;;  %3378 = vmatprep.mubr.f32.mxu1 %v6388_v0  ;;  %5351 = vst [vmem:[%s6954_s20 + $0x660] sm:$0xff] %v1890_v34  ;;  %5353 = vst [vmem:[%s6954_s20 + $0x670] sm:$0xff] %v2255_v2  ;;  %v2761_v2 = vld [vmem:[#allocation5 + $0x60] sm:$0xff] }
 0x2b4   : > { %v1892_v36 = vpop.f32.mrf.mxu0  ;;  %v2257_v53 = vpop.f32.mrf.mxu1 }
 0x2b5   : > { %5352 = vst [vmem:[%s6954_s20 + $0x668] sm:$0xff] %v1892_v36  ;;  %5354 = vst.msk [vmem:[%s6954_s20 + $0x678] sm:$0xff] %vm237_vm0, %v2257_v53 }
 0x2b6   : > { %5547 = vmatmul.mubr.msk.f32.vlgmr.msra.gmra.mxu0 %vm237_vm0, %v2749_v45  ;;  %5597 = vmatmul.mubr.msk.f32.vlgmr.msra.gmra.mxu1 %vm237_vm0, %v2749_v45  ;;  %v1896_v3 = vpop.f32.mrf.mxu0  ;;  %v2261_v54 = vpop.f32.mrf.mxu1 }
 0x2b7   : > { %4109 = vmatpush1.msra.mxu0 %v6941_v32  ;;  %4474 = vmatpush1.msra.mxu1 %v6943_v33  ;;  %5355 = vst [vmem:[%s6954_s20 + $0x680] sm:$0xff] %v1896_v3  ;;  %5357 = vst [vmem:[%s6954_s20 + $0x690] sm:$0xff] %v2261_v54  ;;  %v2751_v32 = vld [vmem:[#allocation5 + $0x10] sm:$0xff]  ;;  %v2762_v54 = vld [vmem:[#allocation5 + $0x68] sm:$0xff] }
 0x2b8   : > { %4110 = vmatprep.subr.mxu0 %v6933_v28  ;;  %4475 = vmatprep.subr.mxu1 %v6935_v29  ;;  %v1898_v50 = vpop.f32.mrf.mxu0  ;;  %v2263_v11 = vpop.f32.mrf.mxu1 }
 0x2b9   : > { %4111 = vmatpush1.msra.mxu0 %v6925_v24  ;;  %4476 = vmatpush1.msra.mxu1 %v6927_v26  ;;  %5356 = vst [vmem:[%s6954_s20 + $0x688] sm:$0xff] %v1898_v50  ;;  %5358 = vst.msk [vmem:[%s6954_s20 + $0x698] sm:$0xff] %vm237_vm0, %v2263_v11 }
 0x2ba   : > { %3019 = vmatprep.mubr.f32.mxu0 %v6388_v0  ;;  %3384 = vmatprep.mubr.f32.mxu1 %v6388_v0  ;;  %v1902_v28 = vpop.f32.mrf.mxu0  ;;  %v2267_v29 = vpop.f32.mrf.mxu1 }
 0x2bb   : > { %5359 = vst [vmem:[%s6954_s20 + $0x6a0] sm:$0xff] %v1902_v28  ;;  %5361 = vst [vmem:[%s6954_s20 + $0x6b0] sm:$0xff] %v2267_v29  ;;  %5548 = vmatmul.mubr.msk.f32.gmra.mxu0 %vm237_vm0, %v2750_v4  ;;  %5598 = vmatmul.mubr.msk.f32.gmra.mxu1 %vm237_vm0, %v2750_v4  ;;  %v2763_v29 = vld [vmem:[#allocation5 + $0x70] sm:$0xff] }
 0x2bc   : > { %v1904_v24 = vpop.f32.mrf.mxu0  ;;  %v2269_v26 = vpop.f32.mrf.mxu1  ;;  %3025 = vmatprep.mubr.f32.mxu0 %v6388_v0  ;;  %3390 = vmatprep.mubr.f32.mxu1 %v6388_v0 }
 0x2bd   : > { %5360 = vst [vmem:[%s6954_s20 + $0x6a8] sm:$0xff] %v1904_v24  ;;  %5362 = vst.msk [vmem:[%s6954_s20 + $0x6b8] sm:$0xff] %vm237_vm0, %v2269_v26 }
 0x2be   : > { %v1908_v33 = vpop.f32.mrf.mxu0  ;;  %v2273_v37 = vpop.f32.mrf.mxu1 }
 0x2bf   : > { %5363 = vst [vmem:[%s6954_s20 + $0x6c0] sm:$0xff] %v1908_v33  ;;  %5365 = vst [vmem:[%s6954_s20 + $0x6d0] sm:$0xff] %v2273_v37  ;;  %5549 = vmatmul.mubr.msk.f32.gmra.mxu0 %vm237_vm0, %v2751_v32  ;;  %5599 = vmatmul.mubr.msk.f32.gmra.mxu1 %vm237_vm0, %v2751_v32  ;;  %v2764_v37 = vld [vmem:[#allocation5 + $0x78] sm:$0xff] }
 0x2c0   : > { %v1910_v12 = vpop.f32.mrf.mxu0  ;;  %v2275_v55 = vpop.f32.mrf.mxu1  ;;  %3031 = vmatprep.mubr.f32.mxu0 %v6388_v0  ;;  %3396 = vmatprep.mubr.f32.mxu1 %v6388_v0 }
 0x2c1   : > { %5364 = vst [vmem:[%s6954_s20 + $0x6c8] sm:$0xff] %v1910_v12  ;;  %5366 = vst.msk [vmem:[%s6954_s20 + $0x6d8] sm:$0xff] %vm237_vm0, %v2275_v55 }
 0x2c2   : > { %v1914_v13 = vpop.f32.mrf.mxu0  ;;  %v2279_v14 = vpop.f32.mrf.mxu1 }
 0x2c3   : > { %5367 = vst [vmem:[%s6954_s20 + $0x6e0] sm:$0xff] %v1914_v13  ;;  %5369 = vst [vmem:[%s6954_s20 + $0x6f0] sm:$0xff] %v2279_v14  ;;  %5550 = vmatmul.mubr.msk.f32.gmra.mxu0 %vm237_vm0, %v2752_v5  ;;  %5600 = vmatmul.mubr.msk.f32.gmra.mxu1 %vm237_vm0, %v2752_v5  ;;  %v2765_v14 = vld [vmem:[#allocation5 + $0x80] sm:$0xff] }
 0x2c4   : > { %v1916_v38 = vpop.f32.mrf.mxu0  ;;  %v2281_v6 = vpop.f32.mrf.mxu1  ;;  %3037 = vmatprep.mubr.f32.mxu0 %v6388_v0  ;;  %3402 = vmatprep.mubr.f32.mxu1 %v6388_v0 }
 0x2c5   : > { %5368 = vst [vmem:[%s6954_s20 + $0x6e8] sm:$0xff] %v1916_v38  ;;  %5370 = vst.msk [vmem:[%s6954_s20 + $0x6f8] sm:$0xff] %vm237_vm0, %v2281_v6 }
 0x2c6   : > { %v1920_v15 = vpop.f32.mrf.mxu0  ;;  %v2285_v16 = vpop.f32.mrf.mxu1 }
 0x2c7   : > { %5371 = vst [vmem:[%s6954_s20 + $0x700] sm:$0xff] %v1920_v15  ;;  %5373 = vst [vmem:[%s6954_s20 + $0x710] sm:$0xff] %v2285_v16  ;;  %5551 = vmatmul.mubr.msk.f32.gmra.mxu0 %vm237_vm0, %v2753_v56  ;;  %5601 = vmatmul.mubr.msk.f32.gmra.mxu1 %vm237_vm0, %v2753_v56  ;;  %v2766_v16 = vld [vmem:[#allocation5 + $0x88] sm:$0xff] }
 0x2c8   : > { %v1922_v7 = vpop.f32.mrf.mxu0  ;;  %v2287_v17 = vpop.f32.mrf.mxu1  ;;  %3043 = vmatprep.mubr.f32.mxu0 %v6388_v0  ;;  %3408 = vmatprep.mubr.f32.mxu1 %v6388_v0 }
 0x2c9   : > { %5372 = vst [vmem:[%s6954_s20 + $0x708] sm:$0xff] %v1922_v7  ;;  %5374 = vst.msk [vmem:[%s6954_s20 + $0x718] sm:$0xff] %vm237_vm0, %v2287_v17 }
 0x2ca   : > { %v1926_v39 = vpop.f32.mrf.mxu0  ;;  %v2291_v8 = vpop.f32.mrf.mxu1 }
 0x2cb   : > { %5375 = vst [vmem:[%s6954_s20 + $0x720] sm:$0xff] %v1926_v39  ;;  %5377 = vst [vmem:[%s6954_s20 + $0x730] sm:$0xff] %v2291_v8  ;;  %5552 = vmatmul.mubr.msk.f32.gmra.mxu0 %vm237_vm0, %v2754_v57  ;;  %5602 = vmatmul.mubr.msk.f32.gmra.mxu1 %vm237_vm0, %v2754_v57  ;;  %v2767_v8 = vld [vmem:[#allocation5 + $0x90] sm:$0xff] }
 0x2cc   : > { %v1928_v18 = vpop.f32.mrf.mxu0  ;;  %v2293_v19 = vpop.f32.mrf.mxu1  ;;  %3049 = vmatprep.mubr.f32.mxu0 %v6388_v0  ;;  %3414 = vmatprep.mubr.f32.mxu1 %v6388_v0 }
 0x2cd   : > { %5376 = vst [vmem:[%s6954_s20 + $0x728] sm:$0xff] %v1928_v18  ;;  %5378 = vst.msk [vmem:[%s6954_s20 + $0x738] sm:$0xff] %vm237_vm0, %v2293_v19 }
 0x2ce   : > { %v1932_v9 = vpop.f32.mrf.mxu0  ;;  %v2297_v20 = vpop.f32.mrf.mxu1 }
 0x2cf   : > { %5379 = vst [vmem:[%s6954_s20 + $0x740] sm:$0xff] %v1932_v9  ;;  %5381 = vst [vmem:[%s6954_s20 + $0x750] sm:$0xff] %v2297_v20  ;;  %5553 = vmatmul.mubr.msk.f32.gmra.mxu0 %vm237_vm0, %v2755_v58  ;;  %5603 = vmatmul.mubr.msk.f32.gmra.mxu1 %vm237_vm0, %v2755_v58  ;;  %v2768_v20 = vld [vmem:[#allocation5 + $0x98] sm:$0xff] }
 0x2d0   : > { %v1934_v40 = vpop.f32.mrf.mxu0  ;;  %v2299_v21 = vpop.f32.mrf.mxu1  ;;  %3055 = vmatprep.mubr.f32.mxu0 %v6388_v0  ;;  %3420 = vmatprep.mubr.f32.mxu1 %v6388_v0 }
 0x2d1   : > { %5380 = vst [vmem:[%s6954_s20 + $0x748] sm:$0xff] %v1934_v40  ;;  %5382 = vst.msk [vmem:[%s6954_s20 + $0x758] sm:$0xff] %vm237_vm0, %v2299_v21 }
 0x2d2   : > { %v1938_v10 = vpop.f32.mrf.mxu0  ;;  %v2303_v22 = vpop.f32.mrf.mxu1 }
 0x2d3   : > { %5383 = vst [vmem:[%s6954_s20 + $0x760] sm:$0xff] %v1938_v10  ;;  %5385 = vst [vmem:[%s6954_s20 + $0x770] sm:$0xff] %v2303_v22  ;;  %5554 = vmatmul.mubr.msk.f32.gmra.mxu0 %vm237_vm0, %v2756_v59  ;;  %5604 = vmatmul.mubr.msk.f32.gmra.mxu1 %vm237_vm0, %v2756_v59  ;;  %v2769_v22 = vld [vmem:[#allocation5 + $0xa0] sm:$0xff] }
 0x2d4   : > { %v1940_v23 = vpop.f32.mrf.mxu0  ;;  %v2305_v41 = vpop.f32.mrf.mxu1  ;;  %3061 = vmatprep.mubr.f32.mxu0 %v6388_v0  ;;  %3426 = vmatprep.mubr.f32.mxu1 %v6388_v0 }
 0x2d5   : > { %5384 = vst [vmem:[%s6954_s20 + $0x768] sm:$0xff] %v1940_v23  ;;  %5386 = vst.msk [vmem:[%s6954_s20 + $0x778] sm:$0xff] %vm237_vm0, %v2305_v41 }
 0x2d6   : > { %v1944_v25 = vpop.f32.mrf.mxu0  ;;  %v2309_v51 = vpop.f32.mrf.mxu1 }
 0x2d7   : > { %5387 = vst [vmem:[%s6954_s20 + $0x780] sm:$0xff] %v1944_v25  ;;  %5389 = vst [vmem:[%s6954_s20 + $0x790] sm:$0xff] %v2309_v51  ;;  %5555 = vmatmul.mubr.msk.f32.gmra.mxu0 %vm237_vm0, %v2757_v60  ;;  %5605 = vmatmul.mubr.msk.f32.gmra.mxu1 %vm237_vm0, %v2757_v60  ;;  %v2770_v51 = vld [vmem:[#allocation5 + $0xa8] sm:$0xff] }
 0x2d8   : > { %v1946_v48 = vpop.f32.mrf.mxu0  ;;  %v2311_v61 = vpop.f32.mrf.mxu1  ;;  %3067 = vmatprep.mubr.f32.mxu0 %v6388_v0  ;;  %3432 = vmatprep.mubr.f32.mxu1 %v6388_v0 }
 0x2d9   : > { %5388 = vst [vmem:[%s6954_s20 + $0x788] sm:$0xff] %v1946_v48  ;;  %5390 = vst.msk [vmem:[%s6954_s20 + $0x798] sm:$0xff] %vm237_vm0, %v2311_v61 }
 0x2da   : > { %v1950_v49 = vpop.f32.mrf.mxu0  ;;  %v2315_v30 = vpop.f32.mrf.mxu1 }
 0x2db   : > { %5391 = vst [vmem:[%s6954_s20 + $0x7a0] sm:$0xff] %v1950_v49  ;;  %5393 = vst [vmem:[%s6954_s20 + $0x7b0] sm:$0xff] %v2315_v30  ;;  %5556 = vmatmul.mubr.msk.f32.gmra.mxu0 %vm237_vm0, %v2758_v42  ;;  %5606 = vmatmul.mubr.msk.f32.gmra.mxu1 %vm237_vm0, %v2758_v42  ;;  %v2771_v30 = vld [vmem:[#allocation5 + $0xb0] sm:$0xff] }
 0x2dc   : > { %v1952_v62 = vpop.f32.mrf.mxu0  ;;  %v2317_v46 = vpop.f32.mrf.mxu1  ;;  %3073 = vmatprep.mubr.f32.mxu0 %v6388_v0  ;;  %3438 = vmatprep.mubr.f32.mxu1 %v6388_v0 }
 0x2dd   : > { %5392 = vst [vmem:[%s6954_s20 + $0x7a8] sm:$0xff] %v1952_v62  ;;  %5394 = vst.msk [vmem:[%s6954_s20 + $0x7b8] sm:$0xff] %vm237_vm0, %v2317_v46 }
 0x2de   : > { %v1956_v47 = vpop.f32.mrf.mxu0  ;;  %v2321_v63 = vpop.f32.mrf.mxu1 }
 0x2df   : > { %5395 = vst [vmem:[%s6954_s20 + $0x7c0] sm:$0xff] %v1956_v47  ;;  %5397 = vst [vmem:[%s6954_s20 + $0x7d0] sm:$0xff] %v2321_v63  ;;  %5557 = vmatmul.mubr.msk.f32.gmra.mxu0 %vm237_vm0, %v2759_v43  ;;  %5607 = vmatmul.mubr.msk.f32.gmra.mxu1 %vm237_vm0, %v2759_v43  ;;  %v2772_v63 = vld [vmem:[#allocation5 + $0xb8] sm:$0xff] }
 0x2e0   : > { %v1958_v52 = vpop.f32.mrf.mxu0  ;;  %v2323_v35 = vpop.f32.mrf.mxu1  ;;  %3079 = vmatprep.mubr.f32.mxu0 %v6388_v0  ;;  %3444 = vmatprep.mubr.f32.mxu1 %v6388_v0 }
 0x2e1   : > { %5396 = vst [vmem:[%s6954_s20 + $0x7c8] sm:$0xff] %v1958_v52  ;;  %5398 = vst.msk [vmem:[%s6954_s20 + $0x7d8] sm:$0xff] %vm237_vm0, %v2323_v35 }
 0x2e2   : > { %v1962_v1 = vpop.f32.mrf.mxu0  ;;  %v2327_v27 = vpop.f32.mrf.mxu1 }
 0x2e3   : > { %5399 = vst [vmem:[%s6954_s20 + $0x7e0] sm:$0xff] %v1962_v1  ;;  %5401 = vst [vmem:[%s6954_s20 + $0x7f0] sm:$0xff] %v2327_v27  ;;  %5558 = vmatmul.mubr.msk.f32.gmra.mxu0 %vm237_vm0, %v2760_v44  ;;  %5608 = vmatmul.mubr.msk.f32.gmra.mxu1 %vm237_vm0, %v2760_v44  ;;  %v2773_v27 = vld [vmem:[#allocation5 + $0xc0] sm:$0xff] }
 0x2e4   : > { %v1964_v31 = vpop.f32.mrf.mxu0  ;;  %v2329_v34 = vpop.f32.mrf.mxu1  ;;  %3085 = vmatprep.mubr.f32.mxu0 %v6388_v0  ;;  %3450 = vmatprep.mubr.f32.mxu1 %v6388_v0 }
 0x2e5   : > { %5400 = vst [vmem:[%s6954_s20 + $0x7e8] sm:$0xff] %v1964_v31  ;;  %5402 = vst.msk [vmem:[%s6954_s20 + $0x7f8] sm:$0xff] %vm237_vm0, %v2329_v34 }
 0x2e6   : > { %v1968_v45 = vpop.f32.mrf.mxu0  ;;  %v2333_v36 = vpop.f32.mrf.mxu1 }
 0x2e7   : > { %5403 = vst [vmem:[%s6954_s20 + $0x800] sm:$0xff] %v1968_v45  ;;  %5405 = vst [vmem:[%s6954_s20 + $0x810] sm:$0xff] %v2333_v36  ;;  %5559 = vmatmul.mubr.msk.f32.gmra.mxu0 %vm237_vm0, %v2761_v2  ;;  %5609 = vmatmul.mubr.msk.f32.gmra.mxu1 %vm237_vm0, %v2761_v2  ;;  %v2774_v36 = vld [vmem:[#allocation5 + $0xc8] sm:$0xff] }
 0x2e8   : > { %v1970_v53 = vpop.f32.mrf.mxu0  ;;  %v2335_v3 = vpop.f32.mrf.mxu1  ;;  %3091 = vmatprep.mubr.f32.mxu0 %v6388_v0  ;;  %3456 = vmatprep.mubr.f32.mxu1 %v6388_v0 }
 0x2e9   : > { %5404 = vst [vmem:[%s6954_s20 + $0x808] sm:$0xff] %v1970_v53  ;;  %5406 = vst.msk [vmem:[%s6954_s20 + $0x818] sm:$0xff] %vm237_vm0, %v2335_v3 }
 0x2ea   : > { %v1974_v50 = vpop.f32.mrf.mxu0  ;;  %v2339_v11 = vpop.f32.mrf.mxu1 }
 0x2eb   : > { %5407 = vst [vmem:[%s6954_s20 + $0x820] sm:$0xff] %v1974_v50  ;;  %5409 = vst [vmem:[%s6954_s20 + $0x830] sm:$0xff] %v2339_v11  ;;  %5560 = vmatmul.mubr.msk.f32.gmra.mxu0 %vm237_vm0, %v2762_v54  ;;  %5610 = vmatmul.mubr.msk.f32.gmra.mxu1 %vm237_vm0, %v2762_v54  ;;  %v2775_v11 = vld [vmem:[#allocation5 + $0xd0] sm:$0xff] }
 0x2ec   : > { %v1976_v4 = vpop.f32.mrf.mxu0  ;;  %v2341_v28 = vpop.f32.mrf.mxu1  ;;  %3097 = vmatprep.mubr.f32.mxu0 %v6388_v0  ;;  %3462 = vmatprep.mubr.f32.mxu1 %v6388_v0 }
 0x2ed   : > { %5408 = vst [vmem:[%s6954_s20 + $0x828] sm:$0xff] %v1976_v4  ;;  %5410 = vst.msk [vmem:[%s6954_s20 + $0x838] sm:$0xff] %vm237_vm0, %v2341_v28 }
 0x2ee   : > { %v1980_v24 = vpop.f32.mrf.mxu0  ;;  %v2345_v26 = vpop.f32.mrf.mxu1 }
 0x2ef   : > { %5411 = vst [vmem:[%s6954_s20 + $0x840] sm:$0xff] %v1980_v24  ;;  %5413 = vst [vmem:[%s6954_s20 + $0x850] sm:$0xff] %v2345_v26  ;;  %5561 = vmatmul.mubr.msk.f32.gmra.mxu0 %vm237_vm0, %v2763_v29  ;;  %5611 = vmatmul.mubr.msk.f32.gmra.mxu1 %vm237_vm0, %v2763_v29  ;;  %v2776_v26 = vld [vmem:[#allocation5 + $0xd8] sm:$0xff] }
 0x2f0   : > { %v1982_v32 = vpop.f32.mrf.mxu0  ;;  %v2347_v33 = vpop.f32.mrf.mxu1  ;;  %3103 = vmatprep.mubr.f32.mxu0 %v6388_v0  ;;  %3468 = vmatprep.mubr.f32.mxu1 %v6388_v0 }
 0x2f1   : > { %5412 = vst [vmem:[%s6954_s20 + $0x848] sm:$0xff] %v1982_v32  ;;  %5414 = vst.msk [vmem:[%s6954_s20 + $0x858] sm:$0xff] %vm237_vm0, %v2347_v33 }
 0x2f2   : > { %v1986_v12 = vpop.f32.mrf.mxu0  ;;  %v2351_v55 = vpop.f32.mrf.mxu1 }
 0x2f3   : > { %5415 = vst [vmem:[%s6954_s20 + $0x860] sm:$0xff] %v1986_v12  ;;  %5417 = vst [vmem:[%s6954_s20 + $0x870] sm:$0xff] %v2351_v55  ;;  %5562 = vmatmul.mubr.msk.f32.gmra.mxu0 %vm237_vm0, %v2764_v37  ;;  %5612 = vmatmul.mubr.msk.f32.gmra.mxu1 %vm237_vm0, %v2764_v37  ;;  %v2777_v55 = vld [vmem:[#allocation5 + $0xe0] sm:$0xff] }
 0x2f4   : > { %v1988_v5 = vpop.f32.mrf.mxu0  ;;  %v2353_v13 = vpop.f32.mrf.mxu1  ;;  %3109 = vmatprep.mubr.f32.mxu0 %v6388_v0  ;;  %3474 = vmatprep.mubr.f32.mxu1 %v6388_v0 }
 0x2f5   : > { %5416 = vst [vmem:[%s6954_s20 + $0x868] sm:$0xff] %v1988_v5  ;;  %5418 = vst.msk [vmem:[%s6954_s20 + $0x878] sm:$0xff] %vm237_vm0, %v2353_v13 }
 0x2f6   : > { %v1992_v38 = vpop.f32.mrf.mxu0  ;;  %v2357_v6 = vpop.f32.mrf.mxu1 }
 0x2f7   : > { %5419 = vst [vmem:[%s6954_s20 + $0x880] sm:$0xff] %v1992_v38  ;;  %5421 = vst [vmem:[%s6954_s20 + $0x890] sm:$0xff] %v2357_v6  ;;  %5563 = vmatmul.mubr.msk.f32.gmra.mxu0 %vm237_vm0, %v2765_v14  ;;  %5613 = vmatmul.mubr.msk.f32.gmra.mxu1 %vm237_vm0, %v2765_v14  ;;  %v2778_v6 = vld [vmem:[#allocation5 + $0xe8] sm:$0xff] }
 0x2f8   : > { %v1994_v56 = vpop.f32.mrf.mxu0  ;;  %v2359_v15 = vpop.f32.mrf.mxu1  ;;  %3115 = vmatprep.mubr.f32.mxu0 %v6388_v0  ;;  %3480 = vmatprep.mubr.f32.mxu1 %v6388_v0 }
 0x2f9   : > { %5420 = vst [vmem:[%s6954_s20 + $0x888] sm:$0xff] %v1994_v56  ;;  %5422 = vst.msk [vmem:[%s6954_s20 + $0x898] sm:$0xff] %vm237_vm0, %v2359_v15 }
 0x2fa   : > { %v1998_v7 = vpop.f32.mrf.mxu0  ;;  %v2363_v17 = vpop.f32.mrf.mxu1 }
 0x2fb   : > { %5423 = vst [vmem:[%s6954_s20 + $0x8a0] sm:$0xff] %v1998_v7  ;;  %5425 = vst [vmem:[%s6954_s20 + $0x8b0] sm:$0xff] %v2363_v17  ;;  %5564 = vmatmul.mubr.msk.f32.gmra.mxu0 %vm237_vm0, %v2766_v16  ;;  %5614 = vmatmul.mubr.msk.f32.gmra.mxu1 %vm237_vm0, %v2766_v16  ;;  %v2779_v17 = vld [vmem:[#allocation5 + $0xf0] sm:$0xff] }
 0x2fc   : > { %v2000_v57 = vpop.f32.mrf.mxu0  ;;  %v2365_v39 = vpop.f32.mrf.mxu1  ;;  %3121 = vmatprep.mubr.f32.mxu0 %v6388_v0  ;;  %3486 = vmatprep.mubr.f32.mxu1 %v6388_v0 }
 0x2fd   : > { %5424 = vst [vmem:[%s6954_s20 + $0x8a8] sm:$0xff] %v2000_v57  ;;  %5426 = vst.msk [vmem:[%s6954_s20 + $0x8b8] sm:$0xff] %vm237_vm0, %v2365_v39 }
 0x2fe   : > { %v2004_v18 = vpop.f32.mrf.mxu0  ;;  %v2369_v19 = vpop.f32.mrf.mxu1 }
 0x2ff   : > { %5427 = vst [vmem:[%s6954_s20 + $0x8c0] sm:$0xff] %v2004_v18  ;;  %5429 = vst [vmem:[%s6954_s20 + $0x8d0] sm:$0xff] %v2369_v19  ;;  %5565 = vmatmul.mubr.msk.f32.gmra.mxu0 %vm237_vm0, %v2767_v8  ;;  %5615 = vmatmul.mubr.msk.f32.gmra.mxu1 %vm237_vm0, %v2767_v8  ;;  %v2780_v19 = vld [vmem:[#allocation5 + $0xf8] sm:$0xff] }
 0x300   : > { %v2006_v58 = vpop.f32.mrf.mxu0  ;;  %v2371_v9 = vpop.f32.mrf.mxu1  ;;  %3127 = vmatprep.mubr.f32.mxu0 %v6388_v0  ;;  %3492 = vmatprep.mubr.f32.mxu1 %v6388_v0 }
 0x301   : > { %5428 = vst [vmem:[%s6954_s20 + $0x8c8] sm:$0xff] %v2006_v58  ;;  %5430 = vst.msk [vmem:[%s6954_s20 + $0x8d8] sm:$0xff] %vm237_vm0, %v2371_v9 }
 0x302   : > { %v2010_v40 = vpop.f32.mrf.mxu0  ;;  %v2375_v21 = vpop.f32.mrf.mxu1 }
 0x303   : > { %5431 = vst [vmem:[%s6954_s20 + $0x8e0] sm:$0xff] %v2010_v40  ;;  %5433 = vst [vmem:[%s6954_s20 + $0x8f0] sm:$0xff] %v2375_v21  ;;  %5566 = vmatmul.mubr.msk.f32.gmra.mxu0 %vm237_vm0, %v2768_v20  ;;  %5616 = vmatmul.mubr.msk.f32.gmra.mxu1 %vm237_vm0, %v2768_v20  ;;  %v2781_v21 = vld [vmem:[#allocation5 + $0x100] sm:$0xff] }
 0x304   : > { %v2012_v59 = vpop.f32.mrf.mxu0  ;;  %v2377_v10 = vpop.f32.mrf.mxu1  ;;  %3133 = vmatprep.mubr.f32.mxu0 %v6388_v0  ;;  %3498 = vmatprep.mubr.f32.mxu1 %v6388_v0 }
 0x305   : > { %5432 = vst [vmem:[%s6954_s20 + $0x8e8] sm:$0xff] %v2012_v59  ;;  %5434 = vst.msk [vmem:[%s6954_s20 + $0x8f8] sm:$0xff] %vm237_vm0, %v2377_v10 }
 0x306   : > { %v2016_v23 = vpop.f32.mrf.mxu0  ;;  %v2381_v41 = vpop.f32.mrf.mxu1 }
 0x307   : > { %5435 = vst [vmem:[%s6954_s20 + $0x900] sm:$0xff] %v2016_v23  ;;  %5437 = vst [vmem:[%s6954_s20 + $0x910] sm:$0xff] %v2381_v41  ;;  %5567 = vmatmul.mubr.msk.f32.gmra.mxu0 %vm237_vm0, %v2769_v22  ;;  %5617 = vmatmul.mubr.msk.f32.gmra.mxu1 %vm237_vm0, %v2769_v22  ;;  %v2782_v41 = vld [vmem:[#allocation5 + $0x108] sm:$0xff] }
 0x308   : > { %v2018_v60 = vpop.f32.mrf.mxu0  ;;  %v2383_v25 = vpop.f32.mrf.mxu1  ;;  %3139 = vmatprep.mubr.f32.mxu0 %v6388_v0  ;;  %3504 = vmatprep.mubr.f32.mxu1 %v6388_v0 }
 0x309   : > { %5436 = vst [vmem:[%s6954_s20 + $0x908] sm:$0xff] %v2018_v60  ;;  %5438 = vst.msk [vmem:[%s6954_s20 + $0x918] sm:$0xff] %vm237_vm0, %v2383_v25 }
 0x30a   : > { %v2022_v48 = vpop.f32.mrf.mxu0  ;;  %v2387_v61 = vpop.f32.mrf.mxu1 }
 0x30b   : > { %5439 = vst [vmem:[%s6954_s20 + $0x920] sm:$0xff] %v2022_v48  ;;  %5441 = vst [vmem:[%s6954_s20 + $0x930] sm:$0xff] %v2387_v61  ;;  %5568 = vmatmul.mubr.msk.f32.gmra.mxu0 %vm237_vm0, %v2770_v51  ;;  %5618 = vmatmul.mubr.msk.f32.gmra.mxu1 %vm237_vm0, %v2770_v51  ;;  %v2783_v61 = vld [vmem:[#allocation5 + $0x110] sm:$0xff] }
 0x30c   : > { %v2024_v42 = vpop.f32.mrf.mxu0  ;;  %v2389_v49 = vpop.f32.mrf.mxu1  ;;  %3145 = vmatprep.mubr.f32.mxu0 %v6388_v0  ;;  %3510 = vmatprep.mubr.f32.mxu1 %v6388_v0 }
 0x30d   : > { %5440 = vst [vmem:[%s6954_s20 + $0x928] sm:$0xff] %v2024_v42  ;;  %5442 = vst.msk [vmem:[%s6954_s20 + $0x938] sm:$0xff] %vm237_vm0, %v2389_v49 }
 0x30e   : > { %v2028_v62 = vpop.f32.mrf.mxu0  ;;  %v2393_v46 = vpop.f32.mrf.mxu1 }
 0x30f   : > { %5443 = vst [vmem:[%s6954_s20 + $0x940] sm:$0xff] %v2028_v62  ;;  %5445 = vst [vmem:[%s6954_s20 + $0x950] sm:$0xff] %v2393_v46  ;;  %5569 = vmatmul.mubr.msk.f32.gmra.mxu0 %vm237_vm0, %v2771_v30  ;;  %5619 = vmatmul.mubr.msk.f32.gmra.mxu1 %vm237_vm0, %v2771_v30  ;;  %v2784_v46 = vld [vmem:[#allocation5 + $0x118] sm:$0xff] }
 0x310   : > { %v2030_v43 = vpop.f32.mrf.mxu0  ;;  %v2395_v47 = vpop.f32.mrf.mxu1  ;;  %3151 = vmatprep.mubr.f32.mxu0 %v6388_v0  ;;  %3516 = vmatprep.mubr.f32.mxu1 %v6388_v0 }
 0x311   : > { %5444 = vst [vmem:[%s6954_s20 + $0x948] sm:$0xff] %v2030_v43  ;;  %5446 = vst.msk [vmem:[%s6954_s20 + $0x958] sm:$0xff] %vm237_vm0, %v2395_v47 }
 0x312   : > { %v2034_v52 = vpop.f32.mrf.mxu0  ;;  %v2399_v35 = vpop.f32.mrf.mxu1 }
 0x313   : > { %5447 = vst [vmem:[%s6954_s20 + $0x960] sm:$0xff] %v2034_v52  ;;  %5449 = vst [vmem:[%s6954_s20 + $0x970] sm:$0xff] %v2399_v35  ;;  %5570 = vmatmul.mubr.msk.f32.gmra.mxu0 %vm237_vm0, %v2772_v63  ;;  %5620 = vmatmul.mubr.msk.f32.gmra.mxu1 %vm237_vm0, %v2772_v63  ;;  %v2785_v35 = vld [vmem:[#allocation5 + $0x120] sm:$0xff] }
 0x314   : > { %v2036_v44 = vpop.f32.mrf.mxu0  ;;  %v2401_v1 = vpop.f32.mrf.mxu1  ;;  %3157 = vmatprep.mubr.f32.mxu0 %v6388_v0  ;;  %3522 = vmatprep.mubr.f32.mxu1 %v6388_v0 }
 0x315   : > { %5448 = vst [vmem:[%s6954_s20 + $0x968] sm:$0xff] %v2036_v44  ;;  %5450 = vst.msk [vmem:[%s6954_s20 + $0x978] sm:$0xff] %vm237_vm0, %v2401_v1 }
 0x316   : > { %v2040_v31 = vpop.f32.mrf.mxu0  ;;  %v2405_v34 = vpop.f32.mrf.mxu1 }
 0x317   : > { %5451 = vst [vmem:[%s6954_s20 + $0x980] sm:$0xff] %v2040_v31  ;;  %5453 = vst [vmem:[%s6954_s20 + $0x990] sm:$0xff] %v2405_v34  ;;  %5571 = vmatmul.mubr.msk.f32.gmra.mxu0 %vm237_vm0, %v2773_v27  ;;  %5621 = vmatmul.mubr.msk.f32.gmra.mxu1 %vm237_vm0, %v2773_v27  ;;  %v2786_v34 = vld [vmem:[#allocation5 + $0x128] sm:$0xff] }
 0x318   : > { %v2042_v2 = vpop.f32.mrf.mxu0  ;;  %v2407_v45 = vpop.f32.mrf.mxu1  ;;  %3163 = vmatprep.mubr.f32.mxu0 %v6388_v0  ;;  %3528 = vmatprep.mubr.f32.mxu1 %v6388_v0 }
 0x319   : > { %5452 = vst [vmem:[%s6954_s20 + $0x988] sm:$0xff] %v2042_v2  ;;  %5454 = vst.msk [vmem:[%s6954_s20 + $0x998] sm:$0xff] %vm237_vm0, %v2407_v45 }
 0x31a   : > { %v2046_v53 = vpop.f32.mrf.mxu0  ;;  %v2411_v3 = vpop.f32.mrf.mxu1 }
 0x31b   : > { %5455 = vst [vmem:[%s6954_s20 + $0x9a0] sm:$0xff] %v2046_v53  ;;  %5457 = vst [vmem:[%s6954_s20 + $0x9b0] sm:$0xff] %v2411_v3  ;;  %5572 = vmatmul.mubr.msk.f32.gmra.mxu0 %vm237_vm0, %v2774_v36  ;;  %5622 = vmatmul.mubr.msk.f32.gmra.mxu1 %vm237_vm0, %v2774_v36  ;;  %v2787_v3 = vld [vmem:[#allocation5 + $0x130] sm:$0xff] }
 0x31c   : > { %v2048_v54 = vpop.f32.mrf.mxu0  ;;  %v2413_v50 = vpop.f32.mrf.mxu1  ;;  %3169 = vmatprep.mubr.f32.mxu0 %v6388_v0  ;;  %3534 = vmatprep.mubr.f32.mxu1 %v6388_v0 }
 0x31d   : > { %5456 = vst [vmem:[%s6954_s20 + $0x9a8] sm:$0xff] %v2048_v54  ;;  %5458 = vst.msk [vmem:[%s6954_s20 + $0x9b8] sm:$0xff] %vm237_vm0, %v2413_v50 }
 0x31e   : > { %v2052_v4 = vpop.f32.mrf.mxu0  ;;  %v2417_v28 = vpop.f32.mrf.mxu1 }
 0x31f   : > { %5459 = vst [vmem:[%s6954_s20 + $0x9c0] sm:$0xff] %v2052_v4  ;;  %5461 = vst [vmem:[%s6954_s20 + $0x9d0] sm:$0xff] %v2417_v28  ;;  %5573 = vmatmul.mubr.msk.f32.gmra.mxu0 %vm237_vm0, %v2775_v11  ;;  %5623 = vmatmul.mubr.msk.f32.gmra.mxu1 %vm237_vm0, %v2775_v11  ;;  %v2788_v28 = vld [vmem:[#allocation5 + $0x138] sm:$0xff] }
 0x320   : > { %v2054_v29 = vpop.f32.mrf.mxu0  ;;  %v2419_v24 = vpop.f32.mrf.mxu1  ;;  %3175 = vmatprep.mubr.f32.mxu0 %v6388_v0  ;;  %3540 = vmatprep.mubr.f32.mxu1 %v6388_v0 }
 0x321   : > { %5460 = vst [vmem:[%s6954_s20 + $0x9c8] sm:$0xff] %v2054_v29  ;;  %5462 = vst.msk [vmem:[%s6954_s20 + $0x9d8] sm:$0xff] %vm237_vm0, %v2419_v24 }
 0x322   : > { %v2058_v32 = vpop.f32.mrf.mxu0  ;;  %v2423_v33 = vpop.f32.mrf.mxu1 }
 0x323   : > { %5463 = vst [vmem:[%s6954_s20 + $0x9e0] sm:$0xff] %v2058_v32  ;;  %5465 = vst [vmem:[%s6954_s20 + $0x9f0] sm:$0xff] %v2423_v33  ;;  %5574 = vmatmul.mubr.msk.f32.gmra.mxu0 %vm237_vm0, %v2776_v26  ;;  %5624 = vmatmul.mubr.msk.f32.gmra.mxu1 %vm237_vm0, %v2776_v26  ;;  %v2789_v33 = vld [vmem:[#allocation5 + $0x140] sm:$0xff] }
 0x324   : > { %v2060_v37 = vpop.f32.mrf.mxu0  ;;  %v2425_v12 = vpop.f32.mrf.mxu1  ;;  %3181 = vmatprep.mubr.f32.mxu0 %v6388_v0  ;;  %3546 = vmatprep.mubr.f32.mxu1 %v6388_v0 }
 0x325   : > { %5464 = vst [vmem:[%s6954_s20 + $0x9e8] sm:$0xff] %v2060_v37  ;;  %5466 = vst.msk [vmem:[%s6954_s20 + $0x9f8] sm:$0xff] %vm237_vm0, %v2425_v12 }
 0x326   : > { %v2064_v5 = vpop.f32.mrf.mxu0  ;;  %v2429_v13 = vpop.f32.mrf.mxu1 }
 0x327   : > { %5467 = vst [vmem:[%s6954_s20 + $0xa00] sm:$0xff] %v2064_v5  ;;  %5469 = vst [vmem:[%s6954_s20 + $0xa10] sm:$0xff] %v2429_v13  ;;  %5575 = vmatmul.mubr.msk.f32.gmra.mxu0 %vm237_vm0, %v2777_v55  ;;  %5625 = vmatmul.mubr.msk.f32.gmra.mxu1 %vm237_vm0, %v2777_v55  ;;  %v2790_v13 = vld [vmem:[#allocation5 + $0x148] sm:$0xff] }
 0x328   : > { %v2066_v14 = vpop.f32.mrf.mxu0  ;;  %v2431_v38 = vpop.f32.mrf.mxu1  ;;  %3187 = vmatprep.mubr.f32.mxu0 %v6388_v0  ;;  %3552 = vmatprep.mubr.f32.mxu1 %v6388_v0 }
 0x329   : > { %5468 = vst [vmem:[%s6954_s20 + $0xa08] sm:$0xff] %v2066_v14  ;;  %5470 = vst.msk [vmem:[%s6954_s20 + $0xa18] sm:$0xff] %vm237_vm0, %v2431_v38 }
 0x32a   : > { %v2070_v56 = vpop.f32.mrf.mxu0  ;;  %v2435_v15 = vpop.f32.mrf.mxu1 }
 0x32b   : > { %5471 = vst [vmem:[%s6954_s20 + $0xa20] sm:$0xff] %v2070_v56  ;;  %5473 = vst [vmem:[%s6954_s20 + $0xa30] sm:$0xff] %v2435_v15  ;;  %5576 = vmatmul.mubr.msk.f32.gmra.mxu0 %vm237_vm0, %v2778_v6  ;;  %5626 = vmatmul.mubr.msk.f32.gmra.mxu1 %vm237_vm0, %v2778_v6  ;;  %v2791_v15 = vld [vmem:[#allocation5 + $0x150] sm:$0xff] }
 0x32c   : > { %v2072_v16 = vpop.f32.mrf.mxu0  ;;  %v2437_v7 = vpop.f32.mrf.mxu1  ;;  %3193 = vmatprep.mubr.f32.mxu0 %v6388_v0  ;;  %3558 = vmatprep.mubr.f32.mxu1 %v6388_v0 }
 0x32d   : > { %5472 = vst [vmem:[%s6954_s20 + $0xa28] sm:$0xff] %v2072_v16  ;;  %5474 = vst.msk [vmem:[%s6954_s20 + $0xa38] sm:$0xff] %vm237_vm0, %v2437_v7 }
 0x32e   : > { %v2076_v57 = vpop.f32.mrf.mxu0  ;;  %v2441_v39 = vpop.f32.mrf.mxu1 }
 0x32f   : > { %5475 = vst [vmem:[%s6954_s20 + $0xa40] sm:$0xff] %v2076_v57  ;;  %5477 = vst [vmem:[%s6954_s20 + $0xa50] sm:$0xff] %v2441_v39  ;;  %5577 = vmatmul.mubr.msk.f32.gmra.mxu0 %vm237_vm0, %v2779_v17  ;;  %5627 = vmatmul.mubr.msk.f32.gmra.mxu1 %vm237_vm0, %v2779_v17  ;;  %v2792_v39 = vld [vmem:[#allocation5 + $0x158] sm:$0xff] }
 0x330   : > { %v2078_v8 = vpop.f32.mrf.mxu0  ;;  %v2443_v18 = vpop.f32.mrf.mxu1  ;;  %3199 = vmatprep.mubr.f32.mxu0 %v6388_v0  ;;  %3564 = vmatprep.mubr.f32.mxu1 %v6388_v0 }
 0x331   : > { %5476 = vst [vmem:[%s6954_s20 + $0xa48] sm:$0xff] %v2078_v8  ;;  %5478 = vst.msk [vmem:[%s6954_s20 + $0xa58] sm:$0xff] %vm237_vm0, %v2443_v18 }
 0x332   : > { %v2082_v58 = vpop.f32.mrf.mxu0  ;;  %v2447_v9 = vpop.f32.mrf.mxu1 }
 0x333   : > { %5479 = vst [vmem:[%s6954_s20 + $0xa60] sm:$0xff] %v2082_v58  ;;  %5481 = vst [vmem:[%s6954_s20 + $0xa70] sm:$0xff] %v2447_v9  ;;  %5578 = vmatmul.mubr.msk.f32.gmra.mxu0 %vm237_vm0, %v2780_v19  ;;  %5628 = vmatmul.mubr.msk.f32.gmra.mxu1 %vm237_vm0, %v2780_v19  ;;  %v2793_v9 = vld [vmem:[#allocation5 + $0x160] sm:$0xff] }
 0x334   : > { %v2084_v20 = vpop.f32.mrf.mxu0  ;;  %v2449_v40 = vpop.f32.mrf.mxu1  ;;  %3205 = vmatprep.mubr.f32.mxu0 %v6388_v0  ;;  %3570 = vmatprep.mubr.f32.mxu1 %v6388_v0 }
 0x335   : > { %5480 = vst [vmem:[%s6954_s20 + $0xa68] sm:$0xff] %v2084_v20  ;;  %5482 = vst.msk [vmem:[%s6954_s20 + $0xa78] sm:$0xff] %vm237_vm0, %v2449_v40 }
 0x336   : > { %v2088_v59 = vpop.f32.mrf.mxu0  ;;  %v2453_v10 = vpop.f32.mrf.mxu1 }
 0x337   : > { %5483 = vst [vmem:[%s6954_s20 + $0xa80] sm:$0xff] %v2088_v59  ;;  %5485 = vst [vmem:[%s6954_s20 + $0xa90] sm:$0xff] %v2453_v10  ;;  %5579 = vmatmul.mubr.msk.f32.gmra.mxu0 %vm237_vm0, %v2781_v21  ;;  %5629 = vmatmul.mubr.msk.f32.gmra.mxu1 %vm237_vm0, %v2781_v21  ;;  %v2794_v10 = vld [vmem:[#allocation5 + $0x168] sm:$0xff] }
 0x338   : > { %v2090_v22 = vpop.f32.mrf.mxu0  ;;  %v2455_v23 = vpop.f32.mrf.mxu1  ;;  %3211 = vmatprep.mubr.f32.mxu0 %v6388_v0  ;;  %3576 = vmatprep.mubr.f32.mxu1 %v6388_v0 }
 0x339   : > { %5484 = vst [vmem:[%s6954_s20 + $0xa88] sm:$0xff] %v2090_v22  ;;  %5486 = vst.msk [vmem:[%s6954_s20 + $0xa98] sm:$0xff] %vm237_vm0, %v2455_v23 }
 0x33a   : > { %v2094_v60 = vpop.f32.mrf.mxu0  ;;  %v2459_v25 = vpop.f32.mrf.mxu1 }
 0x33b   : > { %5487 = vst [vmem:[%s6954_s20 + $0xaa0] sm:$0xff] %v2094_v60  ;;  %5489 = vst [vmem:[%s6954_s20 + $0xab0] sm:$0xff] %v2459_v25  ;;  %5580 = vmatmul.mubr.msk.f32.gmra.mxu0 %vm237_vm0, %v2782_v41  ;;  %5630 = vmatmul.mubr.msk.f32.gmra.mxu1 %vm237_vm0, %v2782_v41  ;;  %v2795_v25 = vld [vmem:[#allocation5 + $0x170] sm:$0xff] }
 0x33c   : > { %v2096_v51 = vpop.f32.mrf.mxu0  ;;  %v2461_v48 = vpop.f32.mrf.mxu1  ;;  %3217 = vmatprep.mubr.f32.mxu0 %v6388_v0  ;;  %3582 = vmatprep.mubr.f32.mxu1 %v6388_v0 }
 0x33d   : > { %5488 = vst [vmem:[%s6954_s20 + $0xaa8] sm:$0xff] %v2096_v51  ;;  %5490 = vst.msk [vmem:[%s6954_s20 + $0xab8] sm:$0xff] %vm237_vm0, %v2461_v48 }
 0x33e   : > { %v2100_v42 = vpop.f32.mrf.mxu0  ;;  %v2465_v49 = vpop.f32.mrf.mxu1 }
 0x33f   : > { %5491 = vst [vmem:[%s6954_s20 + $0xac0] sm:$0xff] %v2100_v42  ;;  %5493 = vst [vmem:[%s6954_s20 + $0xad0] sm:$0xff] %v2465_v49  ;;  %5581 = vmatmul.mubr.msk.f32.gmra.mxu0 %vm237_vm0, %v2783_v61  ;;  %5631 = vmatmul.mubr.msk.f32.gmra.mxu1 %vm237_vm0, %v2783_v61  ;;  %v2796_v49 = vld [vmem:[#allocation5 + $0x178] sm:$0xff] }
 0x340   : > { %v2102_v30 = vpop.f32.mrf.mxu0  ;;  %v2467_v62 = vpop.f32.mrf.mxu1  ;;  %3223 = vmatprep.mubr.f32.mxu0 %v6388_v0  ;;  %3588 = vmatprep.mubr.f32.mxu1 %v6388_v0 }
 0x341   : > { %5492 = vst [vmem:[%s6954_s20 + $0xac8] sm:$0xff] %v2102_v30  ;;  %5494 = vst.msk [vmem:[%s6954_s20 + $0xad8] sm:$0xff] %vm237_vm0, %v2467_v62 }
 0x342   : > { %v2106_v43 = vpop.f32.mrf.mxu0  ;;  %v2471_v47 = vpop.f32.mrf.mxu1 }
 0x343   : > { %5495 = vst [vmem:[%s6954_s20 + $0xae0] sm:$0xff] %v2106_v43  ;;  %5497 = vst [vmem:[%s6954_s20 + $0xaf0] sm:$0xff] %v2471_v47  ;;  %5582 = vmatmul.mubr.msk.f32.gmra.mxu0 %vm237_vm0, %v2784_v46  ;;  %5632 = vmatmul.mubr.msk.f32.gmra.mxu1 %vm237_vm0, %v2784_v46  ;;  %v2797_v47 = vld [vmem:[#allocation5 + $0x180] sm:$0xff] }
 0x344   : > { %v2108_v63 = vpop.f32.mrf.mxu0  ;;  %v2473_v52 = vpop.f32.mrf.mxu1  ;;  %3229 = vmatprep.mubr.f32.mxu0 %v6388_v0  ;;  %3594 = vmatprep.mubr.f32.mxu1 %v6388_v0 }
 0x345   : > { %5496 = vst [vmem:[%s6954_s20 + $0xae8] sm:$0xff] %v2108_v63  ;;  %5498 = vst.msk [vmem:[%s6954_s20 + $0xaf8] sm:$0xff] %vm237_vm0, %v2473_v52 }
 0x346   : > { %v2112_v44 = vpop.f32.mrf.mxu0  ;;  %v2477_v1 = vpop.f32.mrf.mxu1 }
 0x347   : > { %5499 = vst [vmem:[%s6954_s20 + $0xb00] sm:$0xff] %v2112_v44  ;;  %5501 = vst [vmem:[%s6954_s20 + $0xb10] sm:$0xff] %v2477_v1  ;;  %5583 = vmatmul.mubr.msk.f32.gmra.mxu0 %vm237_vm0, %v2785_v35  ;;  %5633 = vmatmul.mubr.msk.f32.gmra.mxu1 %vm237_vm0, %v2785_v35  ;;  %v2798_v1 = vld [vmem:[#allocation5 + $0x188] sm:$0xff] }
 0x348   : > { %v2114_v27 = vpop.f32.mrf.mxu0  ;;  %v2479_v31 = vpop.f32.mrf.mxu1  ;;  %3235 = vmatprep.mubr.f32.mxu0 %v6388_v0  ;;  %3600 = vmatprep.mubr.f32.mxu1 %v6388_v0 }
 0x349   : > { %5500 = vst [vmem:[%s6954_s20 + $0xb08] sm:$0xff] %v2114_v27  ;;  %5502 = vst.msk [vmem:[%s6954_s20 + $0xb18] sm:$0xff] %vm237_vm0, %v2479_v31 }
 0x34a   : > { %v2118_v2 = vpop.f32.mrf.mxu0  ;;  %v2483_v45 = vpop.f32.mrf.mxu1 }
 0x34b   : > { %5503 = vst [vmem:[%s6954_s20 + $0xb20] sm:$0xff] %v2118_v2  ;;  %5505 = vst [vmem:[%s6954_s20 + $0xb30] sm:$0xff] %v2483_v45  ;;  %5584 = vmatmul.mubr.msk.f32.gmra.mxu0 %vm237_vm0, %v2786_v34  ;;  %5634 = vmatmul.mubr.msk.f32.gmra.mxu1 %vm237_vm0, %v2786_v34  ;;  %v3880_v34 = vld [vmem:[#allocation5] sm:$0xff] }
 0x34c   : > { %v2120_v36 = vpop.f32.mrf.mxu0  ;;  %v2485_v53 = vpop.f32.mrf.mxu1  ;;  %3241 = vmatprep.mubr.f32.mxu0 %v6388_v0  ;;  %3606 = vmatprep.mubr.f32.mxu1 %v6388_v0 }
 0x34d   : > { %5504 = vst [vmem:[%s6954_s20 + $0xb28] sm:$0xff] %v2120_v36  ;;  %5506 = vst.msk [vmem:[%s6954_s20 + $0xb38] sm:$0xff] %vm237_vm0, %v2485_v53 }
 0x34e   : > { %v2124_v54 = vpop.f32.mrf.mxu0  ;;  %v2489_v50 = vpop.f32.mrf.mxu1 }
 0x34f   : > { %5507 = vst [vmem:[%s6954_s20 + $0xb40] sm:$0xff] %v2124_v54  ;;  %5509 = vst [vmem:[%s6954_s20 + $0xb50] sm:$0xff] %v2489_v50  ;;  %5585 = vmatmul.mubr.msk.f32.gmra.mxu0 %vm237_vm0, %v2787_v3  ;;  %5635 = vmatmul.mubr.msk.f32.gmra.mxu1 %vm237_vm0, %v2787_v3  ;;  %v3881_v3 = vld [vmem:[#allocation5 + $0x8] sm:$0xff] }
 0x350   : > { %v2126_v11 = vpop.f32.mrf.mxu0  ;;  %v2491_v4 = vpop.f32.mrf.mxu1  ;;  %3247 = vmatprep.mubr.f32.mxu0 %v6388_v0  ;;  %3612 = vmatprep.mubr.f32.mxu1 %v6388_v0 }
 0x351   : > { %5508 = vst [vmem:[%s6954_s20 + $0xb48] sm:$0xff] %v2126_v11  ;;  %5510 = vst.msk [vmem:[%s6954_s20 + $0xb58] sm:$0xff] %vm237_vm0, %v2491_v4 }
 0x352   : > { %v2130_v29 = vpop.f32.mrf.mxu0  ;;  %v2495_v24 = vpop.f32.mrf.mxu1 }
 0x353   : > { %5511 = vst [vmem:[%s6954_s20 + $0xb60] sm:$0xff] %v2130_v29  ;;  %5513 = vst [vmem:[%s6954_s20 + $0xb70] sm:$0xff] %v2495_v24  ;;  %5586 = vmatmul.mubr.msk.f32.gmra.mxu0 %vm237_vm0, %v2788_v28  ;;  %5636 = vmatmul.mubr.msk.f32.gmra.mxu1 %vm237_vm0, %v2788_v28  ;;  %v3882_v28 = vld [vmem:[#allocation5 + $0x10] sm:$0xff] }
 0x354   : > { %v2132_v26 = vpop.f32.mrf.mxu0  ;;  %v2497_v32 = vpop.f32.mrf.mxu1  ;;  %3253 = vmatprep.mubr.f32.mxu0 %v6388_v0  ;;  %3618 = vmatprep.mubr.f32.mxu1 %v6388_v0 }
 0x355   : > { %5512 = vst [vmem:[%s6954_s20 + $0xb68] sm:$0xff] %v2132_v26  ;;  %5514 = vst.msk [vmem:[%s6954_s20 + $0xb78] sm:$0xff] %vm237_vm0, %v2497_v32 }
 0x356   : > { %v2136_v37 = vpop.f32.mrf.mxu0  ;;  %v2501_v12 = vpop.f32.mrf.mxu1 }
 0x357   : > { %5515 = vst [vmem:[%s6954_s20 + $0xb80] sm:$0xff] %v2136_v37  ;;  %5517 = vst [vmem:[%s6954_s20 + $0xb90] sm:$0xff] %v2501_v12  ;;  %5587 = vmatmul.mubr.msk.f32.gmra.mxu0 %vm237_vm0, %v2789_v33  ;;  %5637 = vmatmul.mubr.msk.f32.gmra.mxu1 %vm237_vm0, %v2789_v33  ;;  %v3883_v33 = vld [vmem:[#allocation5 + $0x18] sm:$0xff] }
 0x358   : > { %v2138_v55 = vpop.f32.mrf.mxu0  ;;  %v2503_v5 = vpop.f32.mrf.mxu1  ;;  %3259 = vmatprep.mubr.f32.mxu0 %v6388_v0  ;;  %3624 = vmatprep.mubr.f32.mxu1 %v6388_v0 }
 0x359   : > { %5516 = vst [vmem:[%s6954_s20 + $0xb88] sm:$0xff] %v2138_v55  ;;  %5518 = vst.msk [vmem:[%s6954_s20 + $0xb98] sm:$0xff] %vm237_vm0, %v2503_v5 }
 0x35a   : > { %v2142_v14 = vpop.f32.mrf.mxu0  ;;  %v2507_v38 = vpop.f32.mrf.mxu1 }
 0x35b   : > { %5519 = vst [vmem:[%s6954_s20 + $0xba0] sm:$0xff] %v2142_v14  ;;  %5521 = vst [vmem:[%s6954_s20 + $0xbb0] sm:$0xff] %v2507_v38  ;;  %5588 = vmatmul.mubr.msk.f32.gmra.mxu0 %vm237_vm0, %v2790_v13  ;;  %5638 = vmatmul.mubr.msk.f32.gmra.mxu1 %vm237_vm0, %v2790_v13  ;;  %v3884_v13 = vld [vmem:[#allocation5 + $0x20] sm:$0xff] }
 0x35c   : > { %v2144_v6 = vpop.f32.mrf.mxu0  ;;  %v2509_v56 = vpop.f32.mrf.mxu1  ;;  %3265 = vmatprep.mubr.f32.mxu0 %v6388_v0  ;;  %3630 = vmatprep.mubr.f32.mxu1 %v6388_v0 }
 0x35d   : > { %5520 = vst [vmem:[%s6954_s20 + $0xba8] sm:$0xff] %v2144_v6  ;;  %5522 = vst.msk [vmem:[%s6954_s20 + $0xbb8] sm:$0xff] %vm237_vm0, %v2509_v56 }
 0x35e   : > { %v2148_v16 = vpop.f32.mrf.mxu0  ;;  %v2513_v7 = vpop.f32.mrf.mxu1 }
 0x35f   : > { %5523 = vst [vmem:[%s6954_s20 + $0xbc0] sm:$0xff] %v2148_v16  ;;  %5525 = vst [vmem:[%s6954_s20 + $0xbd0] sm:$0xff] %v2513_v7  ;;  %5589 = vmatmul.mubr.msk.f32.gmra.mxu0 %vm237_vm0, %v2791_v15  ;;  %5639 = vmatmul.mubr.msk.f32.gmra.mxu1 %vm237_vm0, %v2791_v15  ;;  %v3885_v15 = vld [vmem:[#allocation5 + $0x28] sm:$0xff] }
 0x360   : > { %v2150_v17 = vpop.f32.mrf.mxu0  ;;  %v2515_v57 = vpop.f32.mrf.mxu1  ;;  %3271 = vmatprep.mubr.f32.mxu0 %v6388_v0  ;;  %3636 = vmatprep.mubr.f32.mxu1 %v6388_v0 }
 0x361   : > { %5524 = vst [vmem:[%s6954_s20 + $0xbc8] sm:$0xff] %v2150_v17  ;;  %5526 = vst.msk [vmem:[%s6954_s20 + $0xbd8] sm:$0xff] %vm237_vm0, %v2515_v57 }
 0x362   : > { %v2154_v8 = vpop.f32.mrf.mxu0  ;;  %v2519_v18 = vpop.f32.mrf.mxu1 }
 0x363   : > { %5527 = vst [vmem:[%s6954_s20 + $0xbe0] sm:$0xff] %v2154_v8  ;;  %5529 = vst [vmem:[%s6954_s20 + $0xbf0] sm:$0xff] %v2519_v18  ;;  %5590 = vmatmul.mubr.msk.f32.gmra.mxu0 %vm237_vm0, %v2792_v39  ;;  %5640 = vmatmul.mubr.msk.f32.gmra.mxu1 %vm237_vm0, %v2792_v39  ;;  %v3886_v39 = vld [vmem:[#allocation5 + $0x30] sm:$0xff] }
 0x364   : > { %v2156_v19 = vpop.f32.mrf.mxu0  ;;  %v2521_v58 = vpop.f32.mrf.mxu1  ;;  %3277 = vmatprep.mubr.f32.mxu0 %v6388_v0  ;;  %3642 = vmatprep.mubr.f32.mxu1 %v6388_v0 }
 0x365   : > { %5528 = vst [vmem:[%s6954_s20 + $0xbe8] sm:$0xff] %v2156_v19  ;;  %5530 = vst.msk [vmem:[%s6954_s20 + $0xbf8] sm:$0xff] %vm237_vm0, %v2521_v58 }
 0x366   : > { %v2160_v20 = vpop.f32.mrf.mxu0  ;;  %v2525_v40 = vpop.f32.mrf.mxu1 }
 0x367   : > { %5531 = vst [vmem:[%s6954_s20 + $0xc00] sm:$0xff] %v2160_v20  ;;  %5533 = vst [vmem:[%s6954_s20 + $0xc10] sm:$0xff] %v2525_v40  ;;  %5591 = vmatmul.mubr.msk.f32.gmra.mxu0 %vm237_vm0, %v2793_v9  ;;  %5641 = vmatmul.mubr.msk.f32.gmra.mxu1 %vm237_vm0, %v2793_v9  ;;  %v3887_v9 = vld [vmem:[#allocation5 + $0x38] sm:$0xff] }
 0x368   : > { %v2162_v21 = vpop.f32.mrf.mxu0  ;;  %v2527_v59 = vpop.f32.mrf.mxu1  ;;  %3283 = vmatprep.mubr.f32.mxu0 %v6388_v0  ;;  %3648 = vmatprep.mubr.f32.mxu1 %v6388_v0 }
 0x369   : > { %5532 = vst [vmem:[%s6954_s20 + $0xc08] sm:$0xff] %v2162_v21  ;;  %5534 = vst.msk [vmem:[%s6954_s20 + $0xc18] sm:$0xff] %vm237_vm0, %v2527_v59 }
 0x36a   : > { %v2166_v22 = vpop.f32.mrf.mxu0  ;;  %v2531_v23 = vpop.f32.mrf.mxu1 }
 0x36b   : > { %5535 = vst [vmem:[%s6954_s20 + $0xc20] sm:$0xff] %v2166_v22  ;;  %5537 = vst [vmem:[%s6954_s20 + $0xc30] sm:$0xff] %v2531_v23  ;;  %5592 = vmatmul.mubr.msk.f32.gmra.mxu0 %vm237_vm0, %v2794_v10  ;;  %5642 = vmatmul.mubr.msk.f32.gmra.mxu1 %vm237_vm0, %v2794_v10  ;;  %v3888_v10 = vld [vmem:[#allocation5 + $0x40] sm:$0xff] }
 0x36c   : > { %v2168_v41 = vpop.f32.mrf.mxu0  ;;  %v2533_v60 = vpop.f32.mrf.mxu1  ;;  %3289 = vmatprep.mubr.f32.mxu0 %v6388_v0  ;;  %3654 = vmatprep.mubr.f32.mxu1 %v6388_v0 }
 0x36d   : > { %5536 = vst [vmem:[%s6954_s20 + $0xc28] sm:$0xff] %v2168_v41  ;;  %5538 = vst.msk [vmem:[%s6954_s20 + $0xc38] sm:$0xff] %vm237_vm0, %v2533_v60 }
 0x36e   : > { %v2172_v51 = vpop.f32.mrf.mxu0  ;;  %v2537_v48 = vpop.f32.mrf.mxu1 }
 0x36f   : > { %5539 = vst [vmem:[%s6954_s20 + $0xc40] sm:$0xff] %v2172_v51  ;;  %5541 = vst [vmem:[%s6954_s20 + $0xc50] sm:$0xff] %v2537_v48  ;;  %5593 = vmatmul.mubr.msk.f32.gmra.mxu0 %vm237_vm0, %v2795_v25  ;;  %5643 = vmatmul.mubr.msk.f32.gmra.mxu1 %vm237_vm0, %v2795_v25  ;;  %v3889_v25 = vld [vmem:[#allocation5 + $0x48] sm:$0xff] }
 0x370   : > { %v2174_v61 = vpop.f32.mrf.mxu0  ;;  %v2539_v42 = vpop.f32.mrf.mxu1  ;;  %3295 = vmatprep.mubr.f32.mxu0 %v6388_v0  ;;  %3660 = vmatprep.mubr.f32.mxu1 %v6388_v0 }
 0x371   : > { %5540 = vst [vmem:[%s6954_s20 + $0xc48] sm:$0xff] %v2174_v61  ;;  %5542 = vst.msk [vmem:[%s6954_s20 + $0xc58] sm:$0xff] %vm237_vm0, %v2539_v42 }
 0x372   : > { %v2178_v30 = vpop.f32.mrf.mxu0  ;;  %v2543_v62 = vpop.f32.mrf.mxu1 }
 0x373   : > { %5543 = vst [vmem:[%s6954_s20 + $0xc60] sm:$0xff] %v2178_v30  ;;  %5545 = vst [vmem:[%s6954_s20 + $0xc70] sm:$0xff] %v2543_v62  ;;  %5594 = vmatmul.mubr.msk.f32.gmra.mxu0 %vm237_vm0, %v2796_v49  ;;  %5644 = vmatmul.mubr.msk.f32.gmra.mxu1 %vm237_vm0, %v2796_v49  ;;  %v3890_v49 = vld [vmem:[#allocation5 + $0x50] sm:$0xff] }
 0x374   : > { %v2180_v46 = vpop.f32.mrf.mxu0  ;;  %v2545_v43 = vpop.f32.mrf.mxu1  ;;  %3301 = vmatprep.mubr.f32.mxu0 %v6388_v0  ;;  %3666 = vmatprep.mubr.f32.mxu1 %v6388_v0 }
 0x375   : > { %5544 = vst [vmem:[%s6954_s20 + $0xc68] sm:$0xff] %v2180_v46  ;;  %5546 = vst.msk [vmem:[%s6954_s20 + $0xc78] sm:$0xff] %vm237_vm0, %v2545_v43 }
 0x376   : > { %v3015_v63 = vpop.f32.mrf.mxu0  ;;  %v3380_v52 = vpop.f32.mrf.mxu1 }
 0x377   : > { %5647 = vst [vmem:[%s6954_s20 + $0xc80] sm:$0xff] %v3015_v63  ;;  %5595 = vmatmul.mubr.msk.f32.gmra.mxu0 %vm237_vm0, %v2797_v47  ;;  %5649 = vst [vmem:[%s6954_s20 + $0xc90] sm:$0xff] %v3380_v52  ;;  %5645 = vmatmul.mubr.msk.f32.gmra.mxu1 %vm237_vm0, %v2797_v47  ;;  %v3891_v47 = vld [vmem:[#allocation5 + $0x58] sm:$0xff] }
 0x378   : > { %v3017_v35 = vpop.f32.mrf.mxu0  ;;  %v3382_v44 = vpop.f32.mrf.mxu1  ;;  %3307 = vmatprep.mubr.f32.mxu0 %v6388_v0  ;;  %3672 = vmatprep.mubr.f32.mxu1 %v6388_v0 }
 0x379   : > { %5648 = vst [vmem:[%s6954_s20 + $0xc88] sm:$0xff] %v3017_v35  ;;  %5650 = vst.msk [vmem:[%s6954_s20 + $0xc98] sm:$0xff] %vm237_vm0, %v3382_v44 }
 0x37b   : > { %v3021_v27 = vpop.f32.mrf.mxu0  ;;  %5596 = vmatmul.mubr.msk.f32.gmra.mxu0 %vm237_vm0, %v2798_v1  ;;  %v3386_v31 = vpop.f32.mrf.mxu1  ;;  %5646 = vmatmul.mubr.msk.f32.gmra.mxu1 %vm237_vm0, %v2798_v1  ;;  %v3892_v1 = vld [vmem:[#allocation5 + $0x60] sm:$0xff] }
 0x37c   : > { %5651 = vst [vmem:[%s6954_s20 + $0xca0] sm:$0xff] %v3021_v27  ;;  %5653 = vst [vmem:[%s6954_s20 + $0xcb0] sm:$0xff] %v3386_v31  ;;  %4144 = vmatprep.mubr.f32.mxu0 %v6388_v0  ;;  %4509 = vmatprep.mubr.f32.mxu1 %v6388_v0 }
 0x37d   : > { %v3023_v2 = vpop.f32.mrf.mxu0  ;;  %v3388_v45 = vpop.f32.mrf.mxu1 }
 0x37e   : > { %5652 = vst [vmem:[%s6954_s20 + $0xca8] sm:$0xff] %v3023_v2  ;;  %5654 = vst.msk [vmem:[%s6954_s20 + $0xcb8] sm:$0xff] %vm237_vm0, %v3388_v45  ;;  %v3893_v45 = vld [vmem:[#allocation5 + $0x68] sm:$0xff] }
 0x37f   : > { %v3027_v36 = vpop.f32.mrf.mxu0  ;;  %v3392_v53 = vpop.f32.mrf.mxu1  ;;  %5847 = vmatmul.mubr.msk.f32.vlgmr.msra.gmra.mxu0 %vm237_vm0, %v3880_v34  ;;  %5897 = vmatmul.mubr.msk.f32.vlgmr.msra.gmra.mxu1 %vm237_vm0, %v3880_v34 }
 0x380   : > { %5655 = vst [vmem:[%s6954_s20 + $0xcc0] sm:$0xff] %v3027_v36  ;;  %5657 = vst [vmem:[%s6954_s20 + $0xcd0] sm:$0xff] %v3392_v53  ;;  %4150 = vmatprep.mubr.f32.mxu0 %v6388_v0  ;;  %4515 = vmatprep.mubr.f32.mxu1 %v6388_v0 }
 0x381   : > { %v3029_v54 = vpop.f32.mrf.mxu0  ;;  %v3394_v50 = vpop.f32.mrf.mxu1 }
 0x382   : > { %5656 = vst [vmem:[%s6954_s20 + $0xcc8] sm:$0xff] %v3029_v54  ;;  %5658 = vst.msk [vmem:[%s6954_s20 + $0xcd8] sm:$0xff] %vm237_vm0, %v3394_v50  ;;  %v3894_v50 = vld [vmem:[#allocation5 + $0x70] sm:$0xff] }
 0x383   : > { %v3033_v11 = vpop.f32.mrf.mxu0  ;;  %v3398_v4 = vpop.f32.mrf.mxu1  ;;  %5848 = vmatmul.mubr.msk.f32.gmra.mxu0 %vm237_vm0, %v3881_v3  ;;  %5898 = vmatmul.mubr.msk.f32.gmra.mxu1 %vm237_vm0, %v3881_v3 }
 0x384   : > { %5659 = vst [vmem:[%s6954_s20 + $0xce0] sm:$0xff] %v3033_v11  ;;  %5661 = vst [vmem:[%s6954_s20 + $0xcf0] sm:$0xff] %v3398_v4  ;;  %4156 = vmatprep.mubr.f32.mxu0 %v6388_v0  ;;  %4521 = vmatprep.mubr.f32.mxu1 %v6388_v0 }
 0x385   : > { %v3035_v29 = vpop.f32.mrf.mxu0  ;;  %v3400_v24 = vpop.f32.mrf.mxu1 }
 0x386   : > { %5660 = vst [vmem:[%s6954_s20 + $0xce8] sm:$0xff] %v3035_v29  ;;  %5662 = vst.msk [vmem:[%s6954_s20 + $0xcf8] sm:$0xff] %vm237_vm0, %v3400_v24  ;;  %v3895_v24 = vld [vmem:[#allocation5 + $0x78] sm:$0xff] }
 0x387   : > { %v3039_v26 = vpop.f32.mrf.mxu0  ;;  %v3404_v32 = vpop.f32.mrf.mxu1  ;;  %5849 = vmatmul.mubr.msk.f32.gmra.mxu0 %vm237_vm0, %v3882_v28  ;;  %5899 = vmatmul.mubr.msk.f32.gmra.mxu1 %vm237_vm0, %v3882_v28 }
 0x388   : > { %5663 = vst [vmem:[%s6954_s20 + $0xd00] sm:$0xff] %v3039_v26  ;;  %5665 = vst [vmem:[%s6954_s20 + $0xd10] sm:$0xff] %v3404_v32  ;;  %4162 = vmatprep.mubr.f32.mxu0 %v6388_v0  ;;  %4527 = vmatprep.mubr.f32.mxu1 %v6388_v0 }
 0x389   : > { %v3041_v37 = vpop.f32.mrf.mxu0  ;;  %v3406_v12 = vpop.f32.mrf.mxu1 }
 0x38a   : > { %5664 = vst [vmem:[%s6954_s20 + $0xd08] sm:$0xff] %v3041_v37  ;;  %5666 = vst.msk [vmem:[%s6954_s20 + $0xd18] sm:$0xff] %vm237_vm0, %v3406_v12  ;;  %v3896_v12 = vld [vmem:[#allocation5 + $0x80] sm:$0xff] }
 0x38b   : > { %v3045_v55 = vpop.f32.mrf.mxu0  ;;  %v3410_v5 = vpop.f32.mrf.mxu1  ;;  %5850 = vmatmul.mubr.msk.f32.gmra.mxu0 %vm237_vm0, %v3883_v33  ;;  %5900 = vmatmul.mubr.msk.f32.gmra.mxu1 %vm237_vm0, %v3883_v33 }
 0x38c   : > { %5667 = vst [vmem:[%s6954_s20 + $0xd20] sm:$0xff] %v3045_v55  ;;  %5669 = vst [vmem:[%s6954_s20 + $0xd30] sm:$0xff] %v3410_v5  ;;  %4168 = vmatprep.mubr.f32.mxu0 %v6388_v0  ;;  %4533 = vmatprep.mubr.f32.mxu1 %v6388_v0 }
 0x38d   : > { %v3047_v14 = vpop.f32.mrf.mxu0  ;;  %v3412_v38 = vpop.f32.mrf.mxu1 }
 0x38e   : > { %5668 = vst [vmem:[%s6954_s20 + $0xd28] sm:$0xff] %v3047_v14  ;;  %5670 = vst.msk [vmem:[%s6954_s20 + $0xd38] sm:$0xff] %vm237_vm0, %v3412_v38  ;;  %v3897_v38 = vld [vmem:[#allocation5 + $0x88] sm:$0xff] }
 0x38f   : > { %v3051_v6 = vpop.f32.mrf.mxu0  ;;  %v3416_v56 = vpop.f32.mrf.mxu1  ;;  %5851 = vmatmul.mubr.msk.f32.gmra.mxu0 %vm237_vm0, %v3884_v13  ;;  %5901 = vmatmul.mubr.msk.f32.gmra.mxu1 %vm237_vm0, %v3884_v13 }
 0x390   : > { %5671 = vst [vmem:[%s6954_s20 + $0xd40] sm:$0xff] %v3051_v6  ;;  %5673 = vst [vmem:[%s6954_s20 + $0xd50] sm:$0xff] %v3416_v56  ;;  %4174 = vmatprep.mubr.f32.mxu0 %v6388_v0  ;;  %4539 = vmatprep.mubr.f32.mxu1 %v6388_v0 }
 0x391   : > { %v3053_v16 = vpop.f32.mrf.mxu0  ;;  %v3418_v7 = vpop.f32.mrf.mxu1 }
 0x392   : > { %5672 = vst [vmem:[%s6954_s20 + $0xd48] sm:$0xff] %v3053_v16  ;;  %5674 = vst.msk [vmem:[%s6954_s20 + $0xd58] sm:$0xff] %vm237_vm0, %v3418_v7  ;;  %v3898_v7 = vld [vmem:[#allocation5 + $0x90] sm:$0xff] }
 0x393   : > { %v3057_v17 = vpop.f32.mrf.mxu0  ;;  %v3422_v57 = vpop.f32.mrf.mxu1  ;;  %5852 = vmatmul.mubr.msk.f32.gmra.mxu0 %vm237_vm0, %v3885_v15  ;;  %5902 = vmatmul.mubr.msk.f32.gmra.mxu1 %vm237_vm0, %v3885_v15 }
 0x394   : > { %5675 = vst [vmem:[%s6954_s20 + $0xd60] sm:$0xff] %v3057_v17  ;;  %5677 = vst [vmem:[%s6954_s20 + $0xd70] sm:$0xff] %v3422_v57  ;;  %4180 = vmatprep.mubr.f32.mxu0 %v6388_v0  ;;  %4545 = vmatprep.mubr.f32.mxu1 %v6388_v0 }
 0x395   : > { %v3059_v8 = vpop.f32.mrf.mxu0  ;;  %v3424_v18 = vpop.f32.mrf.mxu1 }
 0x396   : > { %5676 = vst [vmem:[%s6954_s20 + $0xd68] sm:$0xff] %v3059_v8  ;;  %5678 = vst.msk [vmem:[%s6954_s20 + $0xd78] sm:$0xff] %vm237_vm0, %v3424_v18  ;;  %v3899_v18 = vld [vmem:[#allocation5 + $0x98] sm:$0xff] }
 0x397   : > { %v3063_v19 = vpop.f32.mrf.mxu0  ;;  %v3428_v58 = vpop.f32.mrf.mxu1  ;;  %5853 = vmatmul.mubr.msk.f32.gmra.mxu0 %vm237_vm0, %v3886_v39  ;;  %5903 = vmatmul.mubr.msk.f32.gmra.mxu1 %vm237_vm0, %v3886_v39 }
 0x398   : > { %5679 = vst [vmem:[%s6954_s20 + $0xd80] sm:$0xff] %v3063_v19  ;;  %5681 = vst [vmem:[%s6954_s20 + $0xd90] sm:$0xff] %v3428_v58  ;;  %4186 = vmatprep.mubr.f32.mxu0 %v6388_v0  ;;  %4551 = vmatprep.mubr.f32.mxu1 %v6388_v0 }
 0x399   : > { %v3065_v20 = vpop.f32.mrf.mxu0  ;;  %v3430_v40 = vpop.f32.mrf.mxu1 }
 0x39a   : > { %5680 = vst [vmem:[%s6954_s20 + $0xd88] sm:$0xff] %v3065_v20  ;;  %5682 = vst.msk [vmem:[%s6954_s20 + $0xd98] sm:$0xff] %vm237_vm0, %v3430_v40  ;;  %v3900_v40 = vld [vmem:[#allocation5 + $0xa0] sm:$0xff] }
 0x39b   : > { %v3069_v21 = vpop.f32.mrf.mxu0  ;;  %v3434_v59 = vpop.f32.mrf.mxu1  ;;  %5854 = vmatmul.mubr.msk.f32.gmra.mxu0 %vm237_vm0, %v3887_v9  ;;  %5904 = vmatmul.mubr.msk.f32.gmra.mxu1 %vm237_vm0, %v3887_v9 }
 0x39c   : > { %5683 = vst [vmem:[%s6954_s20 + $0xda0] sm:$0xff] %v3069_v21  ;;  %5685 = vst [vmem:[%s6954_s20 + $0xdb0] sm:$0xff] %v3434_v59  ;;  %4192 = vmatprep.mubr.f32.mxu0 %v6388_v0  ;;  %4557 = vmatprep.mubr.f32.mxu1 %v6388_v0 }
 0x39d   : > { %v3071_v22 = vpop.f32.mrf.mxu0  ;;  %v3436_v23 = vpop.f32.mrf.mxu1 }
 0x39e   : > { %5684 = vst [vmem:[%s6954_s20 + $0xda8] sm:$0xff] %v3071_v22  ;;  %5686 = vst.msk [vmem:[%s6954_s20 + $0xdb8] sm:$0xff] %vm237_vm0, %v3436_v23  ;;  %v3901_v23 = vld [vmem:[#allocation5 + $0xa8] sm:$0xff] }
 0x39f   : > { %v3075_v41 = vpop.f32.mrf.mxu0  ;;  %v3440_v60 = vpop.f32.mrf.mxu1  ;;  %5855 = vmatmul.mubr.msk.f32.gmra.mxu0 %vm237_vm0, %v3888_v10  ;;  %5905 = vmatmul.mubr.msk.f32.gmra.mxu1 %vm237_vm0, %v3888_v10 }
 0x3a0   : > { %5687 = vst [vmem:[%s6954_s20 + $0xdc0] sm:$0xff] %v3075_v41  ;;  %5689 = vst [vmem:[%s6954_s20 + $0xdd0] sm:$0xff] %v3440_v60  ;;  %4198 = vmatprep.mubr.f32.mxu0 %v6388_v0  ;;  %4563 = vmatprep.mubr.f32.mxu1 %v6388_v0 }
 0x3a1   : > { %v3077_v51 = vpop.f32.mrf.mxu0  ;;  %v3442_v48 = vpop.f32.mrf.mxu1 }
 0x3a2   : > { %5688 = vst [vmem:[%s6954_s20 + $0xdc8] sm:$0xff] %v3077_v51  ;;  %5690 = vst.msk [vmem:[%s6954_s20 + $0xdd8] sm:$0xff] %vm237_vm0, %v3442_v48  ;;  %v3902_v48 = vld [vmem:[#allocation5 + $0xb0] sm:$0xff] }
 0x3a3   : > { %v3081_v61 = vpop.f32.mrf.mxu0  ;;  %v3446_v42 = vpop.f32.mrf.mxu1  ;;  %5856 = vmatmul.mubr.msk.f32.gmra.mxu0 %vm237_vm0, %v3889_v25  ;;  %5906 = vmatmul.mubr.msk.f32.gmra.mxu1 %vm237_vm0, %v3889_v25 }
 0x3a4   : > { %5691 = vst [vmem:[%s6954_s20 + $0xde0] sm:$0xff] %v3081_v61  ;;  %5693 = vst [vmem:[%s6954_s20 + $0xdf0] sm:$0xff] %v3446_v42  ;;  %4204 = vmatprep.mubr.f32.mxu0 %v6388_v0  ;;  %4569 = vmatprep.mubr.f32.mxu1 %v6388_v0 }
 0x3a5   : > { %v3083_v30 = vpop.f32.mrf.mxu0  ;;  %v3448_v62 = vpop.f32.mrf.mxu1 }
 0x3a6   : > { %5692 = vst [vmem:[%s6954_s20 + $0xde8] sm:$0xff] %v3083_v30  ;;  %5694 = vst.msk [vmem:[%s6954_s20 + $0xdf8] sm:$0xff] %vm237_vm0, %v3448_v62  ;;  %v3903_v62 = vld [vmem:[#allocation5 + $0xb8] sm:$0xff] }
 0x3a7   : > { %v3087_v46 = vpop.f32.mrf.mxu0  ;;  %v3452_v43 = vpop.f32.mrf.mxu1  ;;  %5857 = vmatmul.mubr.msk.f32.gmra.mxu0 %vm237_vm0, %v3890_v49  ;;  %5907 = vmatmul.mubr.msk.f32.gmra.mxu1 %vm237_vm0, %v3890_v49 }
 0x3a8   : > { %5695 = vst [vmem:[%s6954_s20 + $0xe00] sm:$0xff] %v3087_v46  ;;  %5697 = vst [vmem:[%s6954_s20 + $0xe10] sm:$0xff] %v3452_v43  ;;  %4210 = vmatprep.mubr.f32.mxu0 %v6388_v0  ;;  %4575 = vmatprep.mubr.f32.mxu1 %v6388_v0 }
 0x3a9   : > { %v3089_v63 = vpop.f32.mrf.mxu0  ;;  %v3454_v52 = vpop.f32.mrf.mxu1 }
 0x3aa   : > { %5696 = vst [vmem:[%s6954_s20 + $0xe08] sm:$0xff] %v3089_v63  ;;  %5698 = vst.msk [vmem:[%s6954_s20 + $0xe18] sm:$0xff] %vm237_vm0, %v3454_v52  ;;  %v3904_v52 = vld [vmem:[#allocation5 + $0xc0] sm:$0xff] }
 0x3ab   : > { %v3093_v35 = vpop.f32.mrf.mxu0  ;;  %v3458_v44 = vpop.f32.mrf.mxu1  ;;  %5858 = vmatmul.mubr.msk.f32.gmra.mxu0 %vm237_vm0, %v3891_v47  ;;  %5908 = vmatmul.mubr.msk.f32.gmra.mxu1 %vm237_vm0, %v3891_v47 }
 0x3ac   : > { %5699 = vst [vmem:[%s6954_s20 + $0xe20] sm:$0xff] %v3093_v35  ;;  %5701 = vst [vmem:[%s6954_s20 + $0xe30] sm:$0xff] %v3458_v44  ;;  %4216 = vmatprep.mubr.f32.mxu0 %v6388_v0  ;;  %4581 = vmatprep.mubr.f32.mxu1 %v6388_v0 }
 0x3ad   : > { %v3095_v27 = vpop.f32.mrf.mxu0  ;;  %v3460_v31 = vpop.f32.mrf.mxu1 }
 0x3ae   : > { %5700 = vst [vmem:[%s6954_s20 + $0xe28] sm:$0xff] %v3095_v27  ;;  %5702 = vst.msk [vmem:[%s6954_s20 + $0xe38] sm:$0xff] %vm237_vm0, %v3460_v31  ;;  %v3905_v31 = vld [vmem:[#allocation5 + $0xc8] sm:$0xff] }
 0x3af   : > { %v3099_v34 = vpop.f32.mrf.mxu0  ;;  %v3464_v2 = vpop.f32.mrf.mxu1  ;;  %5859 = vmatmul.mubr.msk.f32.gmra.mxu0 %vm237_vm0, %v3892_v1  ;;  %5909 = vmatmul.mubr.msk.f32.gmra.mxu1 %vm237_vm0, %v3892_v1 }
 0x3b0   : > { %5703 = vst [vmem:[%s6954_s20 + $0xe40] sm:$0xff] %v3099_v34  ;;  %5705 = vst [vmem:[%s6954_s20 + $0xe50] sm:$0xff] %v3464_v2  ;;  %4222 = vmatprep.mubr.f32.mxu0 %v6388_v0  ;;  %4587 = vmatprep.mubr.f32.mxu1 %v6388_v0 }
 0x3b1   : > { %v3101_v36 = vpop.f32.mrf.mxu0  ;;  %v3466_v53 = vpop.f32.mrf.mxu1 }
 0x3b2   : > { %5704 = vst [vmem:[%s6954_s20 + $0xe48] sm:$0xff] %v3101_v36  ;;  %5706 = vst.msk [vmem:[%s6954_s20 + $0xe58] sm:$0xff] %vm237_vm0, %v3466_v53  ;;  %v3906_v53 = vld [vmem:[#allocation5 + $0xd0] sm:$0xff] }
 0x3b3   : > { %v3105_v3 = vpop.f32.mrf.mxu0  ;;  %v3470_v54 = vpop.f32.mrf.mxu1  ;;  %5860 = vmatmul.mubr.msk.f32.gmra.mxu0 %vm237_vm0, %v3893_v45  ;;  %5910 = vmatmul.mubr.msk.f32.gmra.mxu1 %vm237_vm0, %v3893_v45 }
 0x3b4   : > { %5707 = vst [vmem:[%s6954_s20 + $0xe60] sm:$0xff] %v3105_v3  ;;  %5709 = vst [vmem:[%s6954_s20 + $0xe70] sm:$0xff] %v3470_v54  ;;  %4228 = vmatprep.mubr.f32.mxu0 %v6388_v0  ;;  %4593 = vmatprep.mubr.f32.mxu1 %v6388_v0 }
 0x3b5   : > { %v3107_v11 = vpop.f32.mrf.mxu0  ;;  %v3472_v4 = vpop.f32.mrf.mxu1 }
 0x3b6   : > { %5708 = vst [vmem:[%s6954_s20 + $0xe68] sm:$0xff] %v3107_v11  ;;  %5710 = vst.msk [vmem:[%s6954_s20 + $0xe78] sm:$0xff] %vm237_vm0, %v3472_v4  ;;  %v3907_v4 = vld [vmem:[#allocation5 + $0xd8] sm:$0xff] }
 0x3b7   : > { %v3111_v28 = vpop.f32.mrf.mxu0  ;;  %v3476_v29 = vpop.f32.mrf.mxu1  ;;  %5861 = vmatmul.mubr.msk.f32.gmra.mxu0 %vm237_vm0, %v3894_v50  ;;  %5911 = vmatmul.mubr.msk.f32.gmra.mxu1 %vm237_vm0, %v3894_v50 }
 0x3b8   : > { %5711 = vst [vmem:[%s6954_s20 + $0xe80] sm:$0xff] %v3111_v28  ;;  %5713 = vst [vmem:[%s6954_s20 + $0xe90] sm:$0xff] %v3476_v29  ;;  %4234 = vmatprep.mubr.f32.mxu0 %v6388_v0  ;;  %4599 = vmatprep.mubr.f32.mxu1 %v6388_v0 }
 0x3b9   : > { %v3113_v26 = vpop.f32.mrf.mxu0  ;;  %v3478_v32 = vpop.f32.mrf.mxu1 }
 0x3ba   : > { %5712 = vst [vmem:[%s6954_s20 + $0xe88] sm:$0xff] %v3113_v26  ;;  %5714 = vst.msk [vmem:[%s6954_s20 + $0xe98] sm:$0xff] %vm237_vm0, %v3478_v32  ;;  %v3908_v32 = vld [vmem:[#allocation5 + $0xe0] sm:$0xff] }
 0x3bb   : > { %v3117_v33 = vpop.f32.mrf.mxu0  ;;  %v3482_v37 = vpop.f32.mrf.mxu1  ;;  %5862 = vmatmul.mubr.msk.f32.gmra.mxu0 %vm237_vm0, %v3895_v24  ;;  %5912 = vmatmul.mubr.msk.f32.gmra.mxu1 %vm237_vm0, %v3895_v24 }
 0x3bc   : > { %5715 = vst [vmem:[%s6954_s20 + $0xea0] sm:$0xff] %v3117_v33  ;;  %5717 = vst [vmem:[%s6954_s20 + $0xeb0] sm:$0xff] %v3482_v37  ;;  %4240 = vmatprep.mubr.f32.mxu0 %v6388_v0  ;;  %4605 = vmatprep.mubr.f32.mxu1 %v6388_v0 }
 0x3bd   : > { %v3119_v55 = vpop.f32.mrf.mxu0  ;;  %v3484_v5 = vpop.f32.mrf.mxu1 }
 0x3be   : > { %5716 = vst [vmem:[%s6954_s20 + $0xea8] sm:$0xff] %v3119_v55  ;;  %5718 = vst.msk [vmem:[%s6954_s20 + $0xeb8] sm:$0xff] %vm237_vm0, %v3484_v5  ;;  %v3909_v5 = vld [vmem:[#allocation5 + $0xe8] sm:$0xff] }
 0x3bf   : > { %v3123_v13 = vpop.f32.mrf.mxu0  ;;  %v3488_v14 = vpop.f32.mrf.mxu1  ;;  %5863 = vmatmul.mubr.msk.f32.gmra.mxu0 %vm237_vm0, %v3896_v12  ;;  %5913 = vmatmul.mubr.msk.f32.gmra.mxu1 %vm237_vm0, %v3896_v12 }
 0x3c0   : > { %5719 = vst [vmem:[%s6954_s20 + $0xec0] sm:$0xff] %v3123_v13  ;;  %5721 = vst [vmem:[%s6954_s20 + $0xed0] sm:$0xff] %v3488_v14  ;;  %4246 = vmatprep.mubr.f32.mxu0 %v6388_v0  ;;  %4611 = vmatprep.mubr.f32.mxu1 %v6388_v0 }
 0x3c1   : > { %v3125_v6 = vpop.f32.mrf.mxu0  ;;  %v3490_v56 = vpop.f32.mrf.mxu1 }
 0x3c2   : > { %5720 = vst [vmem:[%s6954_s20 + $0xec8] sm:$0xff] %v3125_v6  ;;  %5722 = vst.msk [vmem:[%s6954_s20 + $0xed8] sm:$0xff] %vm237_vm0, %v3490_v56  ;;  %v3910_v56 = vld [vmem:[#allocation5 + $0xf0] sm:$0xff] }
 0x3c3   : > { %v3129_v15 = vpop.f32.mrf.mxu0  ;;  %v3494_v16 = vpop.f32.mrf.mxu1  ;;  %5864 = vmatmul.mubr.msk.f32.gmra.mxu0 %vm237_vm0, %v3897_v38  ;;  %5914 = vmatmul.mubr.msk.f32.gmra.mxu1 %vm237_vm0, %v3897_v38 }
 0x3c4   : > { %5723 = vst [vmem:[%s6954_s20 + $0xee0] sm:$0xff] %v3129_v15  ;;  %5725 = vst [vmem:[%s6954_s20 + $0xef0] sm:$0xff] %v3494_v16  ;;  %4252 = vmatprep.mubr.f32.mxu0 %v6388_v0  ;;  %4617 = vmatprep.mubr.f32.mxu1 %v6388_v0 }
 0x3c5   : > { %v3131_v17 = vpop.f32.mrf.mxu0  ;;  %v3496_v57 = vpop.f32.mrf.mxu1 }
 0x3c6   : > { %5724 = vst [vmem:[%s6954_s20 + $0xee8] sm:$0xff] %v3131_v17  ;;  %5726 = vst.msk [vmem:[%s6954_s20 + $0xef8] sm:$0xff] %vm237_vm0, %v3496_v57  ;;  %v3911_v57 = vld [vmem:[#allocation5 + $0xf8] sm:$0xff] }
 0x3c7   : > { %v3135_v39 = vpop.f32.mrf.mxu0  ;;  %v3500_v8 = vpop.f32.mrf.mxu1  ;;  %5865 = vmatmul.mubr.msk.f32.gmra.mxu0 %vm237_vm0, %v3898_v7  ;;  %5915 = vmatmul.mubr.msk.f32.gmra.mxu1 %vm237_vm0, %v3898_v7 }
 0x3c8   : > { %5727 = vst [vmem:[%s6954_s20 + $0xf00] sm:$0xff] %v3135_v39  ;;  %5729 = vst [vmem:[%s6954_s20 + $0xf10] sm:$0xff] %v3500_v8  ;;  %4258 = vmatprep.mubr.f32.mxu0 %v6388_v0  ;;  %4623 = vmatprep.mubr.f32.mxu1 %v6388_v0 }
 0x3c9   : > { %v3137_v19 = vpop.f32.mrf.mxu0  ;;  %v3502_v58 = vpop.f32.mrf.mxu1 }
 0x3ca   : > { %5728 = vst [vmem:[%s6954_s20 + $0xf08] sm:$0xff] %v3137_v19  ;;  %5730 = vst.msk [vmem:[%s6954_s20 + $0xf18] sm:$0xff] %vm237_vm0, %v3502_v58  ;;  %v3912_v58 = vld [vmem:[#allocation5 + $0x100] sm:$0xff] }
 0x3cb   : > { %v3141_v9 = vpop.f32.mrf.mxu0  ;;  %v3506_v20 = vpop.f32.mrf.mxu1  ;;  %5866 = vmatmul.mubr.msk.f32.gmra.mxu0 %vm237_vm0, %v3899_v18  ;;  %5916 = vmatmul.mubr.msk.f32.gmra.mxu1 %vm237_vm0, %v3899_v18 }
 0x3cc   : > { %5731 = vst [vmem:[%s6954_s20 + $0xf20] sm:$0xff] %v3141_v9  ;;  %5733 = vst [vmem:[%s6954_s20 + $0xf30] sm:$0xff] %v3506_v20  ;;  %4264 = vmatprep.mubr.f32.mxu0 %v6388_v0  ;;  %4629 = vmatprep.mubr.f32.mxu1 %v6388_v0 }
 0x3cd   : > { %v3143_v21 = vpop.f32.mrf.mxu0  ;;  %v3508_v59 = vpop.f32.mrf.mxu1 }
 0x3ce   : > { %5732 = vst [vmem:[%s6954_s20 + $0xf28] sm:$0xff] %v3143_v21  ;;  %5734 = vst.msk [vmem:[%s6954_s20 + $0xf38] sm:$0xff] %vm237_vm0, %v3508_v59  ;;  %v3913_v59 = vld [vmem:[#allocation5 + $0x108] sm:$0xff] }
 0x3cf   : > { %v3147_v10 = vpop.f32.mrf.mxu0  ;;  %v3512_v22 = vpop.f32.mrf.mxu1  ;;  %5867 = vmatmul.mubr.msk.f32.gmra.mxu0 %vm237_vm0, %v3900_v40  ;;  %5917 = vmatmul.mubr.msk.f32.gmra.mxu1 %vm237_vm0, %v3900_v40 }
 0x3d0   : > { %5735 = vst [vmem:[%s6954_s20 + $0xf40] sm:$0xff] %v3147_v10  ;;  %5737 = vst [vmem:[%s6954_s20 + $0xf50] sm:$0xff] %v3512_v22  ;;  %4270 = vmatprep.mubr.f32.mxu0 %v6388_v0  ;;  %4635 = vmatprep.mubr.f32.mxu1 %v6388_v0 }
 0x3d1   : > { %v3149_v41 = vpop.f32.mrf.mxu0  ;;  %v3514_v60 = vpop.f32.mrf.mxu1 }
 0x3d2   : > { %5736 = vst [vmem:[%s6954_s20 + $0xf48] sm:$0xff] %v3149_v41  ;;  %5738 = vst.msk [vmem:[%s6954_s20 + $0xf58] sm:$0xff] %vm237_vm0, %v3514_v60  ;;  %v3914_v60 = vld [vmem:[#allocation5 + $0x110] sm:$0xff] }
 0x3d3   : > { %v3153_v25 = vpop.f32.mrf.mxu0  ;;  %v3518_v51 = vpop.f32.mrf.mxu1  ;;  %5868 = vmatmul.mubr.msk.f32.gmra.mxu0 %vm237_vm0, %v3901_v23  ;;  %5918 = vmatmul.mubr.msk.f32.gmra.mxu1 %vm237_vm0, %v3901_v23 }
 0x3d4   : > { %5739 = vst [vmem:[%s6954_s20 + $0xf60] sm:$0xff] %v3153_v25  ;;  %5741 = vst [vmem:[%s6954_s20 + $0xf70] sm:$0xff] %v3518_v51  ;;  %4276 = vmatprep.mubr.f32.mxu0 %v6388_v0  ;;  %4641 = vmatprep.mubr.f32.mxu1 %v6388_v0 }
 0x3d5   : > { %v3155_v61 = vpop.f32.mrf.mxu0  ;;  %v3520_v42 = vpop.f32.mrf.mxu1 }
 0x3d6   : > { %5740 = vst [vmem:[%s6954_s20 + $0xf68] sm:$0xff] %v3155_v61  ;;  %5742 = vst.msk [vmem:[%s6954_s20 + $0xf78] sm:$0xff] %vm237_vm0, %v3520_v42  ;;  %v3915_v42 = vld [vmem:[#allocation5 + $0x118] sm:$0xff] }
 0x3d7   : > { %v3159_v49 = vpop.f32.mrf.mxu0  ;;  %v3524_v30 = vpop.f32.mrf.mxu1  ;;  %5869 = vmatmul.mubr.msk.f32.gmra.mxu0 %vm237_vm0, %v3902_v48  ;;  %5919 = vmatmul.mubr.msk.f32.gmra.mxu1 %vm237_vm0, %v3902_v48 }
 0x3d8   : > { %5743 = vst [vmem:[%s6954_s20 + $0xf80] sm:$0xff] %v3159_v49  ;;  %5745 = vst [vmem:[%s6954_s20 + $0xf90] sm:$0xff] %v3524_v30  ;;  %4282 = vmatprep.mubr.f32.mxu0 %v6388_v0  ;;  %4647 = vmatprep.mubr.f32.mxu1 %v6388_v0 }
 0x3d9   : > { %v3161_v46 = vpop.f32.mrf.mxu0  ;;  %v3526_v43 = vpop.f32.mrf.mxu1 }
 0x3da   : > { %5744 = vst [vmem:[%s6954_s20 + $0xf88] sm:$0xff] %v3161_v46  ;;  %5746 = vst.msk [vmem:[%s6954_s20 + $0xf98] sm:$0xff] %vm237_vm0, %v3526_v43  ;;  %v3916_v43 = vld [vmem:[#allocation5 + $0x120] sm:$0xff] }
 0x3db   : > { %v3165_v47 = vpop.f32.mrf.mxu0  ;;  %v3530_v63 = vpop.f32.mrf.mxu1  ;;  %5870 = vmatmul.mubr.msk.f32.gmra.mxu0 %vm237_vm0, %v3903_v62  ;;  %5920 = vmatmul.mubr.msk.f32.gmra.mxu1 %vm237_vm0, %v3903_v62 }
 0x3dc   : > { %5747 = vst [vmem:[%s6954_s20 + $0xfa0] sm:$0xff] %v3165_v47  ;;  %5749 = vst [vmem:[%s6954_s20 + $0xfb0] sm:$0xff] %v3530_v63  ;;  %4288 = vmatprep.mubr.f32.mxu0 %v6388_v0  ;;  %4653 = vmatprep.mubr.f32.mxu1 %v6388_v0 }
 0x3dd   : > { %v3167_v35 = vpop.f32.mrf.mxu0  ;;  %v3532_v44 = vpop.f32.mrf.mxu1 }
 0x3de   : > { %5748 = vst [vmem:[%s6954_s20 + $0xfa8] sm:$0xff] %v3167_v35  ;;  %5750 = vst.msk [vmem:[%s6954_s20 + $0xfb8] sm:$0xff] %vm237_vm0, %v3532_v44  ;;  %v3917_v44 = vld [vmem:[#allocation5 + $0x128] sm:$0xff] }
 0x3df   : > { %v3171_v1 = vpop.f32.mrf.mxu0  ;;  %v3536_v27 = vpop.f32.mrf.mxu1  ;;  %5871 = vmatmul.mubr.msk.f32.gmra.mxu0 %vm237_vm0, %v3904_v52  ;;  %5921 = vmatmul.mubr.msk.f32.gmra.mxu1 %vm237_vm0, %v3904_v52 }
 0x3e0   : > { %5751 = vst [vmem:[%s6954_s20 + $0xfc0] sm:$0xff] %v3171_v1  ;;  %5753 = vst [vmem:[%s6954_s20 + $0xfd0] sm:$0xff] %v3536_v27  ;;  %4294 = vmatprep.mubr.f32.mxu0 %v6388_v0  ;;  %4659 = vmatprep.mubr.f32.mxu1 %v6388_v0 }
 0x3e1   : > { %v3173_v34 = vpop.f32.mrf.mxu0  ;;  %v3538_v2 = vpop.f32.mrf.mxu1 }
 0x3e2   : > { %5752 = vst [vmem:[%s6954_s20 + $0xfc8] sm:$0xff] %v3173_v34  ;;  %5754 = vst.msk [vmem:[%s6954_s20 + $0xfd8] sm:$0xff] %vm237_vm0, %v3538_v2  ;;  %v3918_v2 = vld [vmem:[#allocation5 + $0x130] sm:$0xff] }
 0x3e3   : > { %v3177_v45 = vpop.f32.mrf.mxu0  ;;  %v3542_v36 = vpop.f32.mrf.mxu1  ;;  %5872 = vmatmul.mubr.msk.f32.gmra.mxu0 %vm237_vm0, %v3905_v31  ;;  %5922 = vmatmul.mubr.msk.f32.gmra.mxu1 %vm237_vm0, %v3905_v31 }
 0x3e4   : > { %5755 = vst [vmem:[%s6954_s20 + $0xfe0] sm:$0xff] %v3177_v45  ;;  %5757 = vst [vmem:[%s6954_s20 + $0xff0] sm:$0xff] %v3542_v36  ;;  %4300 = vmatprep.mubr.f32.mxu0 %v6388_v0  ;;  %4665 = vmatprep.mubr.f32.mxu1 %v6388_v0 }
 0x3e5   : > { %v3179_v3 = vpop.f32.mrf.mxu0  ;;  %v3544_v54 = vpop.f32.mrf.mxu1 }
 0x3e6   : > { %5756 = vst [vmem:[%s6954_s20 + $0xfe8] sm:$0xff] %v3179_v3  ;;  %5758 = vst.msk [vmem:[%s6954_s20 + $0xff8] sm:$0xff] %vm237_vm0, %v3544_v54  ;;  %v3919_v54 = vld [vmem:[#allocation5 + $0x138] sm:$0xff] }
 0x3e7   : > { %v3183_v50 = vpop.f32.mrf.mxu0  ;;  %v3548_v11 = vpop.f32.mrf.mxu1  ;;  %5873 = vmatmul.mubr.msk.f32.gmra.mxu0 %vm237_vm0, %v3906_v53  ;;  %5923 = vmatmul.mubr.msk.f32.gmra.mxu1 %vm237_vm0, %v3906_v53 }
 0x3e8   : > { %5759 = vst [vmem:[%s6954_s20 + $0x1000] sm:$0xff] %v3183_v50  ;;  %5761 = vst [vmem:[%s6954_s20 + $0x1010] sm:$0xff] %v3548_v11  ;;  %4306 = vmatprep.mubr.f32.mxu0 %v6388_v0  ;;  %4671 = vmatprep.mubr.f32.mxu1 %v6388_v0 }
 0x3e9   : > { %v3185_v28 = vpop.f32.mrf.mxu0  ;;  %v3550_v29 = vpop.f32.mrf.mxu1 }
 0x3ea   : > { %5760 = vst [vmem:[%s6954_s20 + $0x1008] sm:$0xff] %v3185_v28  ;;  %5762 = vst.msk [vmem:[%s6954_s20 + $0x1018] sm:$0xff] %vm237_vm0, %v3550_v29  ;;  %v3920_v29 = vld [vmem:[#allocation5 + $0x140] sm:$0xff] }
 0x3eb   : > { %v3189_v24 = vpop.f32.mrf.mxu0  ;;  %v3554_v26 = vpop.f32.mrf.mxu1  ;;  %5874 = vmatmul.mubr.msk.f32.gmra.mxu0 %vm237_vm0, %v3907_v4  ;;  %5924 = vmatmul.mubr.msk.f32.gmra.mxu1 %vm237_vm0, %v3907_v4 }
 0x3ec   : > { %5763 = vst [vmem:[%s6954_s20 + $0x1020] sm:$0xff] %v3189_v24  ;;  %5765 = vst [vmem:[%s6954_s20 + $0x1030] sm:$0xff] %v3554_v26  ;;  %4312 = vmatprep.mubr.f32.mxu0 %v6388_v0  ;;  %4677 = vmatprep.mubr.f32.mxu1 %v6388_v0 }
 0x3ed   : > { %v3191_v33 = vpop.f32.mrf.mxu0  ;;  %v3556_v37 = vpop.f32.mrf.mxu1 }
 0x3ee   : > { %5764 = vst [vmem:[%s6954_s20 + $0x1028] sm:$0xff] %v3191_v33  ;;  %5766 = vst.msk [vmem:[%s6954_s20 + $0x1038] sm:$0xff] %vm237_vm0, %v3556_v37  ;;  %v3921_v37 = vld [vmem:[#allocation5 + $0x148] sm:$0xff] }
 0x3ef   : > { %v3195_v12 = vpop.f32.mrf.mxu0  ;;  %v3560_v55 = vpop.f32.mrf.mxu1  ;;  %5875 = vmatmul.mubr.msk.f32.gmra.mxu0 %vm237_vm0, %v3908_v32  ;;  %5925 = vmatmul.mubr.msk.f32.gmra.mxu1 %vm237_vm0, %v3908_v32 }
 0x3f0   : > { %5767 = vst [vmem:[%s6954_s20 + $0x1040] sm:$0xff] %v3195_v12  ;;  %5769 = vst [vmem:[%s6954_s20 + $0x1050] sm:$0xff] %v3560_v55  ;;  %4318 = vmatprep.mubr.f32.mxu0 %v6388_v0  ;;  %4683 = vmatprep.mubr.f32.mxu1 %v6388_v0 }
 0x3f1   : > { %v3197_v13 = vpop.f32.mrf.mxu0  ;;  %v3562_v14 = vpop.f32.mrf.mxu1 }
 0x3f2   : > { %5768 = vst [vmem:[%s6954_s20 + $0x1048] sm:$0xff] %v3197_v13  ;;  %5770 = vst.msk [vmem:[%s6954_s20 + $0x1058] sm:$0xff] %vm237_vm0, %v3562_v14  ;;  %v3922_v14 = vld [vmem:[#allocation5 + $0x150] sm:$0xff] }
 0x3f3   : > { %v3201_v38 = vpop.f32.mrf.mxu0  ;;  %v3566_v6 = vpop.f32.mrf.mxu1  ;;  %5876 = vmatmul.mubr.msk.f32.gmra.mxu0 %vm237_vm0, %v3909_v5  ;;  %5926 = vmatmul.mubr.msk.f32.gmra.mxu1 %vm237_vm0, %v3909_v5 }
 0x3f4   : > { %5771 = vst [vmem:[%s6954_s20 + $0x1060] sm:$0xff] %v3201_v38  ;;  %5773 = vst [vmem:[%s6954_s20 + $0x1070] sm:$0xff] %v3566_v6  ;;  %4324 = vmatprep.mubr.f32.mxu0 %v6388_v0  ;;  %4689 = vmatprep.mubr.f32.mxu1 %v6388_v0 }
 0x3f5   : > { %v3203_v15 = vpop.f32.mrf.mxu0  ;;  %v3568_v16 = vpop.f32.mrf.mxu1 }
 0x3f6   : > { %5772 = vst [vmem:[%s6954_s20 + $0x1068] sm:$0xff] %v3203_v15  ;;  %5774 = vst.msk [vmem:[%s6954_s20 + $0x1078] sm:$0xff] %vm237_vm0, %v3568_v16  ;;  %v3923_v16 = vld [vmem:[#allocation5 + $0x158] sm:$0xff] }
 0x3f7   : > { %v3207_v7 = vpop.f32.mrf.mxu0  ;;  %v3572_v17 = vpop.f32.mrf.mxu1  ;;  %5877 = vmatmul.mubr.msk.f32.gmra.mxu0 %vm237_vm0, %v3910_v56  ;;  %5927 = vmatmul.mubr.msk.f32.gmra.mxu1 %vm237_vm0, %v3910_v56 }
 0x3f8   : > { %5775 = vst [vmem:[%s6954_s20 + $0x1080] sm:$0xff] %v3207_v7  ;;  %5777 = vst [vmem:[%s6954_s20 + $0x1090] sm:$0xff] %v3572_v17  ;;  %4330 = vmatprep.mubr.f32.mxu0 %v6388_v0  ;;  %4695 = vmatprep.mubr.f32.mxu1 %v6388_v0 }
 0x3f9   : > { %v3209_v39 = vpop.f32.mrf.mxu0  ;;  %v3574_v8 = vpop.f32.mrf.mxu1 }
 0x3fa   : > { %5776 = vst [vmem:[%s6954_s20 + $0x1088] sm:$0xff] %v3209_v39  ;;  %5778 = vst.msk [vmem:[%s6954_s20 + $0x1098] sm:$0xff] %vm237_vm0, %v3574_v8  ;;  %v3924_v8 = vld [vmem:[#allocation5 + $0x160] sm:$0xff] }
 0x3fb   : > { %v3213_v18 = vpop.f32.mrf.mxu0  ;;  %v3578_v19 = vpop.f32.mrf.mxu1  ;;  %5878 = vmatmul.mubr.msk.f32.gmra.mxu0 %vm237_vm0, %v3911_v57  ;;  %5928 = vmatmul.mubr.msk.f32.gmra.mxu1 %vm237_vm0, %v3911_v57 }
 0x3fc   : > { %5779 = vst [vmem:[%s6954_s20 + $0x10a0] sm:$0xff] %v3213_v18  ;;  %5781 = vst [vmem:[%s6954_s20 + $0x10b0] sm:$0xff] %v3578_v19  ;;  %4336 = vmatprep.mubr.f32.mxu0 %v6388_v0  ;;  %4701 = vmatprep.mubr.f32.mxu1 %v6388_v0 }
 0x3fd   : > { %v3215_v9 = vpop.f32.mrf.mxu0  ;;  %v3580_v20 = vpop.f32.mrf.mxu1 }
 0x3fe   : > { %5780 = vst [vmem:[%s6954_s20 + $0x10a8] sm:$0xff] %v3215_v9  ;;  %5782 = vst.msk [vmem:[%s6954_s20 + $0x10b8] sm:$0xff] %vm237_vm0, %v3580_v20  ;;  %v3925_v20 = vld [vmem:[#allocation5 + $0x168] sm:$0xff] }
 0x3ff   : > { %v3219_v40 = vpop.f32.mrf.mxu0  ;;  %v3584_v21 = vpop.f32.mrf.mxu1  ;;  %5879 = vmatmul.mubr.msk.f32.gmra.mxu0 %vm237_vm0, %v3912_v58  ;;  %5929 = vmatmul.mubr.msk.f32.gmra.mxu1 %vm237_vm0, %v3912_v58 }
 0x400   : > { %5783 = vst [vmem:[%s6954_s20 + $0x10c0] sm:$0xff] %v3219_v40  ;;  %5785 = vst [vmem:[%s6954_s20 + $0x10d0] sm:$0xff] %v3584_v21  ;;  %4342 = vmatprep.mubr.f32.mxu0 %v6388_v0  ;;  %4707 = vmatprep.mubr.f32.mxu1 %v6388_v0 }
 0x401   : > { %v3221_v10 = vpop.f32.mrf.mxu0  ;;  %v3586_v22 = vpop.f32.mrf.mxu1 }
 0x402   : > { %5784 = vst [vmem:[%s6954_s20 + $0x10c8] sm:$0xff] %v3221_v10  ;;  %5786 = vst.msk [vmem:[%s6954_s20 + $0x10d8] sm:$0xff] %vm237_vm0, %v3586_v22  ;;  %v3926_v22 = vld [vmem:[#allocation5 + $0x170] sm:$0xff] }
 0x403   : > { %v3225_v23 = vpop.f32.mrf.mxu0  ;;  %v3590_v41 = vpop.f32.mrf.mxu1  ;;  %5880 = vmatmul.mubr.msk.f32.gmra.mxu0 %vm237_vm0, %v3913_v59  ;;  %5930 = vmatmul.mubr.msk.f32.gmra.mxu1 %vm237_vm0, %v3913_v59 }
 0x404   : > { %5787 = vst [vmem:[%s6954_s20 + $0x10e0] sm:$0xff] %v3225_v23  ;;  %5789 = vst [vmem:[%s6954_s20 + $0x10f0] sm:$0xff] %v3590_v41  ;;  %4348 = vmatprep.mubr.f32.mxu0 %v6388_v0  ;;  %4713 = vmatprep.mubr.f32.mxu1 %v6388_v0 }
 0x405   : > { %v3227_v25 = vpop.f32.mrf.mxu0  ;;  %v3592_v51 = vpop.f32.mrf.mxu1 }
 0x406   : > { %5788 = vst [vmem:[%s6954_s20 + $0x10e8] sm:$0xff] %v3227_v25  ;;  %5790 = vst.msk [vmem:[%s6954_s20 + $0x10f8] sm:$0xff] %vm237_vm0, %v3592_v51  ;;  %v3927_v51 = vld [vmem:[#allocation5 + $0x178] sm:$0xff] }
 0x407   : > { %v3231_v48 = vpop.f32.mrf.mxu0  ;;  %v3596_v61 = vpop.f32.mrf.mxu1  ;;  %5881 = vmatmul.mubr.msk.f32.gmra.mxu0 %vm237_vm0, %v3914_v60  ;;  %5931 = vmatmul.mubr.msk.f32.gmra.mxu1 %vm237_vm0, %v3914_v60 }
 0x408   : > { %5791 = vst [vmem:[%s6954_s20 + $0x1100] sm:$0xff] %v3231_v48  ;;  %5793 = vst [vmem:[%s6954_s20 + $0x1110] sm:$0xff] %v3596_v61  ;;  %4354 = vmatprep.mubr.f32.mxu0 %v6388_v0  ;;  %4719 = vmatprep.mubr.f32.mxu1 %v6388_v0 }
 0x409   : > { %v3233_v49 = vpop.f32.mrf.mxu0  ;;  %v3598_v30 = vpop.f32.mrf.mxu1 }
 0x40a   : > { %5792 = vst [vmem:[%s6954_s20 + $0x1108] sm:$0xff] %v3233_v49  ;;  %5794 = vst.msk [vmem:[%s6954_s20 + $0x1118] sm:$0xff] %vm237_vm0, %v3598_v30  ;;  %v3928_v30 = vld [vmem:[#allocation5 + $0x180] sm:$0xff] }
 0x40b   : > { %v3237_v62 = vpop.f32.mrf.mxu0  ;;  %v3602_v46 = vpop.f32.mrf.mxu1  ;;  %5882 = vmatmul.mubr.msk.f32.gmra.mxu0 %vm237_vm0, %v3915_v42  ;;  %5932 = vmatmul.mubr.msk.f32.gmra.mxu1 %vm237_vm0, %v3915_v42 }
 0x40c   : > { %5795 = vst [vmem:[%s6954_s20 + $0x1120] sm:$0xff] %v3237_v62  ;;  %5797 = vst [vmem:[%s6954_s20 + $0x1130] sm:$0xff] %v3602_v46  ;;  %4360 = vmatprep.mubr.f32.mxu0 %v6388_v0  ;;  %4725 = vmatprep.mubr.f32.mxu1 %v6388_v0 }
 0x40d   : > { %v3239_v47 = vpop.f32.mrf.mxu0  ;;  %v3604_v63 = vpop.f32.mrf.mxu1 }
 0x40e   : > { %5796 = vst [vmem:[%s6954_s20 + $0x1128] sm:$0xff] %v3239_v47  ;;  %5798 = vst.msk [vmem:[%s6954_s20 + $0x1138] sm:$0xff] %vm237_vm0, %v3604_v63  ;;  %v3929_v63 = vld [vmem:[#allocation5 + $0x188] sm:$0xff] }
 0x40f   : > { %v3243_v52 = vpop.f32.mrf.mxu0  ;;  %v3608_v35 = vpop.f32.mrf.mxu1  ;;  %5883 = vmatmul.mubr.msk.f32.gmra.mxu0 %vm237_vm0, %v3916_v43  ;;  %5933 = vmatmul.mubr.msk.f32.gmra.mxu1 %vm237_vm0, %v3916_v43 }
 0x410   : > { %5799 = vst [vmem:[%s6954_s20 + $0x1140] sm:$0xff] %v3243_v52  ;;  %5801 = vst [vmem:[%s6954_s20 + $0x1150] sm:$0xff] %v3608_v35  ;;  %4366 = vmatprep.mubr.f32.mxu0 %v6388_v0  ;;  %4731 = vmatprep.mubr.f32.mxu1 %v6388_v0 }
 0x411   : > { %v3245_v1 = vpop.f32.mrf.mxu0  ;;  %v3610_v27 = vpop.f32.mrf.mxu1 }
 0x412   : > { %5800 = vst [vmem:[%s6954_s20 + $0x1148] sm:$0xff] %v3245_v1  ;;  %5802 = vst.msk [vmem:[%s6954_s20 + $0x1158] sm:$0xff] %vm237_vm0, %v3610_v27 }
 0x413   : > { %v3249_v31 = vpop.f32.mrf.mxu0  ;;  %v3614_v34 = vpop.f32.mrf.mxu1  ;;  %5884 = vmatmul.mubr.msk.f32.gmra.mxu0 %vm237_vm0, %v3917_v44  ;;  %5934 = vmatmul.mubr.msk.f32.gmra.mxu1 %vm237_vm0, %v3917_v44 }
 0x414   : > { %5803 = vst [vmem:[%s6954_s20 + $0x1160] sm:$0xff] %v3249_v31  ;;  %5805 = vst [vmem:[%s6954_s20 + $0x1170] sm:$0xff] %v3614_v34  ;;  %4372 = vmatprep.mubr.f32.mxu0 %v6388_v0  ;;  %4737 = vmatprep.mubr.f32.mxu1 %v6388_v0 }
 0x415   : > { %v3251_v45 = vpop.f32.mrf.mxu0  ;;  %v3616_v36 = vpop.f32.mrf.mxu1 }
 0x416   : > { %5804 = vst [vmem:[%s6954_s20 + $0x1168] sm:$0xff] %v3251_v45  ;;  %5806 = vst.msk [vmem:[%s6954_s20 + $0x1178] sm:$0xff] %vm237_vm0, %v3616_v36 }
 0x417   : > { %v3255_v53 = vpop.f32.mrf.mxu0  ;;  %v3620_v3 = vpop.f32.mrf.mxu1  ;;  %5885 = vmatmul.mubr.msk.f32.gmra.mxu0 %vm237_vm0, %v3918_v2  ;;  %5935 = vmatmul.mubr.msk.f32.gmra.mxu1 %vm237_vm0, %v3918_v2 }
 0x418   : > { %5807 = vst [vmem:[%s6954_s20 + $0x1180] sm:$0xff] %v3255_v53  ;;  %5809 = vst [vmem:[%s6954_s20 + $0x1190] sm:$0xff] %v3620_v3  ;;  %4378 = vmatprep.mubr.f32.mxu0 %v6388_v0  ;;  %4743 = vmatprep.mubr.f32.mxu1 %v6388_v0 }
 0x419   : > { %v3257_v50 = vpop.f32.mrf.mxu0  ;;  %v3622_v11 = vpop.f32.mrf.mxu1 }
 0x41a   : > { %5808 = vst [vmem:[%s6954_s20 + $0x1188] sm:$0xff] %v3257_v50  ;;  %5810 = vst.msk [vmem:[%s6954_s20 + $0x1198] sm:$0xff] %vm237_vm0, %v3622_v11 }
 0x41b   : > { %v3261_v4 = vpop.f32.mrf.mxu0  ;;  %v3626_v28 = vpop.f32.mrf.mxu1  ;;  %5886 = vmatmul.mubr.msk.f32.gmra.mxu0 %vm237_vm0, %v3919_v54  ;;  %5936 = vmatmul.mubr.msk.f32.gmra.mxu1 %vm237_vm0, %v3919_v54 }
 0x41c   : > { %5811 = vst [vmem:[%s6954_s20 + $0x11a0] sm:$0xff] %v3261_v4  ;;  %5813 = vst [vmem:[%s6954_s20 + $0x11b0] sm:$0xff] %v3626_v28  ;;  %4384 = vmatprep.mubr.f32.mxu0 %v6388_v0  ;;  %4749 = vmatprep.mubr.f32.mxu1 %v6388_v0 }
 0x41d   : > { %v3263_v24 = vpop.f32.mrf.mxu0  ;;  %v3628_v26 = vpop.f32.mrf.mxu1 }
 0x41e   : > { %5812 = vst [vmem:[%s6954_s20 + $0x11a8] sm:$0xff] %v3263_v24  ;;  %5814 = vst.msk [vmem:[%s6954_s20 + $0x11b8] sm:$0xff] %vm237_vm0, %v3628_v26 }
 0x41f   : > { %v3267_v32 = vpop.f32.mrf.mxu0  ;;  %v3632_v33 = vpop.f32.mrf.mxu1  ;;  %5887 = vmatmul.mubr.msk.f32.gmra.mxu0 %vm237_vm0, %v3920_v29  ;;  %5937 = vmatmul.mubr.msk.f32.gmra.mxu1 %vm237_vm0, %v3920_v29 }
 0x420   : > { %5815 = vst [vmem:[%s6954_s20 + $0x11c0] sm:$0xff] %v3267_v32  ;;  %5817 = vst [vmem:[%s6954_s20 + $0x11d0] sm:$0xff] %v3632_v33  ;;  %4390 = vmatprep.mubr.f32.mxu0 %v6388_v0  ;;  %4755 = vmatprep.mubr.f32.mxu1 %v6388_v0 }
 0x421   : > { %v3269_v12 = vpop.f32.mrf.mxu0  ;;  %v3634_v55 = vpop.f32.mrf.mxu1 }
 0x422   : > { %5816 = vst [vmem:[%s6954_s20 + $0x11c8] sm:$0xff] %v3269_v12  ;;  %5818 = vst.msk [vmem:[%s6954_s20 + $0x11d8] sm:$0xff] %vm237_vm0, %v3634_v55 }
 0x423   : > { %v3273_v5 = vpop.f32.mrf.mxu0  ;;  %v3638_v13 = vpop.f32.mrf.mxu1  ;;  %5888 = vmatmul.mubr.msk.f32.gmra.mxu0 %vm237_vm0, %v3921_v37  ;;  %5938 = vmatmul.mubr.msk.f32.gmra.mxu1 %vm237_vm0, %v3921_v37 }
 0x424   : > { %5819 = vst [vmem:[%s6954_s20 + $0x11e0] sm:$0xff] %v3273_v5  ;;  %5821 = vst [vmem:[%s6954_s20 + $0x11f0] sm:$0xff] %v3638_v13  ;;  %4396 = vmatprep.mubr.f32.mxu0 %v6388_v0  ;;  %4761 = vmatprep.mubr.f32.mxu1 %v6388_v0 }
 0x425   : > { %v3275_v38 = vpop.f32.mrf.mxu0  ;;  %v3640_v6 = vpop.f32.mrf.mxu1 }
 0x426   : > { %5820 = vst [vmem:[%s6954_s20 + $0x11e8] sm:$0xff] %v3275_v38  ;;  %5822 = vst.msk [vmem:[%s6954_s20 + $0x11f8] sm:$0xff] %vm237_vm0, %v3640_v6 }
 0x427   : > { %v3279_v56 = vpop.f32.mrf.mxu0  ;;  %v3644_v15 = vpop.f32.mrf.mxu1  ;;  %5889 = vmatmul.mubr.msk.f32.gmra.mxu0 %vm237_vm0, %v3922_v14  ;;  %5939 = vmatmul.mubr.msk.f32.gmra.mxu1 %vm237_vm0, %v3922_v14 }
 0x428   : > { %5823 = vst [vmem:[%s6954_s20 + $0x1200] sm:$0xff] %v3279_v56  ;;  %5825 = vst [vmem:[%s6954_s20 + $0x1210] sm:$0xff] %v3644_v15  ;;  %4402 = vmatprep.mubr.f32.mxu0 %v6388_v0  ;;  %4767 = vmatprep.mubr.f32.mxu1 %v6388_v0 }
 0x429   : > { %v3281_v7 = vpop.f32.mrf.mxu0  ;;  %v3646_v17 = vpop.f32.mrf.mxu1 }
 0x42a   : > { %5824 = vst [vmem:[%s6954_s20 + $0x1208] sm:$0xff] %v3281_v7  ;;  %5826 = vst.msk [vmem:[%s6954_s20 + $0x1218] sm:$0xff] %vm237_vm0, %v3646_v17 }
 0x42b   : > { %v3285_v57 = vpop.f32.mrf.mxu0  ;;  %v3650_v39 = vpop.f32.mrf.mxu1  ;;  %5890 = vmatmul.mubr.msk.f32.gmra.mxu0 %vm237_vm0, %v3923_v16  ;;  %5940 = vmatmul.mubr.msk.f32.gmra.mxu1 %vm237_vm0, %v3923_v16 }
 0x42c   : > { %5827 = vst [vmem:[%s6954_s20 + $0x1220] sm:$0xff] %v3285_v57  ;;  %5829 = vst [vmem:[%s6954_s20 + $0x1230] sm:$0xff] %v3650_v39  ;;  %4408 = vmatprep.mubr.f32.mxu0 %v6388_v0  ;;  %4773 = vmatprep.mubr.f32.mxu1 %v6388_v0 }
 0x42d   : > { %v3287_v18 = vpop.f32.mrf.mxu0  ;;  %v3652_v19 = vpop.f32.mrf.mxu1 }
 0x42e   : > { %5828 = vst [vmem:[%s6954_s20 + $0x1228] sm:$0xff] %v3287_v18  ;;  %5830 = vst.msk [vmem:[%s6954_s20 + $0x1238] sm:$0xff] %vm237_vm0, %v3652_v19 }
 0x42f   : > { %v3291_v58 = vpop.f32.mrf.mxu0  ;;  %v3656_v9 = vpop.f32.mrf.mxu1  ;;  %5891 = vmatmul.mubr.msk.f32.gmra.mxu0 %vm237_vm0, %v3924_v8  ;;  %5941 = vmatmul.mubr.msk.f32.gmra.mxu1 %vm237_vm0, %v3924_v8 }
 0x430   : > { %5831 = vst [vmem:[%s6954_s20 + $0x1240] sm:$0xff] %v3291_v58  ;;  %5833 = vst [vmem:[%s6954_s20 + $0x1250] sm:$0xff] %v3656_v9  ;;  %4414 = vmatprep.mubr.f32.mxu0 %v6388_v0  ;;  %4779 = vmatprep.mubr.f32.mxu1 %v6388_v0 }
 0x431   : > { %v3293_v40 = vpop.f32.mrf.mxu0  ;;  %v3658_v21 = vpop.f32.mrf.mxu1 }
 0x432   : > { %5832 = vst [vmem:[%s6954_s20 + $0x1248] sm:$0xff] %v3293_v40  ;;  %5834 = vst.msk [vmem:[%s6954_s20 + $0x1258] sm:$0xff] %vm237_vm0, %v3658_v21 }
 0x433   : > { %v3297_v59 = vpop.f32.mrf.mxu0  ;;  %v3662_v10 = vpop.f32.mrf.mxu1  ;;  %5892 = vmatmul.mubr.msk.f32.gmra.mxu0 %vm237_vm0, %v3925_v20  ;;  %5942 = vmatmul.mubr.msk.f32.gmra.mxu1 %vm237_vm0, %v3925_v20 }
 0x434   : > { %5835 = vst [vmem:[%s6954_s20 + $0x1260] sm:$0xff] %v3297_v59  ;;  %5837 = vst [vmem:[%s6954_s20 + $0x1270] sm:$0xff] %v3662_v10  ;;  %4420 = vmatprep.mubr.f32.mxu0 %v6388_v0  ;;  %4785 = vmatprep.mubr.f32.mxu1 %v6388_v0 }
 0x435   : > { %v3299_v23 = vpop.f32.mrf.mxu0  ;;  %v3664_v41 = vpop.f32.mrf.mxu1 }
 0x436   : > { %5836 = vst [vmem:[%s6954_s20 + $0x1268] sm:$0xff] %v3299_v23  ;;  %5838 = vst.msk [vmem:[%s6954_s20 + $0x1278] sm:$0xff] %vm237_vm0, %v3664_v41 }
 0x437   : > { %v3303_v60 = vpop.f32.mrf.mxu0  ;;  %v3668_v25 = vpop.f32.mrf.mxu1  ;;  %5893 = vmatmul.mubr.msk.f32.gmra.mxu0 %vm237_vm0, %v3926_v22  ;;  %5943 = vmatmul.mubr.msk.f32.gmra.mxu1 %vm237_vm0, %v3926_v22 }
 0x438   : > { %5839 = vst [vmem:[%s6954_s20 + $0x1280] sm:$0xff] %v3303_v60  ;;  %5841 = vst [vmem:[%s6954_s20 + $0x1290] sm:$0xff] %v3668_v25  ;;  %4426 = vmatprep.mubr.f32.mxu0 %v6388_v0  ;;  %4791 = vmatprep.mubr.f32.mxu1 %v6388_v0 }
 0x439   : > { %v3305_v48 = vpop.f32.mrf.mxu0  ;;  %v3670_v61 = vpop.f32.mrf.mxu1 }
 0x43a   : > { %5840 = vst [vmem:[%s6954_s20 + $0x1288] sm:$0xff] %v3305_v48  ;;  %5842 = vst.msk [vmem:[%s6954_s20 + $0x1298] sm:$0xff] %vm237_vm0, %v3670_v61 }
 0x43b   : > { %v3309_v42 = vpop.f32.mrf.mxu0  ;;  %v3674_v49 = vpop.f32.mrf.mxu1  ;;  %5894 = vmatmul.mubr.msk.f32.gmra.mxu0 %vm237_vm0, %v3927_v51  ;;  %5944 = vmatmul.mubr.msk.f32.gmra.mxu1 %vm237_vm0, %v3927_v51 }
 0x43c   : > { %5843 = vst [vmem:[%s6954_s20 + $0x12a0] sm:$0xff] %v3309_v42  ;;  %5845 = vst [vmem:[%s6954_s20 + $0x12b0] sm:$0xff] %v3674_v49  ;;  %4432 = vmatprep.mubr.f32.mxu0 %v6388_v0  ;;  %4797 = vmatprep.mubr.f32.mxu1 %v6388_v0 }
 0x43d   : > { %v3311_v62 = vpop.f32.mrf.mxu0  ;;  %v3676_v46 = vpop.f32.mrf.mxu1 }
 0x43e   : > { %5844 = vst [vmem:[%s6954_s20 + $0x12a8] sm:$0xff] %v3311_v62  ;;  %5846 = vst.msk [vmem:[%s6954_s20 + $0x12b8] sm:$0xff] %vm237_vm0, %v3676_v46 }
 0x43f   : > { %v4146_v43 = vpop.f32.mrf.mxu0  ;;  %5895 = vmatmul.mubr.msk.f32.gmra.mxu0 %vm237_vm0, %v3928_v30  ;;  %v4511_v47 = vpop.f32.mrf.mxu1  ;;  %5945 = vmatmul.mubr.msk.f32.gmra.mxu1 %vm237_vm0, %v3928_v30 }
 0x440   : > { %5947 = vst [vmem:[%s6954_s20 + $0x12c0] sm:$0xff] %v4146_v43  ;;  %5949 = vst [vmem:[%s6954_s20 + $0x12d0] sm:$0xff] %v4511_v47  ;;  %4438 = vmatprep.mubr.f32.mxu0 %v6388_v0  ;;  %4803 = vmatprep.mubr.f32.mxu1 %v6388_v0 }
 0x441   : > { %v4148_v52 = vpop.f32.mrf.mxu0  ;;  %v4513_v35 = vpop.f32.mrf.mxu1 }
 0x442   : > { %5948 = vst [vmem:[%s6954_s20 + $0x12c8] sm:$0xff] %v4148_v52  ;;  %5950 = vst.msk [vmem:[%s6954_s20 + $0x12d8] sm:$0xff] %vm237_vm0, %v4513_v35 }
 0x443   : > { %v4152_v44 = vpop.f32.mrf.mxu0  ;;  %5896 = vmatmul.mubr.msk.f32.gmra.mxu0 %vm237_vm0, %v3929_v63  ;;  %v4517_v1 = vpop.f32.mrf.mxu1  ;;  %5946 = vmatmul.mubr.msk.f32.gmra.mxu1 %vm237_vm0, %v3929_v63 }
 0x444   : > { %5951 = vst [vmem:[%s6954_s20 + $0x12e0] sm:$0xff] %v4152_v44  ;;  %5953 = vst [vmem:[%s6954_s20 + $0x12f0] sm:$0xff] %v4517_v1 }
 0x445   : > { %v4154_v0 = vpop.f32.mrf.mxu0  ;;  %v4519_v27 = vpop.f32.mrf.mxu1 }
 0x446   : > { %5952 = vst [vmem:[%s6954_s20 + $0x12e8] sm:$0xff] %v4154_v0  ;;  %5954 = vst.msk [vmem:[%s6954_s20 + $0x12f8] sm:$0xff] %vm237_vm0, %v4519_v27 }
 0x447   : > { %v4158_v31 = vpop.f32.mrf.mxu0  ;;  %v4523_v34 = vpop.f32.mrf.mxu1 }
 0x448   : > { %5955 = vst [vmem:[%s6954_s20 + $0x1300] sm:$0xff] %v4158_v31  ;;  %5957 = vst [vmem:[%s6954_s20 + $0x1310] sm:$0xff] %v4523_v34 }
 0x449   : > { %v4160_v2 = vpop.f32.mrf.mxu0  ;;  %v4525_v45 = vpop.f32.mrf.mxu1 }
 0x44a   : > { %5956 = vst [vmem:[%s6954_s20 + $0x1308] sm:$0xff] %v4160_v2  ;;  %5958 = vst.msk [vmem:[%s6954_s20 + $0x1318] sm:$0xff] %vm237_vm0, %v4525_v45 }
 0x44b   : > { %v4164_v36 = vpop.f32.mrf.mxu0  ;;  %v4529_v53 = vpop.f32.mrf.mxu1 }
 0x44c   : > { %5959 = vst [vmem:[%s6954_s20 + $0x1320] sm:$0xff] %v4164_v36  ;;  %5961 = vst [vmem:[%s6954_s20 + $0x1330] sm:$0xff] %v4529_v53 }
 0x44d   : > { %v4166_v3 = vpop.f32.mrf.mxu0  ;;  %v4531_v54 = vpop.f32.mrf.mxu1 }
 0x44e   : > { %5960 = vst [vmem:[%s6954_s20 + $0x1328] sm:$0xff] %v4166_v3  ;;  %5962 = vst.msk [vmem:[%s6954_s20 + $0x1338] sm:$0xff] %vm237_vm0, %v4531_v54 }
 0x44f   : > { %v4170_v50 = vpop.f32.mrf.mxu0  ;;  %v4535_v11 = vpop.f32.mrf.mxu1 }
 0x450   : > { %5963 = vst [vmem:[%s6954_s20 + $0x1340] sm:$0xff] %v4170_v50  ;;  %5965 = vst [vmem:[%s6954_s20 + $0x1350] sm:$0xff] %v4535_v11 }
 0x451   : > { %v4172_v4 = vpop.f32.mrf.mxu0  ;;  %v4537_v28 = vpop.f32.mrf.mxu1 }
 0x452   : > { %5964 = vst [vmem:[%s6954_s20 + $0x1348] sm:$0xff] %v4172_v4  ;;  %5966 = vst.msk [vmem:[%s6954_s20 + $0x1358] sm:$0xff] %vm237_vm0, %v4537_v28 }
 0x453   : > { %v4176_v29 = vpop.f32.mrf.mxu0  ;;  %v4541_v24 = vpop.f32.mrf.mxu1 }
 0x454   : > { %5967 = vst [vmem:[%s6954_s20 + $0x1360] sm:$0xff] %v4176_v29  ;;  %5969 = vst [vmem:[%s6954_s20 + $0x1370] sm:$0xff] %v4541_v24 }
 0x455   : > { %v4178_v26 = vpop.f32.mrf.mxu0  ;;  %v4543_v32 = vpop.f32.mrf.mxu1 }
 0x456   : > { %5968 = vst [vmem:[%s6954_s20 + $0x1368] sm:$0xff] %v4178_v26  ;;  %5970 = vst.msk [vmem:[%s6954_s20 + $0x1378] sm:$0xff] %vm237_vm0, %v4543_v32 }
 0x457   : > { %v4182_v33 = vpop.f32.mrf.mxu0  ;;  %v4547_v37 = vpop.f32.mrf.mxu1 }
 0x458   : > { %5971 = vst [vmem:[%s6954_s20 + $0x1380] sm:$0xff] %v4182_v33  ;;  %5973 = vst [vmem:[%s6954_s20 + $0x1390] sm:$0xff] %v4547_v37 }
 0x459   : > { %v4184_v12 = vpop.f32.mrf.mxu0  ;;  %v4549_v55 = vpop.f32.mrf.mxu1 }
 0x45a   : > { %5972 = vst [vmem:[%s6954_s20 + $0x1388] sm:$0xff] %v4184_v12  ;;  %5974 = vst.msk [vmem:[%s6954_s20 + $0x1398] sm:$0xff] %vm237_vm0, %v4549_v55 }
 0x45b   : > { %v4188_v5 = vpop.f32.mrf.mxu0  ;;  %v4553_v13 = vpop.f32.mrf.mxu1 }
 0x45c   : > { %5975 = vst [vmem:[%s6954_s20 + $0x13a0] sm:$0xff] %v4188_v5  ;;  %5977 = vst [vmem:[%s6954_s20 + $0x13b0] sm:$0xff] %v4553_v13 }
 0x45d   : > { %v4190_v14 = vpop.f32.mrf.mxu0  ;;  %v4555_v38 = vpop.f32.mrf.mxu1 }
 0x45e   : > { %5976 = vst [vmem:[%s6954_s20 + $0x13a8] sm:$0xff] %v4190_v14  ;;  %5978 = vst.msk [vmem:[%s6954_s20 + $0x13b8] sm:$0xff] %vm237_vm0, %v4555_v38 }
 0x45f   : > { %v4194_v6 = vpop.f32.mrf.mxu0  ;;  %v4559_v56 = vpop.f32.mrf.mxu1 }
 0x460   : > { %5979 = vst [vmem:[%s6954_s20 + $0x13c0] sm:$0xff] %v4194_v6  ;;  %5981 = vst [vmem:[%s6954_s20 + $0x13d0] sm:$0xff] %v4559_v56 }
 0x461   : > { %v4196_v15 = vpop.f32.mrf.mxu0  ;;  %v4561_v16 = vpop.f32.mrf.mxu1 }
 0x462   : > { %5980 = vst [vmem:[%s6954_s20 + $0x13c8] sm:$0xff] %v4196_v15  ;;  %5982 = vst.msk [vmem:[%s6954_s20 + $0x13d8] sm:$0xff] %vm237_vm0, %v4561_v16 }
 0x463   : > { %v4200_v7 = vpop.f32.mrf.mxu0  ;;  %v4565_v17 = vpop.f32.mrf.mxu1 }
 0x464   : > { %5983 = vst [vmem:[%s6954_s20 + $0x13e0] sm:$0xff] %v4200_v7  ;;  %5985 = vst [vmem:[%s6954_s20 + $0x13f0] sm:$0xff] %v4565_v17 }
 0x465   : > { %v4202_v57 = vpop.f32.mrf.mxu0  ;;  %v4567_v39 = vpop.f32.mrf.mxu1 }
 0x466   : > { %5984 = vst [vmem:[%s6954_s20 + $0x13e8] sm:$0xff] %v4202_v57  ;;  %5986 = vst.msk [vmem:[%s6954_s20 + $0x13f8] sm:$0xff] %vm237_vm0, %v4567_v39 }
 0x467   : > { %v4206_v8 = vpop.f32.mrf.mxu0  ;;  %v4571_v18 = vpop.f32.mrf.mxu1 }
 0x468   : > { %5987 = vst [vmem:[%s6954_s20 + $0x1400] sm:$0xff] %v4206_v8  ;;  %5989 = vst [vmem:[%s6954_s20 + $0x1410] sm:$0xff] %v4571_v18 }
 0x469   : > { %v4208_v19 = vpop.f32.mrf.mxu0  ;;  %v4573_v58 = vpop.f32.mrf.mxu1 }
 0x46a   : > { %5988 = vst [vmem:[%s6954_s20 + $0x1408] sm:$0xff] %v4208_v19  ;;  %5990 = vst.msk [vmem:[%s6954_s20 + $0x1418] sm:$0xff] %vm237_vm0, %v4573_v58 }
 0x46b   : > { %v4212_v9 = vpop.f32.mrf.mxu0  ;;  %v4577_v20 = vpop.f32.mrf.mxu1 }
 0x46c   : > { %5991 = vst [vmem:[%s6954_s20 + $0x1420] sm:$0xff] %v4212_v9  ;;  %5993 = vst [vmem:[%s6954_s20 + $0x1430] sm:$0xff] %v4577_v20 }
 0x46d   : > { %v4214_v40 = vpop.f32.mrf.mxu0  ;;  %v4579_v21 = vpop.f32.mrf.mxu1 }
 0x46e   : > { %5992 = vst [vmem:[%s6954_s20 + $0x1428] sm:$0xff] %v4214_v40  ;;  %5994 = vst.msk [vmem:[%s6954_s20 + $0x1438] sm:$0xff] %vm237_vm0, %v4579_v21 }
 0x46f   : > { %v4218_v59 = vpop.f32.mrf.mxu0  ;;  %v4583_v10 = vpop.f32.mrf.mxu1 }
 0x470   : > { %5995 = vst [vmem:[%s6954_s20 + $0x1440] sm:$0xff] %v4218_v59  ;;  %5997 = vst [vmem:[%s6954_s20 + $0x1450] sm:$0xff] %v4583_v10 }
 0x471   : > { %v4220_v22 = vpop.f32.mrf.mxu0  ;;  %v4585_v23 = vpop.f32.mrf.mxu1 }
 0x472   : > { %5996 = vst [vmem:[%s6954_s20 + $0x1448] sm:$0xff] %v4220_v22  ;;  %5998 = vst.msk [vmem:[%s6954_s20 + $0x1458] sm:$0xff] %vm237_vm0, %v4585_v23 }
 0x473   : > { %v4224_v41 = vpop.f32.mrf.mxu0  ;;  %v4589_v60 = vpop.f32.mrf.mxu1 }
 0x474   : > { %5999 = vst [vmem:[%s6954_s20 + $0x1460] sm:$0xff] %v4224_v41  ;;  %6001 = vst [vmem:[%s6954_s20 + $0x1470] sm:$0xff] %v4589_v60 }
 0x475   : > { %v4226_v25 = vpop.f32.mrf.mxu0  ;;  %v4591_v51 = vpop.f32.mrf.mxu1 }
 0x476   : > { %6000 = vst [vmem:[%s6954_s20 + $0x1468] sm:$0xff] %v4226_v25  ;;  %6002 = vst.msk [vmem:[%s6954_s20 + $0x1478] sm:$0xff] %vm237_vm0, %v4591_v51 }
 0x477   : > { %v4230_v48 = vpop.f32.mrf.mxu0  ;;  %v4595_v61 = vpop.f32.mrf.mxu1 }
 0x478   : > { %6003 = vst [vmem:[%s6954_s20 + $0x1480] sm:$0xff] %v4230_v48  ;;  %6005 = vst [vmem:[%s6954_s20 + $0x1490] sm:$0xff] %v4595_v61 }
 0x479   : > { %v4232_v42 = vpop.f32.mrf.mxu0  ;;  %v4597_v49 = vpop.f32.mrf.mxu1 }
 0x47a   : > { %6004 = vst [vmem:[%s6954_s20 + $0x1488] sm:$0xff] %v4232_v42  ;;  %6006 = vst.msk [vmem:[%s6954_s20 + $0x1498] sm:$0xff] %vm237_vm0, %v4597_v49 }
 0x47b   : > { %v4236_v30 = vpop.f32.mrf.mxu0  ;;  %v4601_v62 = vpop.f32.mrf.mxu1 }
 0x47c   : > { %6007 = vst [vmem:[%s6954_s20 + $0x14a0] sm:$0xff] %v4236_v30  ;;  %6009 = vst [vmem:[%s6954_s20 + $0x14b0] sm:$0xff] %v4601_v62 }
 0x47d   : > { %v4238_v46 = vpop.f32.mrf.mxu0  ;;  %v4603_v43 = vpop.f32.mrf.mxu1 }
 0x47e   : > { %6008 = vst [vmem:[%s6954_s20 + $0x14a8] sm:$0xff] %v4238_v46  ;;  %6010 = vst.msk [vmem:[%s6954_s20 + $0x14b8] sm:$0xff] %vm237_vm0, %v4603_v43 }
 0x47f   : > { %v4242_v47 = vpop.f32.mrf.mxu0  ;;  %v4607_v63 = vpop.f32.mrf.mxu1 }
 0x480   : > { %6011 = vst [vmem:[%s6954_s20 + $0x14c0] sm:$0xff] %v4242_v47  ;;  %6013 = vst [vmem:[%s6954_s20 + $0x14d0] sm:$0xff] %v4607_v63 }
 0x481   : > { %v4244_v52 = vpop.f32.mrf.mxu0  ;;  %v4609_v35 = vpop.f32.mrf.mxu1 }
 0x482   : > { %6012 = vst [vmem:[%s6954_s20 + $0x14c8] sm:$0xff] %v4244_v52  ;;  %6014 = vst.msk [vmem:[%s6954_s20 + $0x14d8] sm:$0xff] %vm237_vm0, %v4609_v35 }
 0x483   : > { %v4248_v44 = vpop.f32.mrf.mxu0  ;;  %v4613_v1 = vpop.f32.mrf.mxu1 }
 0x484   : > { %6015 = vst [vmem:[%s6954_s20 + $0x14e0] sm:$0xff] %v4248_v44  ;;  %6017 = vst [vmem:[%s6954_s20 + $0x14f0] sm:$0xff] %v4613_v1 }
 0x485   : > { %v4250_v0 = vpop.f32.mrf.mxu0  ;;  %v4615_v27 = vpop.f32.mrf.mxu1 }
 0x486   : > { %6016 = vst [vmem:[%s6954_s20 + $0x14e8] sm:$0xff] %v4250_v0  ;;  %6018 = vst.msk [vmem:[%s6954_s20 + $0x14f8] sm:$0xff] %vm237_vm0, %v4615_v27 }
 0x487   : > { %v4254_v31 = vpop.f32.mrf.mxu0  ;;  %v4619_v34 = vpop.f32.mrf.mxu1 }
 0x488   : > { %6019 = vst [vmem:[%s6954_s20 + $0x1500] sm:$0xff] %v4254_v31  ;;  %6021 = vst [vmem:[%s6954_s20 + $0x1510] sm:$0xff] %v4619_v34 }
 0x489   : > { %v4256_v2 = vpop.f32.mrf.mxu0  ;;  %v4621_v45 = vpop.f32.mrf.mxu1 }
 0x48a   : > { %6020 = vst [vmem:[%s6954_s20 + $0x1508] sm:$0xff] %v4256_v2  ;;  %6022 = vst.msk [vmem:[%s6954_s20 + $0x1518] sm:$0xff] %vm237_vm0, %v4621_v45 }
 0x48b   : > { %v4260_v36 = vpop.f32.mrf.mxu0  ;;  %v4625_v53 = vpop.f32.mrf.mxu1 }
 0x48c   : > { %6023 = vst [vmem:[%s6954_s20 + $0x1520] sm:$0xff] %v4260_v36  ;;  %6025 = vst [vmem:[%s6954_s20 + $0x1530] sm:$0xff] %v4625_v53 }
 0x48d   : > { %v4262_v3 = vpop.f32.mrf.mxu0  ;;  %v4627_v54 = vpop.f32.mrf.mxu1 }
 0x48e   : > { %6024 = vst [vmem:[%s6954_s20 + $0x1528] sm:$0xff] %v4262_v3  ;;  %6026 = vst.msk [vmem:[%s6954_s20 + $0x1538] sm:$0xff] %vm237_vm0, %v4627_v54 }
 0x48f   : > { %v4266_v50 = vpop.f32.mrf.mxu0  ;;  %v4631_v11 = vpop.f32.mrf.mxu1 }
 0x490   : > { %6027 = vst [vmem:[%s6954_s20 + $0x1540] sm:$0xff] %v4266_v50  ;;  %6029 = vst [vmem:[%s6954_s20 + $0x1550] sm:$0xff] %v4631_v11 }
 0x491   : > { %v4268_v4 = vpop.f32.mrf.mxu0  ;;  %v4633_v28 = vpop.f32.mrf.mxu1 }
 0x492   : > { %6028 = vst [vmem:[%s6954_s20 + $0x1548] sm:$0xff] %v4268_v4  ;;  %6030 = vst.msk [vmem:[%s6954_s20 + $0x1558] sm:$0xff] %vm237_vm0, %v4633_v28 }
 0x493   : > { %v4272_v29 = vpop.f32.mrf.mxu0  ;;  %v4637_v24 = vpop.f32.mrf.mxu1 }
 0x494   : > { %6031 = vst [vmem:[%s6954_s20 + $0x1560] sm:$0xff] %v4272_v29  ;;  %6033 = vst [vmem:[%s6954_s20 + $0x1570] sm:$0xff] %v4637_v24 }
 0x495   : > { %v4274_v26 = vpop.f32.mrf.mxu0  ;;  %v4639_v32 = vpop.f32.mrf.mxu1 }
 0x496   : > { %6032 = vst [vmem:[%s6954_s20 + $0x1568] sm:$0xff] %v4274_v26  ;;  %6034 = vst.msk [vmem:[%s6954_s20 + $0x1578] sm:$0xff] %vm237_vm0, %v4639_v32 }
 0x497   : > { %v4278_v33 = vpop.f32.mrf.mxu0  ;;  %v4643_v37 = vpop.f32.mrf.mxu1 }
 0x498   : > { %6035 = vst [vmem:[%s6954_s20 + $0x1580] sm:$0xff] %v4278_v33  ;;  %6037 = vst [vmem:[%s6954_s20 + $0x1590] sm:$0xff] %v4643_v37 }
 0x499   : > { %v4280_v12 = vpop.f32.mrf.mxu0  ;;  %v4645_v55 = vpop.f32.mrf.mxu1 }
 0x49a   : > { %6036 = vst [vmem:[%s6954_s20 + $0x1588] sm:$0xff] %v4280_v12  ;;  %6038 = vst.msk [vmem:[%s6954_s20 + $0x1598] sm:$0xff] %vm237_vm0, %v4645_v55 }
 0x49b   : > { %v4284_v5 = vpop.f32.mrf.mxu0  ;;  %v4649_v13 = vpop.f32.mrf.mxu1 }
 0x49c   : > { %6039 = vst [vmem:[%s6954_s20 + $0x15a0] sm:$0xff] %v4284_v5  ;;  %6041 = vst [vmem:[%s6954_s20 + $0x15b0] sm:$0xff] %v4649_v13 }
 0x49d   : > { %v4286_v14 = vpop.f32.mrf.mxu0  ;;  %v4651_v38 = vpop.f32.mrf.mxu1 }
 0x49e   : > { %6040 = vst [vmem:[%s6954_s20 + $0x15a8] sm:$0xff] %v4286_v14  ;;  %6042 = vst.msk [vmem:[%s6954_s20 + $0x15b8] sm:$0xff] %vm237_vm0, %v4651_v38 }
 0x49f   : > { %v4290_v6 = vpop.f32.mrf.mxu0  ;;  %v4655_v56 = vpop.f32.mrf.mxu1 }
 0x4a0   : > { %6043 = vst [vmem:[%s6954_s20 + $0x15c0] sm:$0xff] %v4290_v6  ;;  %6045 = vst [vmem:[%s6954_s20 + $0x15d0] sm:$0xff] %v4655_v56 }
 0x4a1   : > { %v4292_v15 = vpop.f32.mrf.mxu0  ;;  %v4657_v16 = vpop.f32.mrf.mxu1 }
 0x4a2   : > { %6044 = vst [vmem:[%s6954_s20 + $0x15c8] sm:$0xff] %v4292_v15  ;;  %6046 = vst.msk [vmem:[%s6954_s20 + $0x15d8] sm:$0xff] %vm237_vm0, %v4657_v16 }
 0x4a3   : > { %v4296_v7 = vpop.f32.mrf.mxu0  ;;  %v4661_v17 = vpop.f32.mrf.mxu1 }
 0x4a4   : > { %6047 = vst [vmem:[%s6954_s20 + $0x15e0] sm:$0xff] %v4296_v7  ;;  %6049 = vst [vmem:[%s6954_s20 + $0x15f0] sm:$0xff] %v4661_v17 }
 0x4a5   : > { %v4298_v57 = vpop.f32.mrf.mxu0  ;;  %v4663_v39 = vpop.f32.mrf.mxu1 }
 0x4a6   : > { %6048 = vst [vmem:[%s6954_s20 + $0x15e8] sm:$0xff] %v4298_v57  ;;  %6050 = vst.msk [vmem:[%s6954_s20 + $0x15f8] sm:$0xff] %vm237_vm0, %v4663_v39 }
 0x4a7   : > { %v4302_v8 = vpop.f32.mrf.mxu0  ;;  %v4667_v18 = vpop.f32.mrf.mxu1 }
 0x4a8   : > { %6051 = vst [vmem:[%s6954_s20 + $0x1600] sm:$0xff] %v4302_v8  ;;  %6053 = vst [vmem:[%s6954_s20 + $0x1610] sm:$0xff] %v4667_v18 }
 0x4a9   : > { %v4304_v19 = vpop.f32.mrf.mxu0  ;;  %v4669_v58 = vpop.f32.mrf.mxu1 }
 0x4aa   : > { %6052 = vst [vmem:[%s6954_s20 + $0x1608] sm:$0xff] %v4304_v19  ;;  %6054 = vst.msk [vmem:[%s6954_s20 + $0x1618] sm:$0xff] %vm237_vm0, %v4669_v58 }
 0x4ab   : > { %v4308_v9 = vpop.f32.mrf.mxu0  ;;  %v4673_v20 = vpop.f32.mrf.mxu1 }
 0x4ac   : > { %6055 = vst [vmem:[%s6954_s20 + $0x1620] sm:$0xff] %v4308_v9  ;;  %6057 = vst [vmem:[%s6954_s20 + $0x1630] sm:$0xff] %v4673_v20 }
 0x4ad   : > { %v4310_v40 = vpop.f32.mrf.mxu0  ;;  %v4675_v21 = vpop.f32.mrf.mxu1 }
 0x4ae   : > { %6056 = vst [vmem:[%s6954_s20 + $0x1628] sm:$0xff] %v4310_v40  ;;  %6058 = vst.msk [vmem:[%s6954_s20 + $0x1638] sm:$0xff] %vm237_vm0, %v4675_v21 }
 0x4af   : > { %v4314_v59 = vpop.f32.mrf.mxu0  ;;  %v4679_v10 = vpop.f32.mrf.mxu1 }
 0x4b0   : > { %6059 = vst [vmem:[%s6954_s20 + $0x1640] sm:$0xff] %v4314_v59  ;;  %6061 = vst [vmem:[%s6954_s20 + $0x1650] sm:$0xff] %v4679_v10 }
 0x4b1   : > { %v4316_v22 = vpop.f32.mrf.mxu0  ;;  %v4681_v23 = vpop.f32.mrf.mxu1 }
 0x4b2   : > { %6060 = vst [vmem:[%s6954_s20 + $0x1648] sm:$0xff] %v4316_v22  ;;  %6062 = vst.msk [vmem:[%s6954_s20 + $0x1658] sm:$0xff] %vm237_vm0, %v4681_v23 }
 0x4b3   : > { %v4320_v41 = vpop.f32.mrf.mxu0  ;;  %v4685_v60 = vpop.f32.mrf.mxu1 }
 0x4b4   : > { %6063 = vst [vmem:[%s6954_s20 + $0x1660] sm:$0xff] %v4320_v41  ;;  %6065 = vst [vmem:[%s6954_s20 + $0x1670] sm:$0xff] %v4685_v60 }
 0x4b5   : > { %v4322_v25 = vpop.f32.mrf.mxu0  ;;  %v4687_v51 = vpop.f32.mrf.mxu1 }
 0x4b6   : > { %6064 = vst [vmem:[%s6954_s20 + $0x1668] sm:$0xff] %v4322_v25  ;;  %6066 = vst.msk [vmem:[%s6954_s20 + $0x1678] sm:$0xff] %vm237_vm0, %v4687_v51 }
 0x4b7   : > { %v4326_v48 = vpop.f32.mrf.mxu0  ;;  %v4691_v61 = vpop.f32.mrf.mxu1 }
 0x4b8   : > { %6067 = vst [vmem:[%s6954_s20 + $0x1680] sm:$0xff] %v4326_v48  ;;  %6069 = vst [vmem:[%s6954_s20 + $0x1690] sm:$0xff] %v4691_v61 }
 0x4b9   : > { %v4328_v42 = vpop.f32.mrf.mxu0  ;;  %v4693_v49 = vpop.f32.mrf.mxu1 }
 0x4ba   : > { %6068 = vst [vmem:[%s6954_s20 + $0x1688] sm:$0xff] %v4328_v42  ;;  %6070 = vst.msk [vmem:[%s6954_s20 + $0x1698] sm:$0xff] %vm237_vm0, %v4693_v49 }
 0x4bb   : > { %v4332_v30 = vpop.f32.mrf.mxu0  ;;  %v4697_v62 = vpop.f32.mrf.mxu1 }
 0x4bc   : > { %6071 = vst [vmem:[%s6954_s20 + $0x16a0] sm:$0xff] %v4332_v30  ;;  %6073 = vst [vmem:[%s6954_s20 + $0x16b0] sm:$0xff] %v4697_v62 }
 0x4bd   : > { %v4334_v46 = vpop.f32.mrf.mxu0  ;;  %v4699_v43 = vpop.f32.mrf.mxu1 }
 0x4be   : > { %6072 = vst [vmem:[%s6954_s20 + $0x16a8] sm:$0xff] %v4334_v46  ;;  %6074 = vst.msk [vmem:[%s6954_s20 + $0x16b8] sm:$0xff] %vm237_vm0, %v4699_v43 }
 0x4bf   : > { %v4338_v47 = vpop.f32.mrf.mxu0  ;;  %v4703_v63 = vpop.f32.mrf.mxu1 }
 0x4c0   : > { %6075 = vst [vmem:[%s6954_s20 + $0x16c0] sm:$0xff] %v4338_v47  ;;  %6077 = vst [vmem:[%s6954_s20 + $0x16d0] sm:$0xff] %v4703_v63 }
 0x4c1   : > { %v4340_v52 = vpop.f32.mrf.mxu0  ;;  %v4705_v35 = vpop.f32.mrf.mxu1 }
 0x4c2   : > { %6076 = vst [vmem:[%s6954_s20 + $0x16c8] sm:$0xff] %v4340_v52  ;;  %6078 = vst.msk [vmem:[%s6954_s20 + $0x16d8] sm:$0xff] %vm237_vm0, %v4705_v35 }
 0x4c3   : > { %v4344_v44 = vpop.f32.mrf.mxu0  ;;  %v4709_v1 = vpop.f32.mrf.mxu1 }
 0x4c4   : > { %6079 = vst [vmem:[%s6954_s20 + $0x16e0] sm:$0xff] %v4344_v44  ;;  %6081 = vst [vmem:[%s6954_s20 + $0x16f0] sm:$0xff] %v4709_v1 }
 0x4c5   : > { %v4346_v0 = vpop.f32.mrf.mxu0  ;;  %v4711_v27 = vpop.f32.mrf.mxu1 }
 0x4c6   : > { %6080 = vst [vmem:[%s6954_s20 + $0x16e8] sm:$0xff] %v4346_v0  ;;  %6082 = vst.msk [vmem:[%s6954_s20 + $0x16f8] sm:$0xff] %vm237_vm0, %v4711_v27 }
 0x4c7   : > { %v4350_v31 = vpop.f32.mrf.mxu0  ;;  %v4715_v34 = vpop.f32.mrf.mxu1 }
 0x4c8   : > { %6083 = vst [vmem:[%s6954_s20 + $0x1700] sm:$0xff] %v4350_v31  ;;  %6085 = vst [vmem:[%s6954_s20 + $0x1710] sm:$0xff] %v4715_v34 }
 0x4c9   : > { %v4352_v2 = vpop.f32.mrf.mxu0  ;;  %v4717_v45 = vpop.f32.mrf.mxu1 }
 0x4ca   : > { %6084 = vst [vmem:[%s6954_s20 + $0x1708] sm:$0xff] %v4352_v2  ;;  %6086 = vst.msk [vmem:[%s6954_s20 + $0x1718] sm:$0xff] %vm237_vm0, %v4717_v45 }
 0x4cb   : > { %v4356_v36 = vpop.f32.mrf.mxu0  ;;  %v4721_v53 = vpop.f32.mrf.mxu1 }
 0x4cc   : > { %6087 = vst [vmem:[%s6954_s20 + $0x1720] sm:$0xff] %v4356_v36  ;;  %6089 = vst [vmem:[%s6954_s20 + $0x1730] sm:$0xff] %v4721_v53 }
 0x4cd   : > { %v4358_v3 = vpop.f32.mrf.mxu0  ;;  %v4723_v54 = vpop.f32.mrf.mxu1 }
 0x4ce   : > { %6088 = vst [vmem:[%s6954_s20 + $0x1728] sm:$0xff] %v4358_v3  ;;  %6090 = vst.msk [vmem:[%s6954_s20 + $0x1738] sm:$0xff] %vm237_vm0, %v4723_v54 }
 0x4cf   : > { %v4362_v50 = vpop.f32.mrf.mxu0  ;;  %v4727_v11 = vpop.f32.mrf.mxu1 }
 0x4d0   : > { %6091 = vst [vmem:[%s6954_s20 + $0x1740] sm:$0xff] %v4362_v50  ;;  %6093 = vst [vmem:[%s6954_s20 + $0x1750] sm:$0xff] %v4727_v11 }
 0x4d1   : > { %v4364_v4 = vpop.f32.mrf.mxu0  ;;  %v4729_v28 = vpop.f32.mrf.mxu1 }
 0x4d2   : > { %6092 = vst [vmem:[%s6954_s20 + $0x1748] sm:$0xff] %v4364_v4  ;;  %6094 = vst.msk [vmem:[%s6954_s20 + $0x1758] sm:$0xff] %vm237_vm0, %v4729_v28 }
 0x4d3   : > { %v4368_v29 = vpop.f32.mrf.mxu0  ;;  %v4733_v24 = vpop.f32.mrf.mxu1 }
 0x4d4   : > { %6095 = vst [vmem:[%s6954_s20 + $0x1760] sm:$0xff] %v4368_v29  ;;  %6097 = vst [vmem:[%s6954_s20 + $0x1770] sm:$0xff] %v4733_v24 }
 0x4d5   : > { %v4370_v26 = vpop.f32.mrf.mxu0  ;;  %v4735_v32 = vpop.f32.mrf.mxu1 }
 0x4d6   : > { %6096 = vst [vmem:[%s6954_s20 + $0x1768] sm:$0xff] %v4370_v26  ;;  %6098 = vst.msk [vmem:[%s6954_s20 + $0x1778] sm:$0xff] %vm237_vm0, %v4735_v32 }
 0x4d7   : > { %v4374_v33 = vpop.f32.mrf.mxu0  ;;  %v4739_v37 = vpop.f32.mrf.mxu1 }
 0x4d8   : > { %6099 = vst [vmem:[%s6954_s20 + $0x1780] sm:$0xff] %v4374_v33  ;;  %6101 = vst [vmem:[%s6954_s20 + $0x1790] sm:$0xff] %v4739_v37 }
 0x4d9   : > { %v4376_v12 = vpop.f32.mrf.mxu0  ;;  %v4741_v55 = vpop.f32.mrf.mxu1 }
 0x4da   : > { %6100 = vst [vmem:[%s6954_s20 + $0x1788] sm:$0xff] %v4376_v12  ;;  %6102 = vst.msk [vmem:[%s6954_s20 + $0x1798] sm:$0xff] %vm237_vm0, %v4741_v55 }
 0x4db   : > { %v4380_v5 = vpop.f32.mrf.mxu0  ;;  %v4745_v13 = vpop.f32.mrf.mxu1 }
 0x4dc   : > { %6103 = vst [vmem:[%s6954_s20 + $0x17a0] sm:$0xff] %v4380_v5  ;;  %6105 = vst [vmem:[%s6954_s20 + $0x17b0] sm:$0xff] %v4745_v13 }
 0x4dd   : > { %v4382_v14 = vpop.f32.mrf.mxu0  ;;  %v4747_v38 = vpop.f32.mrf.mxu1 }
 0x4de   : > { %6104 = vst [vmem:[%s6954_s20 + $0x17a8] sm:$0xff] %v4382_v14  ;;  %6106 = vst.msk [vmem:[%s6954_s20 + $0x17b8] sm:$0xff] %vm237_vm0, %v4747_v38 }
 0x4df   : > { %v4386_v6 = vpop.f32.mrf.mxu0  ;;  %v4751_v56 = vpop.f32.mrf.mxu1 }
 0x4e0   : > { %6107 = vst [vmem:[%s6954_s20 + $0x17c0] sm:$0xff] %v4386_v6  ;;  %6109 = vst [vmem:[%s6954_s20 + $0x17d0] sm:$0xff] %v4751_v56 }
 0x4e1   : > { %v4388_v15 = vpop.f32.mrf.mxu0  ;;  %v4753_v16 = vpop.f32.mrf.mxu1 }
 0x4e2   : > { %6108 = vst [vmem:[%s6954_s20 + $0x17c8] sm:$0xff] %v4388_v15  ;;  %6110 = vst.msk [vmem:[%s6954_s20 + $0x17d8] sm:$0xff] %vm237_vm0, %v4753_v16 }
 0x4e3   : > { %v4392_v7 = vpop.f32.mrf.mxu0  ;;  %v4757_v17 = vpop.f32.mrf.mxu1 }
 0x4e4   : > { %6111 = vst [vmem:[%s6954_s20 + $0x17e0] sm:$0xff] %v4392_v7  ;;  %6113 = vst [vmem:[%s6954_s20 + $0x17f0] sm:$0xff] %v4757_v17 }
 0x4e5   : > { %v4394_v57 = vpop.f32.mrf.mxu0  ;;  %v4759_v39 = vpop.f32.mrf.mxu1 }
 0x4e6   : > { %6112 = vst [vmem:[%s6954_s20 + $0x17e8] sm:$0xff] %v4394_v57  ;;  %6114 = vst.msk [vmem:[%s6954_s20 + $0x17f8] sm:$0xff] %vm237_vm0, %v4759_v39 }
 0x4e7   : > { %v4398_v8 = vpop.f32.mrf.mxu0  ;;  %v4763_v18 = vpop.f32.mrf.mxu1 }
 0x4e8   : > { %6115 = vst [vmem:[%s6954_s20 + $0x1800] sm:$0xff] %v4398_v8  ;;  %6117 = vst [vmem:[%s6954_s20 + $0x1810] sm:$0xff] %v4763_v18 }
 0x4e9   : > { %v4400_v19 = vpop.f32.mrf.mxu0  ;;  %v4765_v58 = vpop.f32.mrf.mxu1 }
 0x4ea   : > { %6116 = vst [vmem:[%s6954_s20 + $0x1808] sm:$0xff] %v4400_v19  ;;  %6118 = vst.msk [vmem:[%s6954_s20 + $0x1818] sm:$0xff] %vm237_vm0, %v4765_v58 }
 0x4eb   : > { %v4404_v9 = vpop.f32.mrf.mxu0  ;;  %v4769_v20 = vpop.f32.mrf.mxu1 }
 0x4ec   : > { %6119 = vst [vmem:[%s6954_s20 + $0x1820] sm:$0xff] %v4404_v9  ;;  %6121 = vst [vmem:[%s6954_s20 + $0x1830] sm:$0xff] %v4769_v20 }
 0x4ed   : > { %v4406_v40 = vpop.f32.mrf.mxu0  ;;  %v4771_v21 = vpop.f32.mrf.mxu1 }
 0x4ee   : > { %6120 = vst [vmem:[%s6954_s20 + $0x1828] sm:$0xff] %v4406_v40  ;;  %6122 = vst.msk [vmem:[%s6954_s20 + $0x1838] sm:$0xff] %vm237_vm0, %v4771_v21 }
 0x4ef   : > { %v4410_v59 = vpop.f32.mrf.mxu0  ;;  %v4775_v10 = vpop.f32.mrf.mxu1 }
 0x4f0   : > { %6123 = vst [vmem:[%s6954_s20 + $0x1840] sm:$0xff] %v4410_v59  ;;  %6125 = vst [vmem:[%s6954_s20 + $0x1850] sm:$0xff] %v4775_v10 }
 0x4f1   : > { %v4412_v22 = vpop.f32.mrf.mxu0  ;;  %v4777_v23 = vpop.f32.mrf.mxu1 }
 0x4f2   : > { %6124 = vst [vmem:[%s6954_s20 + $0x1848] sm:$0xff] %v4412_v22  ;;  %6126 = vst.msk [vmem:[%s6954_s20 + $0x1858] sm:$0xff] %vm237_vm0, %v4777_v23 }
 0x4f3   : > { %v4416_v41 = vpop.f32.mrf.mxu0  ;;  %v4781_v60 = vpop.f32.mrf.mxu1 }
 0x4f4   : > { %6127 = vst [vmem:[%s6954_s20 + $0x1860] sm:$0xff] %v4416_v41  ;;  %6129 = vst [vmem:[%s6954_s20 + $0x1870] sm:$0xff] %v4781_v60 }
 0x4f5   : > { %v4418_v25 = vpop.f32.mrf.mxu0  ;;  %v4783_v51 = vpop.f32.mrf.mxu1 }
 0x4f6   : > { %6128 = vst [vmem:[%s6954_s20 + $0x1868] sm:$0xff] %v4418_v25  ;;  %6130 = vst.msk [vmem:[%s6954_s20 + $0x1878] sm:$0xff] %vm237_vm0, %v4783_v51 }
 0x4f7   : > { %v4422_v48 = vpop.f32.mrf.mxu0  ;;  %v4787_v61 = vpop.f32.mrf.mxu1 }
 0x4f8   : > { %6131 = vst [vmem:[%s6954_s20 + $0x1880] sm:$0xff] %v4422_v48  ;;  %6133 = vst [vmem:[%s6954_s20 + $0x1890] sm:$0xff] %v4787_v61 }
 0x4f9   : > { %v4424_v42 = vpop.f32.mrf.mxu0  ;;  %v4789_v49 = vpop.f32.mrf.mxu1 }
 0x4fa   : > { %6132 = vst [vmem:[%s6954_s20 + $0x1888] sm:$0xff] %v4424_v42  ;;  %6134 = vst.msk [vmem:[%s6954_s20 + $0x1898] sm:$0xff] %vm237_vm0, %v4789_v49 }
 0x4fb   : > { %v4428_v30 = vpop.f32.mrf.mxu0  ;;  %v4793_v62 = vpop.f32.mrf.mxu1 }
 0x4fc   : > { %6135 = vst [vmem:[%s6954_s20 + $0x18a0] sm:$0xff] %v4428_v30  ;;  %6137 = vst [vmem:[%s6954_s20 + $0x18b0] sm:$0xff] %v4793_v62 }
 0x4fd   : > { %v4430_v46 = vpop.f32.mrf.mxu0  ;;  %v4795_v43 = vpop.f32.mrf.mxu1 }
 0x4fe   : > { %6136 = vst [vmem:[%s6954_s20 + $0x18a8] sm:$0xff] %v4430_v46  ;;  %6138 = vst.msk [vmem:[%s6954_s20 + $0x18b8] sm:$0xff] %vm237_vm0, %v4795_v43 }
 0x4ff   : > { %v4434_v47 = vpop.f32.mrf.mxu0  ;;  %v4799_v63 = vpop.f32.mrf.mxu1 }
 0x500   : > { %6139 = vst [vmem:[%s6954_s20 + $0x18c0] sm:$0xff] %v4434_v47  ;;  %6141 = vst [vmem:[%s6954_s20 + $0x18d0] sm:$0xff] %v4799_v63 }
 0x501   : > { %v4436_v52 = vpop.f32.mrf.mxu0  ;;  %v4801_v35 = vpop.f32.mrf.mxu1 }
 0x502   : > { %6140 = vst [vmem:[%s6954_s20 + $0x18c8] sm:$0xff] %v4436_v52  ;;  %6142 = vst.msk [vmem:[%s6954_s20 + $0x18d8] sm:$0xff] %vm237_vm0, %v4801_v35 }
 0x503   : > { %v4440_v44 = vpop.f32.mrf.mxu0  ;;  %v4805_v1 = vpop.f32.mrf.mxu1 }
 0x504   : > { %6143 = vst [vmem:[%s6954_s20 + $0x18e0] sm:$0xff] %v4440_v44  ;;  %6145 = vst [vmem:[%s6954_s20 + $0x18f0] sm:$0xff] %v4805_v1 }
 0x505   : > { %v4442_v0 = vpop.f32.mrf.mxu0  ;;  %v4807_v27 = vpop.f32.mrf.mxu1 }
 0x506   : > { %6144 = vst [vmem:[%s6954_s20 + $0x18e8] sm:$0xff] %v4442_v0  ;;  %6146 = vst.msk [vmem:[%s6954_s20 + $0x18f8] sm:$0xff] %vm237_vm0, %v4807_v27 }
 0x507   : > { %6324 = shalt.err (!%p6321_p3)
}
 0x508   : > { %s6325_s25 = scalar_lea.hbm %s8636_s5, 102400  ;;  %s6329_s8 = scalar_lea.hbm %s8689_s3, 204800 }
 0x509   : > { %p6326_p11 = scmp.ne.s32.totalorder %s8636_s5, %s6325_s25  ;;  %p6330_p4 = scmp.lt.s32.totalorder %s8636_s5, %s8689_s3 }
 0x50a   : > { %p6331_p6 = scmp.lt.s32.totalorder %s6329_s8, %s6325_s25 }
 0x50b   : > { %p6327_p9 = pnand %p6326_p11, %p8704_p2 }
 0x50c   : > { %p6332_p8 = por %p6331_p6, %p6330_p4 }
 0x50d   : > { %p6328_p1 = pneg %p6327_p9 }
 0x50f   : > { %p6333_p10 = pnand %p6332_p8, %p6328_p1 }
 0x511   : > { %6336 = shalt.err (!%p6333_p10)
}
 0x512   : > { %s6390_s18 = smov 512   ;;  %s6391_s20 = smov 32  }
 0x513   : > { %6166 = dma.vmem_to_hbm [thread:$0]  (%p8704_p2), %s8640_s28, 102400, %s8636_s5, %s5012_s16, %s6390_s18, %s6390_s18, %s6391_s20  }
 0x514 PF: > { %s5041_s27 = sand.u32 1, %s6367_s12   ;;  %p8705_p7 = scmp.ne.s32.totalorder %s8695_s19, 0 }
 0x515   : > { %p8706_p12 = scmp.ge.s32.totalorder %s6379_s15, 2  ;;  %s5042_s29 = scalar_lea.sflag [#allocation4], %s5041_s27 }
 0x517   : > { %p6180_p13 = pnand %p8706_p12, %p8705_p7 }
 0x519   : > { %p6181_p0 = pneg %p6180_p13 }
 0x51b   : > { %6362 = dma.done.wait (%p6181_p0), %s5042_s29, 102400  }
 0x51c   : > { %6364 = vsyncadd (%p6181_p0), %s5042_s29, 4294864896  ;;  %p17_p5 = scmp.ge.s32.totalorder %s6487_s9, 4   ;;  %s8707_s12 = smov %s6371_s13 }
 0x51d   : > { %s8708_s13 = smov %s6375_s14  ;;  %s8709_s14 = smov %s6496_s17 }
 0x51e   : > { %s8710_s15 = smov %s6487_s9  ;;  %19 = sbr.rel (!%p17_p5) target bundleno = 6 (0x6), region = 88 }
 0x523   :  { %5047 = vsyncpa [#allocation3], 1 }
 0x524   :  { %5049 = vsyncpa [#allocation3 + $0x1], 1 }
 0x525   :  { %5050 = vsyncpa [#allocation6], 1 }
 0x526   :  { %5051 = vsyncpa [#allocation4], 1 }
 0x527   :  { %5053 = vsyncpa [#allocation4 + $0x1], 1 }

</bundles_post_ra>
